<compile_context>
chip_gen: v7x
topology: tpu7x:2x2x1
jax: 0.10.0
libtpu: 0.0.40
codegen_flags: <defaults>
</compile_context>

<pallas_src>
import functools

import jax
import jax.numpy as jnp
import numpy as np
from jax.experimental import pallas as pl
from jax.experimental.pallas import tpu as pltpu


def _round_up(v, m):
    return ((v + m - 1) // m) * m


# ---------------------------------------------------------------------------
# Pallas kernel: one ARMAConv (stacks packed along lanes) + fused epilogue.
# Per grid step (t, i):
#   out[rows_i] = act(A[rows_i, :] @ z_t + (x @ W_root_packed + bias)[rows_i])
#   z_{t+1}[rows_i] = out[rows_i] @ W_blockdiag          (staged for next layer)
# z_t lives in a 2-deep VMEM double buffer selected by layer parity.
# ---------------------------------------------------------------------------
def _arma_kernel(a_ref, x_ref, wi_ref, wd_ref, wr_ref, b_ref, sc_ref, sh_ref,
                 o_ref, z0_ref, z1_ref, rootb_ref, *,
                 tile_m, num_tiles, num_stacks, f_out, num_layers,
                 act_relu, epilogue):
    t = pl.program_id(0)                       # ARMA layer index (true recurrence)
    i = pl.program_id(1)                       # row-tile index of A
    row0 = pl.multiple_of(i * tile_m, tile_m)
    rows = pl.ds(row0, tile_m)

    # ---- first grid step only: hoisted, stack-shared terms (computed once) ---
    @pl.when(jnp.logical_and(t == 0, i == 0))
    def _prime():
        def body(j, carry):
            r0 = pl.multiple_of(j * tile_m, tile_m)
            rj = pl.ds(r0, tile_m)
            xs = x_ref[rj, :]
            rootb_ref[rj, :] = (
                jnp.dot(xs, wr_ref[...], preferred_element_type=jnp.float32)
                + b_ref[...])
            z0_ref[rj, :] = jnp.dot(
                xs, wi_ref[...],
                preferred_element_type=jnp.float32).astype(jnp.bfloat16)
            return carry
        jax.lax.fori_loop(0, num_tiles, body, 0, unroll=num_tiles <= 8)

    # ---- per-tile layer update (parameterized by z src/dst parity buffers) ---
    def tile_step(z_src_ref, z_dst_ref):
        # one wide bf16 MXU matmul, f32 accumulation
        out = jnp.dot(a_ref[...], z_src_ref[...],
                      preferred_element_type=jnp.float32)
        out = out + rootb_ref[rows, :]
        if act_relu:                           # PyG: act at end of EVERY layer
            out = jnp.maximum(out, 0.0)

        # stage this tile's slice of the NEXT layer's MXU operand (overlaps with
        # the remaining A row-slab streaming of the current layer)
        @pl.when(t < num_layers - 1)
        def _stage_next():
            z_dst_ref[rows, :] = jnp.dot(
                out.astype(jnp.bfloat16), wd_ref[...],
                preferred_element_type=jnp.float32).astype(jnp.bfloat16)

        # last layer only: stack mean + fused BN/ReLU or sigmoid, single HBM write
        @pl.when(t == num_layers - 1)
        def _epilogue():
            acc = out[:, 0:f_out]
            for k in range(1, num_stacks):
                acc = acc + out[:, k * f_out:(k + 1) * f_out]
            y = acc * (1.0 / num_stacks)
            y = y * sc_ref[...] + sh_ref[...]
            if epilogue == "relu":
                y = jnp.maximum(y, 0.0)
            elif epilogue == "sigmoid":
                y = 1.0 / (1.0 + jnp.exp(-y))
            o_ref[...] = y.astype(o_ref.dtype)

    parity_even = jax.lax.rem(t, 2) == 0

    @pl.when(parity_even)
    def _even():                               # even layers read z0, stage into z1
        tile_step(z0_ref, z1_ref)

    @pl.when(jnp.logical_not(parity_even))
    def _odd():                                # odd layers read z1, stage into z0
        tile_step(z1_ref, z0_ref)


# ---------------------------------------------------------------------------
# Wrapper: one ARMAConv as a single pallas_call (stacks packed, row-tiled A).
# ---------------------------------------------------------------------------
def _arma_conv_pallas(a_bf16, x_pad, conv_p, *, num_layers, tile_m,
                      act_relu, ep_scale, ep_shift, epilogue):
    n_pad = a_bf16.shape[0]
    num_tiles = n_pad // tile_m
    num_stacks, f_in, f_out = conv_p["init_weight"].shape

    f_in_p = max(8, _round_up(f_in, 8))                      # sublane-friendly K dim
    w_pack = max(128, _round_up(num_stacks * f_out, 128))    # lane-dense packed width
    pad_c = w_pack - num_stacks * f_out

    # Pack per-stack parameters along the lane dim (stack-major column blocks).
    wi = jnp.transpose(conv_p["init_weight"], (1, 0, 2)).reshape(f_in, num_stacks * f_out)
    wr = jnp.transpose(conv_p["root_weight"], (1, 0, 2)).reshape(f_in, num_stacks * f_out)
    b = conv_p["bias"].reshape(1, num_stacks * f_out)
    wd = jnp.zeros((num_stacks * f_out, num_stacks * f_out), jnp.float32)
    for k in range(num_stacks):                              # block-diagonal shared weight
        wd = wd.at[k * f_out:(k + 1) * f_out, k * f_out:(k + 1) * f_out].set(
            conv_p["weight"][k])

    wi = jnp.pad(wi, ((0, f_in_p - f_in), (0, pad_c))).astype(jnp.bfloat16)
    wr = jnp.pad(wr, ((0, f_in_p - f_in), (0, pad_c))).astype(jnp.bfloat16)
    wd = jnp.pad(wd, ((0, pad_c), (0, pad_c))).astype(jnp.bfloat16)
    b = jnp.pad(b, ((0, 0), (0, pad_c))).astype(jnp.float32)
    x_in = jnp.pad(x_pad.astype(jnp.float32),
                   ((0, 0), (0, f_in_p - f_in))).astype(jnp.bfloat16)
    sc = ep_scale.reshape(1, f_out).astype(jnp.float32)
    sh = ep_shift.reshape(1, f_out).astype(jnp.float32)

    kernel = functools.partial(
        _arma_kernel, tile_m=tile_m, num_tiles=num_tiles, num_stacks=num_stacks,
        f_out=f_out, num_layers=num_layers, act_relu=act_relu, epilogue=epilogue)

    grid_spec = pltpu.PrefetchScalarGridSpec(
        num_scalar_prefetch=0,
        grid=(num_layers, num_tiles),
        in_specs=[
            pl.BlockSpec((tile_m, n_pad), lambda t, i: (i, 0)),    # A row slab (streamed)
            pl.BlockSpec((n_pad, f_in_p), lambda t, i: (0, 0)),    # x        (fetched once)
            pl.BlockSpec((f_in_p, w_pack), lambda t, i: (0, 0)),   # W_init packed
            pl.BlockSpec((w_pack, w_pack), lambda t, i: (0, 0)),   # W shared (block-diag)
            pl.BlockSpec((f_in_p, w_pack), lambda t, i: (0, 0)),   # W_root packed
            pl.BlockSpec((1, w_pack), lambda t, i: (0, 0)),        # bias packed
            pl.BlockSpec((1, f_out), lambda t, i: (0, 0)),         # epilogue scale
            pl.BlockSpec((1, f_out), lambda t, i: (0, 0)),         # epilogue shift
        ],
        out_specs=pl.BlockSpec((tile_m, f_out), lambda t, i: (i, 0)),
        scratch_shapes=[
            pltpu.VMEM((n_pad, w_pack), jnp.bfloat16),   # z buffer 0 (even layers' rhs)
            pltpu.VMEM((n_pad, w_pack), jnp.bfloat16),   # z buffer 1 (odd layers' rhs)
            pltpu.VMEM((n_pad, w_pack), jnp.float32),    # hoisted root + bias
        ],
    )

    weights_bytes = (2 * f_in_p * w_pack + w_pack * w_pack + w_pack) * 2 + 2 * f_out * 4
    vmem_est = (2 * tile_m * n_pad * 2              # A slab, double-buffered, bf16
                + 2 * n_pad * w_pack * 2            # z double buffer (bf16)
                + n_pad * w_pack * 4                # root + bias scratch (f32)
                + 2 * n_pad * f_in_p * 2            # x (double-buffered)
                + 2 * weights_bytes
                + 2 * tile_m * f_out * 4)           # output block, double-buffered
    vmem_limit = int(min(max(2 * vmem_est, 32 * 1024 * 1024), 60 * 1024 * 1024))

    flops = (2 * num_layers * n_pad * n_pad * w_pack          # A @ z per layer
             + 2 * (num_layers - 1) * n_pad * w_pack * w_pack  # next-layer staging
             + 4 * n_pad * f_in_p * w_pack)                    # priming (init + root)
    bytes_accessed = ((num_layers if num_tiles > 1 else 1) * n_pad * n_pad * 2
                      + n_pad * f_in_p * 2
                      + n_pad * f_out * 4
                      + 2 * w_pack * w_pack)
    transcendentals = n_pad * f_out if epilogue == "sigmoid" else 0

    out = pl.pallas_call(
        kernel,
        out_shape=jax.ShapeDtypeStruct((n_pad, f_out), jnp.float32),
        grid_spec=grid_spec,
        compiler_params=pltpu.CompilerParams(
            dimension_semantics=("arbitrary", "arbitrary"),
            vmem_limit_bytes=vmem_limit),
        cost_estimate=pl.CostEstimate(flops=int(flops),
                                      transcendentals=int(transcendentals),
                                      bytes_accessed=int(bytes_accessed)),
    )(a_bf16, x_in, wi, wd, wr, b, sc, sh)

    return out


# ---------------------------------------------------------------------------
# Full ArmaNet_bench forward.
# ---------------------------------------------------------------------------
def arma_net_bench_forward(x, edge_index, edge_weight, params, *,
                           num_layers=4, tile_m=128):
    n = x.shape[0]

    # glue: gcn_norm (no self loops) -> dense, padded, bf16 adjacency (target-major).
    row, col = edge_index[0], edge_index[1]
    w = edge_weight.astype(jnp.float32)
    deg = jnp.zeros((n,), jnp.float32).at[col].add(w)
    dinv = jnp.where(deg > 0, jax.lax.rsqrt(deg), 0.0)
    norm = dinv[row] * w * dinv[col]
    a = jnp.zeros((n, n), jnp.float32).at[col, row].add(norm)

    n_pad = _round_up(n, tile_m)
    a = jnp.pad(a, ((0, n_pad - n), (0, n_pad - n))).astype(jnp.bfloat16)
    x_pad = jnp.pad(x.astype(jnp.float32), ((0, n_pad - n), (0, 0)))

    # conv1 (act=relu) + BatchNorm1d(eval) + ReLU fused into the kernel epilogue.
    bn = params["bn1"]
    bn_scale = bn["gamma"] * jax.lax.rsqrt(bn["running_var"] + 1e-5)
    bn_shift = bn["beta"] - bn["running_mean"] * bn_scale
    h = _arma_conv_pallas(a, x_pad, params["conv1"], num_layers=num_layers,
                          tile_m=tile_m, act_relu=True,
                          ep_scale=bn_scale, ep_shift=bn_shift, epilogue="relu")

    # conv2 (act=None) + final sigmoid fused into the kernel epilogue.
    f_out2 = params["conv2"]["init_weight"].shape[-1]
    y = _arma_conv_pallas(a, h, params["conv2"], num_layers=num_layers,
                          tile_m=tile_m, act_relu=False,
                          ep_scale=jnp.ones((f_out2,), jnp.float32),
                          ep_shift=jnp.zeros((f_out2,), jnp.float32),
                          epilogue="sigmoid")
    return y[:n]


# ---------------------------------------------------------------------------
# Pure-JAX (f32) reference for correctness checking.
# ---------------------------------------------------------------------------
def _arma_conv_ref(A, x, p, *, num_layers, act_relu):
    K = p["init_weight"].shape[0]
    outs = []
    for k in range(K):
        rootb = x @ p["root_weight"][k] + p["bias"][k]
        out = A @ (x @ p["init_weight"][k]) + rootb
        if act_relu:
            out = jnp.maximum(out, 0.0)
        for _ in range(1, num_layers):
            out = A @ (out @ p["weight"][k]) + rootb
            if act_relu:
                out = jnp.maximum(out, 0.0)
        outs.append(out)
    return jnp.mean(jnp.stack(outs, 0), axis=0)


def _ref_forward(x, edge_index, edge_weight, params, *, num_layers):
    n = x.shape[0]
    row, col = edge_index[0], edge_index[1]
    w = edge_weight.astype(jnp.float32)
    deg = jnp.zeros((n,), jnp.float32).at[col].add(w)
    dinv = jnp.where(deg > 0, jax.lax.rsqrt(deg), 0.0)
    norm = dinv[row] * w * dinv[col]
    A = jnp.zeros((n, n), jnp.float32).at[col, row].add(norm)

    h = _arma_conv_ref(A, x.astype(jnp.float32), params["conv1"],
                       num_layers=num_layers, act_relu=True)
    bn = params["bn1"]
    h = (h - bn["running_mean"]) * jax.lax.rsqrt(bn["running_var"] + 1e-5)
    h = h * bn["gamma"] + bn["beta"]
    h = jnp.maximum(h, 0.0)
    y = _arma_conv_ref(A, h, params["conv2"],
                       num_layers=num_layers, act_relu=False)
    return 1.0 / (1.0 + jnp.exp(-y))


if __name__ == "__main__":
    N, E = 200, 800          # nodes, edges (N not a tile multiple -> exercises padding)
    F_IN = 1                 # num_node_features
    HIDDEN = 16              # conv1 out_channels
    NUM_CLASSES = 1          # conv2 out_channels
    NUM_STACKS = 3
    NUM_LAYERS = 4
    TILE_M = 128             # -> n_pad = 256, 2 row tiles (exercises A streaming)

    key = jax.random.PRNGKey(0)
    keys = jax.random.split(key, 16)

    x = jax.random.normal(keys[0], (N, F_IN), dtype=jnp.float32)
    edge_index = jnp.stack([
        jax.random.randint(keys[1], (E,), 0, N),
        jax.random.randint(keys[2], (E,), 0, N),
    ]).astype(jnp.int32)
    edge_weight = jax.random.uniform(keys[3], (E,), minval=0.5, maxval=2.0,
                                     dtype=jnp.float32)

    def glorot(k, shape):
        fan_in, fan_out = shape[-2], shape[-1]
        lim = float(np.sqrt(6.0 / (fan_in + fan_out)))
        return jax.random.uniform(k, shape, minval=-lim, maxval=lim,
                                  dtype=jnp.float32)

    params = {
        "conv1": {
            "init_weight": glorot(keys[4], (NUM_STACKS, F_IN, HIDDEN)),
            "weight":      glorot(keys[5], (NUM_STACKS, HIDDEN, HIDDEN)),
            "root_weight": glorot(keys[6], (NUM_STACKS, F_IN, HIDDEN)),
            "bias":        0.1 * jax.random.normal(keys[7], (NUM_STACKS, HIDDEN),
                                                   dtype=jnp.float32),
        },
        "bn1": {
            "gamma":        jax.random.uniform(keys[8], (HIDDEN,), minval=0.5,
                                               maxval=1.5, dtype=jnp.float32),
            "beta":         0.1 * jax.random.normal(keys[9], (HIDDEN,),
                                                    dtype=jnp.float32),
            "running_mean": 0.2 * jax.random.normal(keys[10], (HIDDEN,),
                                                    dtype=jnp.float32),
            "running_var":  jax.random.uniform(keys[11], (HIDDEN,), minval=0.5,
                                               maxval=1.5, dtype=jnp.float32),
        },
        "conv2": {
            "init_weight": glorot(keys[12], (NUM_STACKS, HIDDEN, NUM_CLASSES)),
            "weight":      glorot(keys[13], (NUM_STACKS, NUM_CLASSES, NUM_CLASSES)),
            "root_weight": glorot(keys[14], (NUM_STACKS, HIDDEN, NUM_CLASSES)),
            "bias":        0.1 * jax.random.normal(keys[15], (NUM_STACKS, NUM_CLASSES),
                                                   dtype=jnp.float32),
        },
    }

    fwd = jax.jit(functools.partial(arma_net_bench_forward,
                                    num_layers=NUM_LAYERS, tile_m=TILE_M))
    y = jax.block_until_ready(fwd(x, edge_index, edge_weight, params))

    y_ref = _ref_forward(x, edge_index, edge_weight, params, num_layers=NUM_LAYERS)
    assert y.shape == (N, NUM_CLASSES)
    # bf16 A / bf16 MXU operands (f32 accumulation) vs. pure-f32 reference.
    np.testing.assert_allclose(np.asarray(y), np.asarray(y_ref),
                               rtol=3e-2, atol=3e-2)

    print("KERNEL_OK")
</pallas_src>

<mosaic_0001>
module attributes {stable_mosaic.version = 11 : i64} {
  func.func private @main(%arg0: i32) attributes {dimension_semantics = [#tpu.dimension_semantics<core_parallel>], iteration_bounds = array<i64: 2>, tpu.core_type = #tpu.core_type<sc_scalar_subcore>, window_params = []} {
    return
  }
}

module attributes {stable_mosaic.version = 11 : i64} {
  func.func private @main(%arg0: i32) attributes {dimension_semantics = [#tpu.dimension_semantics<core_parallel>], iteration_bounds = array<i64: 2>, tpu.core_type = #tpu.core_type<sc_scalar_subcore>, window_params = []} {
    return
  }
}

module attributes {stable_mosaic.version = 11 : i64} {
  func.func @_arma_kernel(%arg0: i32, %arg1: i32, %arg2: memref<128x256xbf16, #tpu.memory_space<vmem>>, %arg3: memref<256x16xbf16, #tpu.memory_space<vmem>>, %arg4: memref<16x128xbf16, #tpu.memory_space<vmem>>, %arg5: memref<128x128xbf16, #tpu.memory_space<vmem>>, %arg6: memref<16x128xbf16, #tpu.memory_space<vmem>>, %arg7: memref<1x128xf32, #tpu.memory_space<vmem>>, %arg8: memref<1x1xf32, #tpu.memory_space<vmem>>, %arg9: memref<1x1xf32, #tpu.memory_space<vmem>>, %arg10: memref<128x1xf32, #tpu.memory_space<vmem>>, %arg11: memref<256x128xbf16, #tpu.memory_space<vmem>>, %arg12: memref<256x128xbf16, #tpu.memory_space<vmem>>, %arg13: memref<256x128xf32, #tpu.memory_space<vmem>>) attributes {dimension_semantics = [#tpu.dimension_semantics<arbitrary>, #tpu.dimension_semantics<arbitrary>], iteration_bounds = array<i64: 4, 2>, scalar_prefetch = 0 : i64, scratch_operands = 3 : i64, tpu.core_type = #tpu.core_type<tc>, window_params = [{transform_indices = @transform_0, window_bounds = array<i64: 128, 256>}, {pipeline_mode = #tpu.pipeline_mode<synchronous>, transform_indices = @transform_1, window_bounds = array<i64: 256, 16>}, {pipeline_mode = #tpu.pipeline_mode<synchronous>, transform_indices = @transform_2, window_bounds = array<i64: 16, 128>}, {pipeline_mode = #tpu.pipeline_mode<synchronous>, transform_indices = @transform_3, window_bounds = array<i64: 128, 128>}, {pipeline_mode = #tpu.pipeline_mode<synchronous>, transform_indices = @transform_4, window_bounds = array<i64: 16, 128>}, {pipeline_mode = #tpu.pipeline_mode<synchronous>, transform_indices = @transform_5, window_bounds = array<i64: 1, 128>}, {pipeline_mode = #tpu.pipeline_mode<synchronous>, transform_indices = @transform_6, window_bounds = array<i64: 1, 1>}, {pipeline_mode = #tpu.pipeline_mode<synchronous>, transform_indices = @transform_7, window_bounds = array<i64: 1, 1>}, {transform_indices = @transform_8, window_bounds = array<i64: 128, 1>}]} {
    %c128_i32 = arith.constant 128 : i32
    %0 = arith.muli %arg1, %c128_i32 : i32
    %1 = tpu.assume_multiple %0, 128 : i32
    %c0_i32 = arith.constant 0 : i32
    %2 = arith.cmpi eq, %arg0, %c0_i32 : i32
    %c0_i32_0 = arith.constant 0 : i32
    %3 = arith.cmpi eq, %arg1, %c0_i32_0 : i32
    %4 = arith.andi %2, %3 : i1
    %5 = arith.extui %4 : i1 to i32
    %c0_i32_1 = arith.constant 0 : i32
    %6 = arith.cmpi ne, %5, %c0_i32_1 : i32
    scf.if %6 {
      %c0_i32_5 = arith.constant 0 : i32
      %c128_i32_6 = arith.constant 128 : i32
      %14 = arith.muli %c0_i32_5, %c128_i32_6 : i32
      %15 = tpu.assume_multiple %14, 128 : i32
      %16 = arith.index_cast %15 : i32 to index
      %c0 = arith.constant 0 : index
      %17 = vector.load %arg3[%16, %c0] : memref<256x16xbf16, #tpu.memory_space<vmem>>, vector<128x16xbf16>
      %c0_7 = arith.constant 0 : index
      %c0_8 = arith.constant 0 : index
      %18 = vector.load %arg6[%c0_7, %c0_8] : memref<16x128xbf16, #tpu.memory_space<vmem>>, vector<16x128xbf16>
      %cst = arith.constant dense<0.000000e+00> : vector<128x128xf32>
      %19 = tpu.matmul %17, %18, %cst {dimension_numbers = #tpu.dot_dimension_numbers<[1], [0], [0], [1], [0, 0, 1, 1], [], []>} : vector<128x16xbf16>, vector<16x128xbf16>, vector<128x128xf32> -> vector<128x128xf32>
      %c0_9 = arith.constant 0 : index
      %c0_10 = arith.constant 0 : index
      %20 = vector.load %arg7[%c0_9, %c0_10] : memref<1x128xf32, #tpu.memory_space<vmem>>, vector<1x128xf32>
      %21 = vector.broadcast %20 : vector<1x128xf32> to vector<128x128xf32>
      %22 = arith.addf %19, %21 : vector<128x128xf32>
      %23 = arith.index_cast %15 : i32 to index
      %c0_11 = arith.constant 0 : index
      %24 = vector.load %arg13[%23, %c0_11] : memref<256x128xf32, #tpu.memory_space<vmem>>, vector<128x128xf32>
      tpu.vector_store %arg13[%23, %c0_11], %22 {strides = array<i32>} : memref<256x128xf32, #tpu.memory_space<vmem>>, vector<128x128xf32>,
      %c0_12 = arith.constant 0 : index
      %c0_13 = arith.constant 0 : index
      %25 = vector.load %arg4[%c0_12, %c0_13] : memref<16x128xbf16, #tpu.memory_space<vmem>>, vector<16x128xbf16>
      %cst_14 = arith.constant dense<0.000000e+00> : vector<128x128xf32>
      %26 = tpu.matmul %17, %25, %cst_14 {dimension_numbers = #tpu.dot_dimension_numbers<[1], [0], [0], [1], [0, 0, 1, 1], [], []>} : vector<128x16xbf16>, vector<16x128xbf16>, vector<128x128xf32> -> vector<128x128xf32>
      %27 = arith.truncf %26 : vector<128x128xf32> to vector<128x128xbf16>
      %28 = arith.index_cast %15 : i32 to index
      %c0_15 = arith.constant 0 : index
      %29 = vector.load %arg11[%28, %c0_15] : memref<256x128xbf16, #tpu.memory_space<vmem>>, vector<128x128xbf16>
      tpu.vector_store %arg11[%28, %c0_15], %27 {strides = array<i32>} : memref<256x128xbf16, #tpu.memory_space<vmem>>, vector<128x128xbf16>,
      %c1_i32 = arith.constant 1 : i32
      %c128_i32_16 = arith.constant 128 : i32
      %30 = arith.muli %c1_i32, %c128_i32_16 : i32
      %31 = tpu.assume_multiple %30, 128 : i32
      %32 = arith.index_cast %31 : i32 to index
      %c0_17 = arith.constant 0 : index
      %33 = vector.load %arg3[%32, %c0_17] : memref<256x16xbf16, #tpu.memory_space<vmem>>, vector<128x16xbf16>
      %c0_18 = arith.constant 0 : index
      %c0_19 = arith.constant 0 : index
      %34 = vector.load %arg6[%c0_18, %c0_19] : memref<16x128xbf16, #tpu.memory_space<vmem>>, vector<16x128xbf16>
      %cst_20 = arith.constant dense<0.000000e+00> : vector<128x128xf32>
      %35 = tpu.matmul %33, %34, %cst_20 {dimension_numbers = #tpu.dot_dimension_numbers<[1], [0], [0], [1], [0, 0, 1, 1], [], []>} : vector<128x16xbf16>, vector<16x128xbf16>, vector<128x128xf32> -> vector<128x128xf32>
      %c0_21 = arith.constant 0 : index
      %c0_22 = arith.constant 0 : index
      %36 = vector.load %arg7[%c0_21, %c0_22] : memref<1x128xf32, #tpu.memory_space<vmem>>, vector<1x128xf32>
      %37 = vector.broadcast %36 : vector<1x128xf32> to vector<128x128xf32>
      %38 = arith.addf %35, %37 : vector<128x128xf32>
      %39 = arith.index_cast %31 : i32 to index
      %c0_23 = arith.constant 0 : index
      %40 = vector.load %arg13[%39, %c0_23] : memref<256x128xf32, #tpu.memory_space<vmem>>, vector<128x128xf32>
      tpu.vector_store %arg13[%39, %c0_23], %38 {strides = array<i32>} : memref<256x128xf32, #tpu.memory_space<vmem>>, vector<128x128xf32>,
      %c0_24 = arith.constant 0 : index
      %c0_25 = arith.constant 0 : index
      %41 = vector.load %arg4[%c0_24, %c0_25] : memref<16x128xbf16, #tpu.memory_space<vmem>>, vector<16x128xbf16>
      %cst_26 = arith.constant dense<0.000000e+00> : vector<128x128xf32>
      %42 = tpu.matmul %33, %41, %cst_26 {dimension_numbers = #tpu.dot_dimension_numbers<[1], [0], [0], [1], [0, 0, 1, 1], [], []>} : vector<128x16xbf16>, vector<16x128xbf16>, vector<128x128xf32> -> vector<128x128xf32>
      %43 = arith.truncf %42 : vector<128x128xf32> to vector<128x128xbf16>
      %44 = arith.index_cast %31 : i32 to index
      %c0_27 = arith.constant 0 : index
      %45 = vector.load %arg11[%44, %c0_27] : memref<256x128xbf16, #tpu.memory_space<vmem>>, vector<128x128xbf16>
      tpu.vector_store %arg11[%44, %c0_27], %43 {strides = array<i32>} : memref<256x128xbf16, #tpu.memory_space<vmem>>, vector<128x128xbf16>,
      %c2_i32_28 = arith.constant 2 : i32
    } else {
    }
    %c2_i32 = arith.constant 2 : i32
    %7 = arith.remsi %arg0, %c2_i32 : i32
    %c0_i32_2 = arith.constant 0 : i32
    %8 = arith.cmpi eq, %7, %c0_i32_2 : i32
    %9 = arith.extui %8 : i1 to i32
    %c0_i32_3 = arith.constant 0 : i32
    %10 = arith.cmpi ne, %9, %c0_i32_3 : i32
    scf.if %10 {
      %c0 = arith.constant 0 : index
      %c0_5 = arith.constant 0 : index
      %14 = vector.load %arg2[%c0, %c0_5] : memref<128x256xbf16, #tpu.memory_space<vmem>>, vector<128x256xbf16>
      %c0_6 = arith.constant 0 : index
      %c0_7 = arith.constant 0 : index
      %15 = vector.load %arg11[%c0_6, %c0_7] : memref<256x128xbf16, #tpu.memory_space<vmem>>, vector<256x128xbf16>
      %cst = arith.constant dense<0.000000e+00> : vector<128x128xf32>
      %16 = tpu.matmul %14, %15, %cst {dimension_numbers = #tpu.dot_dimension_numbers<[1], [0], [0], [1], [0, 0, 1, 1], [], []>} : vector<128x256xbf16>, vector<256x128xbf16>, vector<128x128xf32> -> vector<128x128xf32>
      %17 = arith.index_cast %1 : i32 to index
      %c0_8 = arith.constant 0 : index
      %18 = vector.load %arg13[%17, %c0_8] : memref<256x128xf32, #tpu.memory_space<vmem>>, vector<128x128xf32>
      %19 = arith.addf %16, %18 : vector<128x128xf32>
      %c3_i32 = arith.constant 3 : i32
      %20 = arith.cmpi slt, %arg0, %c3_i32 : i32
      %21 = arith.extui %20 : i1 to i32
      %c0_i32_9 = arith.constant 0 : i32
      %22 = arith.cmpi ne, %21, %c0_i32_9 : i32
      scf.if %22 {
        %26 = arith.truncf %19 : vector<128x128xf32> to vector<128x128xbf16>
        %c0_12 = arith.constant 0 : index
        %c0_13 = arith.constant 0 : index
        %27 = vector.load %arg5[%c0_12, %c0_13] : memref<128x128xbf16, #tpu.memory_space<vmem>>, vector<128x128xbf16>
        %cst_14 = arith.constant dense<0.000000e+00> : vector<128x128xf32>
        %28 = tpu.matmul %26, %27, %cst_14 {dimension_numbers = #tpu.dot_dimension_numbers<[1], [0], [0], [1], [0, 0, 1, 1], [], []>} : vector<128x128xbf16>, vector<128x128xbf16>, vector<128x128xf32> -> vector<128x128xf32>
        %29 = arith.truncf %28 : vector<128x128xf32> to vector<128x128xbf16>
        %30 = arith.index_cast %1 : i32 to index
        %c0_15 = arith.constant 0 : index
        %31 = vector.load %arg12[%30, %c0_15] : memref<256x128xbf16, #tpu.memory_space<vmem>>, vector<128x128xbf16>
        tpu.vector_store %arg12[%30, %c0_15], %29 {strides = array<i32>} : memref<256x128xbf16, #tpu.memory_space<vmem>>, vector<128x128xbf16>,
      } else {
      }
      %c3_i32_10 = arith.constant 3 : i32
      %23 = arith.cmpi eq, %arg0, %c3_i32_10 : i32
      %24 = arith.extui %23 : i1 to i32
      %c0_i32_11 = arith.constant 0 : i32
      %25 = arith.cmpi ne, %24, %c0_i32_11 : i32
      scf.if %25 {
        %26 = vector.extract_strided_slice %19 {offsets = [0, 0], sizes = [128, 1], strides = [1, 1]} : vector<128x128xf32> to vector<128x1xf32>
        %27 = vector.extract_strided_slice %19 {offsets = [0, 1], sizes = [128, 1], strides = [1, 1]} : vector<128x128xf32> to vector<128x1xf32>
        %28 = arith.addf %26, %27 : vector<128x1xf32>
        %29 = vector.extract_strided_slice %19 {offsets = [0, 2], sizes = [128, 1], strides = [1, 1]} : vector<128x128xf32> to vector<128x1xf32>
        %30 = arith.addf %28, %29 : vector<128x1xf32>
        %cst_12 = arith.constant 0.333333343 : f32
        %31 = vector.broadcast %cst_12 : f32 to vector<128x1xf32>
        %32 = arith.mulf %30, %31 : vector<128x1xf32>
        %c0_13 = arith.constant 0 : index
        %c0_14 = arith.constant 0 : index
        %33 = vector.load %arg8[%c0_13, %c0_14] : memref<1x1xf32, #tpu.memory_space<vmem>>, vector<1x1xf32>
        %34 = vector.broadcast %33 : vector<1x1xf32> to vector<128x1xf32>
        %35 = arith.mulf %32, %34 : vector<128x1xf32>
        %c0_15 = arith.constant 0 : index
        %c0_16 = arith.constant 0 : index
        %36 = vector.load %arg9[%c0_15, %c0_16] : memref<1x1xf32, #tpu.memory_space<vmem>>, vector<1x1xf32>
        %37 = vector.broadcast %36 : vector<1x1xf32> to vector<128x1xf32>
        %38 = arith.addf %35, %37 : vector<128x1xf32>
        %cst_17 = arith.constant 0.000000e+00 : f32
        %39 = vector.broadcast %cst_17 : f32 to vector<128x1xf32>
        %40 = arith.subf %39, %38 : vector<128x1xf32>
        %41 = math.exp %40 : vector<128x1xf32>
        %cst_18 = arith.constant 1.000000e+00 : f32
        %42 = vector.broadcast %cst_18 : f32 to vector<128x1xf32>
        %43 = arith.addf %42, %41 : vector<128x1xf32>
        %cst_19 = arith.constant 1.000000e+00 : f32
        %44 = vector.broadcast %cst_19 : f32 to vector<128x1xf32>
        %45 = arith.divf %44, %43 : vector<128x1xf32>
        %c0_20 = arith.constant 0 : index
        %c0_21 = arith.constant 0 : index
        %46 = vector.load %arg10[%c0_20, %c0_21] : memref<128x1xf32, #tpu.memory_space<vmem>>, vector<128x1xf32>
        tpu.vector_store %arg10[%c0_20, %c0_21], %45 {strides = array<i32>} : memref<128x1xf32, #tpu.memory_space<vmem>>, vector<128x1xf32>,
      } else {
      }
    } else {
    }
    %true = arith.constant true
    %11 = arith.xori %8, %true : i1
    %12 = arith.extui %11 : i1 to i32
    %c0_i32_4 = arith.constant 0 : i32
    %13 = arith.cmpi ne, %12, %c0_i32_4 : i32
    scf.if %13 {
      %c0 = arith.constant 0 : index
      %c0_5 = arith.constant 0 : index
      %14 = vector.load %arg2[%c0, %c0_5] : memref<128x256xbf16, #tpu.memory_space<vmem>>, vector<128x256xbf16>
      %c0_6 = arith.constant 0 : index
      %c0_7 = arith.constant 0 : index
      %15 = vector.load %arg12[%c0_6, %c0_7] : memref<256x128xbf16, #tpu.memory_space<vmem>>, vector<256x128xbf16>
      %cst = arith.constant dense<0.000000e+00> : vector<128x128xf32>
      %16 = tpu.matmul %14, %15, %cst {dimension_numbers = #tpu.dot_dimension_numbers<[1], [0], [0], [1], [0, 0, 1, 1], [], []>} : vector<128x256xbf16>, vector<256x128xbf16>, vector<128x128xf32> -> vector<128x128xf32>
      %17 = arith.index_cast %1 : i32 to index
      %c0_8 = arith.constant 0 : index
      %18 = vector.load %arg13[%17, %c0_8] : memref<256x128xf32, #tpu.memory_space<vmem>>, vector<128x128xf32>
      %19 = arith.addf %16, %18 : vector<128x128xf32>
      %c3_i32 = arith.constant 3 : i32
      %20 = arith.cmpi slt, %arg0, %c3_i32 : i32
      %21 = arith.extui %20 : i1 to i32
      %c0_i32_9 = arith.constant 0 : i32
      %22 = arith.cmpi ne, %21, %c0_i32_9 : i32
      scf.if %22 {
        %26 = arith.truncf %19 : vector<128x128xf32> to vector<128x128xbf16>
        %c0_12 = arith.constant 0 : index
        %c0_13 = arith.constant 0 : index
        %27 = vector.load %arg5[%c0_12, %c0_13] : memref<128x128xbf16, #tpu.memory_space<vmem>>, vector<128x128xbf16>
        %cst_14 = arith.constant dense<0.000000e+00> : vector<128x128xf32>
        %28 = tpu.matmul %26, %27, %cst_14 {dimension_numbers = #tpu.dot_dimension_numbers<[1], [0], [0], [1], [0, 0, 1, 1], [], []>} : vector<128x128xbf16>, vector<128x128xbf16>, vector<128x128xf32> -> vector<128x128xf32>
        %29 = arith.truncf %28 : vector<128x128xf32> to vector<128x128xbf16>
        %30 = arith.index_cast %1 : i32 to index
        %c0_15 = arith.constant 0 : index
        %31 = vector.load %arg11[%30, %c0_15] : memref<256x128xbf16, #tpu.memory_space<vmem>>, vector<128x128xbf16>
        tpu.vector_store %arg11[%30, %c0_15], %29 {strides = array<i32>} : memref<256x128xbf16, #tpu.memory_space<vmem>>, vector<128x128xbf16>,
      } else {
      }
      %c3_i32_10 = arith.constant 3 : i32
      %23 = arith.cmpi eq, %arg0, %c3_i32_10 : i32
      %24 = arith.extui %23 : i1 to i32
      %c0_i32_11 = arith.constant 0 : i32
      %25 = arith.cmpi ne, %24, %c0_i32_11 : i32
      scf.if %25 {
        %26 = vector.extract_strided_slice %19 {offsets = [0, 0], sizes = [128, 1], strides = [1, 1]} : vector<128x128xf32> to vector<128x1xf32>
        %27 = vector.extract_strided_slice %19 {offsets = [0, 1], sizes = [128, 1], strides = [1, 1]} : vector<128x128xf32> to vector<128x1xf32>
        %28 = arith.addf %26, %27 : vector<128x1xf32>
        %29 = vector.extract_strided_slice %19 {offsets = [0, 2], sizes = [128, 1], strides = [1, 1]} : vector<128x128xf32> to vector<128x1xf32>
        %30 = arith.addf %28, %29 : vector<128x1xf32>
        %cst_12 = arith.constant 0.333333343 : f32
        %31 = vector.broadcast %cst_12 : f32 to vector<128x1xf32>
        %32 = arith.mulf %30, %31 : vector<128x1xf32>
        %c0_13 = arith.constant 0 : index
        %c0_14 = arith.constant 0 : index
        %33 = vector.load %arg8[%c0_13, %c0_14] : memref<1x1xf32, #tpu.memory_space<vmem>>, vector<1x1xf32>
        %34 = vector.broadcast %33 : vector<1x1xf32> to vector<128x1xf32>
        %35 = arith.mulf %32, %34 : vector<128x1xf32>
        %c0_15 = arith.constant 0 : index
        %c0_16 = arith.constant 0 : index
        %36 = vector.load %arg9[%c0_15, %c0_16] : memref<1x1xf32, #tpu.memory_space<vmem>>, vector<1x1xf32>
        %37 = vector.broadcast %36 : vector<1x1xf32> to vector<128x1xf32>
        %38 = arith.addf %35, %37 : vector<128x1xf32>
        %cst_17 = arith.constant 0.000000e+00 : f32
        %39 = vector.broadcast %cst_17 : f32 to vector<128x1xf32>
        %40 = arith.subf %39, %38 : vector<128x1xf32>
        %41 = math.exp %40 : vector<128x1xf32>
        %cst_18 = arith.constant 1.000000e+00 : f32
        %42 = vector.broadcast %cst_18 : f32 to vector<128x1xf32>
        %43 = arith.addf %42, %41 : vector<128x1xf32>
        %cst_19 = arith.constant 1.000000e+00 : f32
        %44 = vector.broadcast %cst_19 : f32 to vector<128x1xf32>
        %45 = arith.divf %44, %43 : vector<128x1xf32>
        %c0_20 = arith.constant 0 : index
        %c0_21 = arith.constant 0 : index
        %46 = vector.load %arg10[%c0_20, %c0_21] : memref<128x1xf32, #tpu.memory_space<vmem>>, vector<128x1xf32>
        tpu.vector_store %arg10[%c0_20, %c0_21], %45 {strides = array<i32>} : memref<128x1xf32, #tpu.memory_space<vmem>>, vector<128x1xf32>,
      } else {
      }
    } else {
    }
    return
  }
  func.func @transform_0(%arg0: i32, %arg1: i32) -> (i32, i32) {
    %c0_i32 = arith.constant 0 : i32
    %c0_i32_0 = arith.constant 0 : i32
    return %arg1, %c0_i32 : i32, i32
  }
  func.func @transform_1(%arg0: i32, %arg1: i32) -> (i32, i32) {
    %c0_i32 = arith.constant 0 : i32
    %c0_i32_0 = arith.constant 0 : i32
    %c0_i32_1 = arith.constant 0 : i32
    return %c0_i32, %c0_i32_0 : i32, i32
  }
  func.func @transform_2(%arg0: i32, %arg1: i32) -> (i32, i32) {
    %c0_i32 = arith.constant 0 : i32
    %c0_i32_0 = arith.constant 0 : i32
    %c0_i32_1 = arith.constant 0 : i32
    return %c0_i32, %c0_i32_0 : i32, i32
  }
  func.func @transform_3(%arg0: i32, %arg1: i32) -> (i32, i32) {
    %c0_i32 = arith.constant 0 : i32
    %c0_i32_0 = arith.constant 0 : i32
    %c0_i32_1 = arith.constant 0 : i32
    return %c0_i32, %c0_i32_0 : i32, i32
  }
  func.func @transform_4(%arg0: i32, %arg1: i32) -> (i32, i32) {
    %c0_i32 = arith.constant 0 : i32
    %c0_i32_0 = arith.constant 0 : i32
    %c0_i32_1 = arith.constant 0 : i32
    return %c0_i32, %c0_i32_0 : i32, i32
  }
  func.func @transform_5(%arg0: i32, %arg1: i32) -> (i32, i32) {
    %c0_i32 = arith.constant 0 : i32
    %c0_i32_0 = arith.constant 0 : i32
    %c0_i32_1 = arith.constant 0 : i32
    return %c0_i32, %c0_i32_0 : i32, i32
  }
  func.func @transform_6(%arg0: i32, %arg1: i32) -> (i32, i32) {
    %c0_i32 = arith.constant 0 : i32
    %c0_i32_0 = arith.constant 0 : i32
    %c0_i32_1 = arith.constant 0 : i32
    return %c0_i32, %c0_i32_0 : i32, i32
  }
  func.func @transform_7(%arg0: i32, %arg1: i32) -> (i32, i32) {
    %c0_i32 = arith.constant 0 : i32
    %c0_i32_0 = arith.constant 0 : i32
    %c0_i32_1 = arith.constant 0 : i32
    return %c0_i32, %c0_i32_0 : i32, i32
  }
  func.func @transform_8(%arg0: i32, %arg1: i32) -> (i32, i32) {
    %c0_i32 = arith.constant 0 : i32
    %c0_i32_0 = arith.constant 0 : i32
    return %arg1, %c0_i32 : i32, i32
  }
}

module attributes {stable_mosaic.version = 11 : i64} {
  func.func @_arma_kernel(%arg0: i32, %arg1: i32, %arg2: memref<128x256xbf16, #tpu.memory_space<vmem>>, %arg3: memref<256x8xbf16, #tpu.memory_space<vmem>>, %arg4: memref<8x128xbf16, #tpu.memory_space<vmem>>, %arg5: memref<128x128xbf16, #tpu.memory_space<vmem>>, %arg6: memref<8x128xbf16, #tpu.memory_space<vmem>>, %arg7: memref<1x128xf32, #tpu.memory_space<vmem>>, %arg8: memref<1x16xf32, #tpu.memory_space<vmem>>, %arg9: memref<1x16xf32, #tpu.memory_space<vmem>>, %arg10: memref<128x16xf32, #tpu.memory_space<vmem>>, %arg11: memref<256x128xbf16, #tpu.memory_space<vmem>>, %arg12: memref<256x128xbf16, #tpu.memory_space<vmem>>, %arg13: memref<256x128xf32, #tpu.memory_space<vmem>>) attributes {dimension_semantics = [#tpu.dimension_semantics<arbitrary>, #tpu.dimension_semantics<arbitrary>], iteration_bounds = array<i64: 4, 2>, scalar_prefetch = 0 : i64, scratch_operands = 3 : i64, tpu.core_type = #tpu.core_type<tc>, window_params = [{transform_indices = @transform_0, window_bounds = array<i64: 128, 256>}, {pipeline_mode = #tpu.pipeline_mode<synchronous>, transform_indices = @transform_1, window_bounds = array<i64: 256, 8>}, {pipeline_mode = #tpu.pipeline_mode<synchronous>, transform_indices = @transform_2, window_bounds = array<i64: 8, 128>}, {pipeline_mode = #tpu.pipeline_mode<synchronous>, transform_indices = @transform_3, window_bounds = array<i64: 128, 128>}, {pipeline_mode = #tpu.pipeline_mode<synchronous>, transform_indices = @transform_4, window_bounds = array<i64: 8, 128>}, {pipeline_mode = #tpu.pipeline_mode<synchronous>, transform_indices = @transform_5, window_bounds = array<i64: 1, 128>}, {pipeline_mode = #tpu.pipeline_mode<synchronous>, transform_indices = @transform_6, window_bounds = array<i64: 1, 16>}, {pipeline_mode = #tpu.pipeline_mode<synchronous>, transform_indices = @transform_7, window_bounds = array<i64: 1, 16>}, {transform_indices = @transform_8, window_bounds = array<i64: 128, 16>}]} {
    %c128_i32 = arith.constant 128 : i32
    %0 = arith.muli %arg1, %c128_i32 : i32
    %1 = tpu.assume_multiple %0, 128 : i32
    %c0_i32 = arith.constant 0 : i32
    %2 = arith.cmpi eq, %arg0, %c0_i32 : i32
    %c0_i32_0 = arith.constant 0 : i32
    %3 = arith.cmpi eq, %arg1, %c0_i32_0 : i32
    %4 = arith.andi %2, %3 : i1
    %5 = arith.extui %4 : i1 to i32
    %c0_i32_1 = arith.constant 0 : i32
    %6 = arith.cmpi ne, %5, %c0_i32_1 : i32
    scf.if %6 {
      %c0_i32_5 = arith.constant 0 : i32
      %c128_i32_6 = arith.constant 128 : i32
      %14 = arith.muli %c0_i32_5, %c128_i32_6 : i32
      %15 = tpu.assume_multiple %14, 128 : i32
      %16 = arith.index_cast %15 : i32 to index
      %c0 = arith.constant 0 : index
      %17 = vector.load %arg3[%16, %c0] : memref<256x8xbf16, #tpu.memory_space<vmem>>, vector<128x8xbf16>
      %c0_7 = arith.constant 0 : index
      %c0_8 = arith.constant 0 : index
      %18 = vector.load %arg6[%c0_7, %c0_8] : memref<8x128xbf16, #tpu.memory_space<vmem>>, vector<8x128xbf16>
      %cst = arith.constant dense<0.000000e+00> : vector<128x128xf32>
      %19 = tpu.matmul %17, %18, %cst {dimension_numbers = #tpu.dot_dimension_numbers<[1], [0], [0], [1], [0, 0, 1, 1], [], []>} : vector<128x8xbf16>, vector<8x128xbf16>, vector<128x128xf32> -> vector<128x128xf32>
      %c0_9 = arith.constant 0 : index
      %c0_10 = arith.constant 0 : index
      %20 = vector.load %arg7[%c0_9, %c0_10] : memref<1x128xf32, #tpu.memory_space<vmem>>, vector<1x128xf32>
      %21 = vector.broadcast %20 : vector<1x128xf32> to vector<128x128xf32>
      %22 = arith.addf %19, %21 : vector<128x128xf32>
      %23 = arith.index_cast %15 : i32 to index
      %c0_11 = arith.constant 0 : index
      %24 = vector.load %arg13[%23, %c0_11] : memref<256x128xf32, #tpu.memory_space<vmem>>, vector<128x128xf32>
      tpu.vector_store %arg13[%23, %c0_11], %22 {strides = array<i32>} : memref<256x128xf32, #tpu.memory_space<vmem>>, vector<128x128xf32>,
      %c0_12 = arith.constant 0 : index
      %c0_13 = arith.constant 0 : index
      %25 = vector.load %arg4[%c0_12, %c0_13] : memref<8x128xbf16, #tpu.memory_space<vmem>>, vector<8x128xbf16>
      %cst_14 = arith.constant dense<0.000000e+00> : vector<128x128xf32>
      %26 = tpu.matmul %17, %25, %cst_14 {dimension_numbers = #tpu.dot_dimension_numbers<[1], [0], [0], [1], [0, 0, 1, 1], [], []>} : vector<128x8xbf16>, vector<8x128xbf16>, vector<128x128xf32> -> vector<128x128xf32>
      %27 = arith.truncf %26 : vector<128x128xf32> to vector<128x128xbf16>
      %28 = arith.index_cast %15 : i32 to index
      %c0_15 = arith.constant 0 : index
      %29 = vector.load %arg11[%28, %c0_15] : memref<256x128xbf16, #tpu.memory_space<vmem>>, vector<128x128xbf16>
      tpu.vector_store %arg11[%28, %c0_15], %27 {strides = array<i32>} : memref<256x128xbf16, #tpu.memory_space<vmem>>, vector<128x128xbf16>,
      %c1_i32 = arith.constant 1 : i32
      %c128_i32_16 = arith.constant 128 : i32
      %30 = arith.muli %c1_i32, %c128_i32_16 : i32
      %31 = tpu.assume_multiple %30, 128 : i32
      %32 = arith.index_cast %31 : i32 to index
      %c0_17 = arith.constant 0 : index
      %33 = vector.load %arg3[%32, %c0_17] : memref<256x8xbf16, #tpu.memory_space<vmem>>, vector<128x8xbf16>
      %c0_18 = arith.constant 0 : index
      %c0_19 = arith.constant 0 : index
      %34 = vector.load %arg6[%c0_18, %c0_19] : memref<8x128xbf16, #tpu.memory_space<vmem>>, vector<8x128xbf16>
      %cst_20 = arith.constant dense<0.000000e+00> : vector<128x128xf32>
      %35 = tpu.matmul %33, %34, %cst_20 {dimension_numbers = #tpu.dot_dimension_numbers<[1], [0], [0], [1], [0, 0, 1, 1], [], []>} : vector<128x8xbf16>, vector<8x128xbf16>, vector<128x128xf32> -> vector<128x128xf32>
      %c0_21 = arith.constant 0 : index
      %c0_22 = arith.constant 0 : index
      %36 = vector.load %arg7[%c0_21, %c0_22] : memref<1x128xf32, #tpu.memory_space<vmem>>, vector<1x128xf32>
      %37 = vector.broadcast %36 : vector<1x128xf32> to vector<128x128xf32>
      %38 = arith.addf %35, %37 : vector<128x128xf32>
      %39 = arith.index_cast %31 : i32 to index
      %c0_23 = arith.constant 0 : index
      %40 = vector.load %arg13[%39, %c0_23] : memref<256x128xf32, #tpu.memory_space<vmem>>, vector<128x128xf32>
      tpu.vector_store %arg13[%39, %c0_23], %38 {strides = array<i32>} : memref<256x128xf32, #tpu.memory_space<vmem>>, vector<128x128xf32>,
      %c0_24 = arith.constant 0 : index
      %c0_25 = arith.constant 0 : index
      %41 = vector.load %arg4[%c0_24, %c0_25] : memref<8x128xbf16, #tpu.memory_space<vmem>>, vector<8x128xbf16>
      %cst_26 = arith.constant dense<0.000000e+00> : vector<128x128xf32>
      %42 = tpu.matmul %33, %41, %cst_26 {dimension_numbers = #tpu.dot_dimension_numbers<[1], [0], [0], [1], [0, 0, 1, 1], [], []>} : vector<128x8xbf16>, vector<8x128xbf16>, vector<128x128xf32> -> vector<128x128xf32>
      %43 = arith.truncf %42 : vector<128x128xf32> to vector<128x128xbf16>
      %44 = arith.index_cast %31 : i32 to index
      %c0_27 = arith.constant 0 : index
      %45 = vector.load %arg11[%44, %c0_27] : memref<256x128xbf16, #tpu.memory_space<vmem>>, vector<128x128xbf16>
      tpu.vector_store %arg11[%44, %c0_27], %43 {strides = array<i32>} : memref<256x128xbf16, #tpu.memory_space<vmem>>, vector<128x128xbf16>,
      %c2_i32_28 = arith.constant 2 : i32
    } else {
    }
    %c2_i32 = arith.constant 2 : i32
    %7 = arith.remsi %arg0, %c2_i32 : i32
    %c0_i32_2 = arith.constant 0 : i32
    %8 = arith.cmpi eq, %7, %c0_i32_2 : i32
    %9 = arith.extui %8 : i1 to i32
    %c0_i32_3 = arith.constant 0 : i32
    %10 = arith.cmpi ne, %9, %c0_i32_3 : i32
    scf.if %10 {
      %c0 = arith.constant 0 : index
      %c0_5 = arith.constant 0 : index
      %14 = vector.load %arg2[%c0, %c0_5] : memref<128x256xbf16, #tpu.memory_space<vmem>>, vector<128x256xbf16>
      %c0_6 = arith.constant 0 : index
      %c0_7 = arith.constant 0 : index
      %15 = vector.load %arg11[%c0_6, %c0_7] : memref<256x128xbf16, #tpu.memory_space<vmem>>, vector<256x128xbf16>
      %cst = arith.constant dense<0.000000e+00> : vector<128x128xf32>
      %16 = tpu.matmul %14, %15, %cst {dimension_numbers = #tpu.dot_dimension_numbers<[1], [0], [0], [1], [0, 0, 1, 1], [], []>} : vector<128x256xbf16>, vector<256x128xbf16>, vector<128x128xf32> -> vector<128x128xf32>
      %17 = arith.index_cast %1 : i32 to index
      %c0_8 = arith.constant 0 : index
      %18 = vector.load %arg13[%17, %c0_8] : memref<256x128xf32, #tpu.memory_space<vmem>>, vector<128x128xf32>
      %19 = arith.addf %16, %18 : vector<128x128xf32>
      %cst_9 = arith.constant 0.000000e+00 : f32
      %20 = vector.broadcast %cst_9 : f32 to vector<128x128xf32>
      %21 = arith.maximumf %19, %20 : vector<128x128xf32>
      %c3_i32 = arith.constant 3 : i32
      %22 = arith.cmpi slt, %arg0, %c3_i32 : i32
      %23 = arith.extui %22 : i1 to i32
      %c0_i32_10 = arith.constant 0 : i32
      %24 = arith.cmpi ne, %23, %c0_i32_10 : i32
      scf.if %24 {
        %28 = arith.truncf %21 : vector<128x128xf32> to vector<128x128xbf16>
        %c0_13 = arith.constant 0 : index
        %c0_14 = arith.constant 0 : index
        %29 = vector.load %arg5[%c0_13, %c0_14] : memref<128x128xbf16, #tpu.memory_space<vmem>>, vector<128x128xbf16>
        %cst_15 = arith.constant dense<0.000000e+00> : vector<128x128xf32>
        %30 = tpu.matmul %28, %29, %cst_15 {dimension_numbers = #tpu.dot_dimension_numbers<[1], [0], [0], [1], [0, 0, 1, 1], [], []>} : vector<128x128xbf16>, vector<128x128xbf16>, vector<128x128xf32> -> vector<128x128xf32>
        %31 = arith.truncf %30 : vector<128x128xf32> to vector<128x128xbf16>
        %32 = arith.index_cast %1 : i32 to index
        %c0_16 = arith.constant 0 : index
        %33 = vector.load %arg12[%32, %c0_16] : memref<256x128xbf16, #tpu.memory_space<vmem>>, vector<128x128xbf16>
        tpu.vector_store %arg12[%32, %c0_16], %31 {strides = array<i32>} : memref<256x128xbf16, #tpu.memory_space<vmem>>, vector<128x128xbf16>,
      } else {
      }
      %c3_i32_11 = arith.constant 3 : i32
      %25 = arith.cmpi eq, %arg0, %c3_i32_11 : i32
      %26 = arith.extui %25 : i1 to i32
      %c0_i32_12 = arith.constant 0 : i32
      %27 = arith.cmpi ne, %26, %c0_i32_12 : i32
      scf.if %27 {
        %28 = vector.extract_strided_slice %21 {offsets = [0, 0], sizes = [128, 16], strides = [1, 1]} : vector<128x128xf32> to vector<128x16xf32>
        %29 = vector.extract_strided_slice %21 {offsets = [0, 16], sizes = [128, 16], strides = [1, 1]} : vector<128x128xf32> to vector<128x16xf32>
        %30 = arith.addf %28, %29 : vector<128x16xf32>
        %31 = vector.extract_strided_slice %21 {offsets = [0, 32], sizes = [128, 16], strides = [1, 1]} : vector<128x128xf32> to vector<128x16xf32>
        %32 = arith.addf %30, %31 : vector<128x16xf32>
        %cst_13 = arith.constant 0.333333343 : f32
        %33 = vector.broadcast %cst_13 : f32 to vector<128x16xf32>
        %34 = arith.mulf %32, %33 : vector<128x16xf32>
        %c0_14 = arith.constant 0 : index
        %c0_15 = arith.constant 0 : index
        %35 = vector.load %arg8[%c0_14, %c0_15] : memref<1x16xf32, #tpu.memory_space<vmem>>, vector<1x16xf32>
        %36 = vector.broadcast %35 : vector<1x16xf32> to vector<128x16xf32>
        %37 = arith.mulf %34, %36 : vector<128x16xf32>
        %c0_16 = arith.constant 0 : index
        %c0_17 = arith.constant 0 : index
        %38 = vector.load %arg9[%c0_16, %c0_17] : memref<1x16xf32, #tpu.memory_space<vmem>>, vector<1x16xf32>
        %39 = vector.broadcast %38 : vector<1x16xf32> to vector<128x16xf32>
        %40 = arith.addf %37, %39 : vector<128x16xf32>
        %cst_18 = arith.constant 0.000000e+00 : f32
        %41 = vector.broadcast %cst_18 : f32 to vector<128x16xf32>
        %42 = arith.maximumf %40, %41 : vector<128x16xf32>
        %c0_19 = arith.constant 0 : index
        %c0_20 = arith.constant 0 : index
        %43 = vector.load %arg10[%c0_19, %c0_20] : memref<128x16xf32, #tpu.memory_space<vmem>>, vector<128x16xf32>
        tpu.vector_store %arg10[%c0_19, %c0_20], %42 {strides = array<i32>} : memref<128x16xf32, #tpu.memory_space<vmem>>, vector<128x16xf32>,
      } else {
      }
    } else {
    }
    %true = arith.constant true
    %11 = arith.xori %8, %true : i1
    %12 = arith.extui %11 : i1 to i32
    %c0_i32_4 = arith.constant 0 : i32
    %13 = arith.cmpi ne, %12, %c0_i32_4 : i32
    scf.if %13 {
      %c0 = arith.constant 0 : index
      %c0_5 = arith.constant 0 : index
      %14 = vector.load %arg2[%c0, %c0_5] : memref<128x256xbf16, #tpu.memory_space<vmem>>, vector<128x256xbf16>
      %c0_6 = arith.constant 0 : index
      %c0_7 = arith.constant 0 : index
      %15 = vector.load %arg12[%c0_6, %c0_7] : memref<256x128xbf16, #tpu.memory_space<vmem>>, vector<256x128xbf16>
      %cst = arith.constant dense<0.000000e+00> : vector<128x128xf32>
      %16 = tpu.matmul %14, %15, %cst {dimension_numbers = #tpu.dot_dimension_numbers<[1], [0], [0], [1], [0, 0, 1, 1], [], []>} : vector<128x256xbf16>, vector<256x128xbf16>, vector<128x128xf32> -> vector<128x128xf32>
      %17 = arith.index_cast %1 : i32 to index
      %c0_8 = arith.constant 0 : index
      %18 = vector.load %arg13[%17, %c0_8] : memref<256x128xf32, #tpu.memory_space<vmem>>, vector<128x128xf32>
      %19 = arith.addf %16, %18 : vector<128x128xf32>
      %cst_9 = arith.constant 0.000000e+00 : f32
      %20 = vector.broadcast %cst_9 : f32 to vector<128x128xf32>
      %21 = arith.maximumf %19, %20 : vector<128x128xf32>
      %c3_i32 = arith.constant 3 : i32
      %22 = arith.cmpi slt, %arg0, %c3_i32 : i32
      %23 = arith.extui %22 : i1 to i32
      %c0_i32_10 = arith.constant 0 : i32
      %24 = arith.cmpi ne, %23, %c0_i32_10 : i32
      scf.if %24 {
        %28 = arith.truncf %21 : vector<128x128xf32> to vector<128x128xbf16>
        %c0_13 = arith.constant 0 : index
        %c0_14 = arith.constant 0 : index
        %29 = vector.load %arg5[%c0_13, %c0_14] : memref<128x128xbf16, #tpu.memory_space<vmem>>, vector<128x128xbf16>
        %cst_15 = arith.constant dense<0.000000e+00> : vector<128x128xf32>
        %30 = tpu.matmul %28, %29, %cst_15 {dimension_numbers = #tpu.dot_dimension_numbers<[1], [0], [0], [1], [0, 0, 1, 1], [], []>} : vector<128x128xbf16>, vector<128x128xbf16>, vector<128x128xf32> -> vector<128x128xf32>
        %31 = arith.truncf %30 : vector<128x128xf32> to vector<128x128xbf16>
        %32 = arith.index_cast %1 : i32 to index
        %c0_16 = arith.constant 0 : index
        %33 = vector.load %arg11[%32, %c0_16] : memref<256x128xbf16, #tpu.memory_space<vmem>>, vector<128x128xbf16>
        tpu.vector_store %arg11[%32, %c0_16], %31 {strides = array<i32>} : memref<256x128xbf16, #tpu.memory_space<vmem>>, vector<128x128xbf16>,
      } else {
      }
      %c3_i32_11 = arith.constant 3 : i32
      %25 = arith.cmpi eq, %arg0, %c3_i32_11 : i32
      %26 = arith.extui %25 : i1 to i32
      %c0_i32_12 = arith.constant 0 : i32
      %27 = arith.cmpi ne, %26, %c0_i32_12 : i32
      scf.if %27 {
        %28 = vector.extract_strided_slice %21 {offsets = [0, 0], sizes = [128, 16], strides = [1, 1]} : vector<128x128xf32> to vector<128x16xf32>
        %29 = vector.extract_strided_slice %21 {offsets = [0, 16], sizes = [128, 16], strides = [1, 1]} : vector<128x128xf32> to vector<128x16xf32>
        %30 = arith.addf %28, %29 : vector<128x16xf32>
        %31 = vector.extract_strided_slice %21 {offsets = [0, 32], sizes = [128, 16], strides = [1, 1]} : vector<128x128xf32> to vector<128x16xf32>
        %32 = arith.addf %30, %31 : vector<128x16xf32>
        %cst_13 = arith.constant 0.333333343 : f32
        %33 = vector.broadcast %cst_13 : f32 to vector<128x16xf32>
        %34 = arith.mulf %32, %33 : vector<128x16xf32>
        %c0_14 = arith.constant 0 : index
        %c0_15 = arith.constant 0 : index
        %35 = vector.load %arg8[%c0_14, %c0_15] : memref<1x16xf32, #tpu.memory_space<vmem>>, vector<1x16xf32>
        %36 = vector.broadcast %35 : vector<1x16xf32> to vector<128x16xf32>
        %37 = arith.mulf %34, %36 : vector<128x16xf32>
        %c0_16 = arith.constant 0 : index
        %c0_17 = arith.constant 0 : index
        %38 = vector.load %arg9[%c0_16, %c0_17] : memref<1x16xf32, #tpu.memory_space<vmem>>, vector<1x16xf32>
        %39 = vector.broadcast %38 : vector<1x16xf32> to vector<128x16xf32>
        %40 = arith.addf %37, %39 : vector<128x16xf32>
        %cst_18 = arith.constant 0.000000e+00 : f32
        %41 = vector.broadcast %cst_18 : f32 to vector<128x16xf32>
        %42 = arith.maximumf %40, %41 : vector<128x16xf32>
        %c0_19 = arith.constant 0 : index
        %c0_20 = arith.constant 0 : index
        %43 = vector.load %arg10[%c0_19, %c0_20] : memref<128x16xf32, #tpu.memory_space<vmem>>, vector<128x16xf32>
        tpu.vector_store %arg10[%c0_19, %c0_20], %42 {strides = array<i32>} : memref<128x16xf32, #tpu.memory_space<vmem>>, vector<128x16xf32>,
      } else {
      }
    } else {
    }
    return
  }
  func.func @transform_0(%arg0: i32, %arg1: i32) -> (i32, i32) {
    %c0_i32 = arith.constant 0 : i32
    %c0_i32_0 = arith.constant 0 : i32
    return %arg1, %c0_i32 : i32, i32
  }
  func.func @transform_1(%arg0: i32, %arg1: i32) -> (i32, i32) {
    %c0_i32 = arith.constant 0 : i32
    %c0_i32_0 = arith.constant 0 : i32
    %c0_i32_1 = arith.constant 0 : i32
    return %c0_i32, %c0_i32_0 : i32, i32
  }
  func.func @transform_2(%arg0: i32, %arg1: i32) -> (i32, i32) {
    %c0_i32 = arith.constant 0 : i32
    %c0_i32_0 = arith.constant 0 : i32
    %c0_i32_1 = arith.constant 0 : i32
    return %c0_i32, %c0_i32_0 : i32, i32
  }
  func.func @transform_3(%arg0: i32, %arg1: i32) -> (i32, i32) {
    %c0_i32 = arith.constant 0 : i32
    %c0_i32_0 = arith.constant 0 : i32
    %c0_i32_1 = arith.constant 0 : i32
    return %c0_i32, %c0_i32_0 : i32, i32
  }
  func.func @transform_4(%arg0: i32, %arg1: i32) -> (i32, i32) {
    %c0_i32 = arith.constant 0 : i32
    %c0_i32_0 = arith.constant 0 : i32
    %c0_i32_1 = arith.constant 0 : i32
    return %c0_i32, %c0_i32_0 : i32, i32
  }
  func.func @transform_5(%arg0: i32, %arg1: i32) -> (i32, i32) {
    %c0_i32 = arith.constant 0 : i32
    %c0_i32_0 = arith.constant 0 : i32
    %c0_i32_1 = arith.constant 0 : i32
    return %c0_i32, %c0_i32_0 : i32, i32
  }
  func.func @transform_6(%arg0: i32, %arg1: i32) -> (i32, i32) {
    %c0_i32 = arith.constant 0 : i32
    %c0_i32_0 = arith.constant 0 : i32
    %c0_i32_1 = arith.constant 0 : i32
    return %c0_i32, %c0_i32_0 : i32, i32
  }
  func.func @transform_7(%arg0: i32, %arg1: i32) -> (i32, i32) {
    %c0_i32 = arith.constant 0 : i32
    %c0_i32_0 = arith.constant 0 : i32
    %c0_i32_1 = arith.constant 0 : i32
    return %c0_i32, %c0_i32_0 : i32, i32
  }
  func.func @transform_8(%arg0: i32, %arg1: i32) -> (i32, i32) {
    %c0_i32 = arith.constant 0 : i32
    %c0_i32_0 = arith.constant 0 : i32
    return %arg1, %c0_i32 : i32, i32
  }
}

</mosaic_0001>

<bundles_post_ra>
// kernel: arma_net_bench_forward.3
= control target key start
LH: loop header
LB: loop body
LE: loop exit
PB: predicated region body
PF: predicated region fallthrough
CT: control target
= control target key end

     0   :  { %s3464_s9 = smov 0   ;;  %s3466_s10 = smov 0   ;;  %s4136_s0 = inlined_call_operand.vmem [shape: bf16[256,256], index: 0, kind: input, shape index: {}]   ;;  %s4137_s1 = inlined_call_operand.vmem [shape: bf16[256,16], index: 1, kind: input, shape index: {}]   ;;  %s4138_s2 = inlined_call_operand.vmem [shape: bf16[16,128], index: 2, kind: input, shape index: {}]   ;;  %s4139_s3 = inlined_call_operand.vmem [shape: bf16[128,128], index: 3, kind: input, shape index: {}]   ;;  %s4140_s4 = inlined_call_operand.vmem [shape: bf16[16,128], index: 4, kind: input, shape index: {}]   ;;  %s4141_s5 = inlined_call_operand.vmem [shape: f32[1,128], index: 5, kind: input, shape index: {}]   ;;  %s4142_s6 = inlined_call_operand.<no memory space> [shape: f32[1,1], index: 6, kind: input, shape index: {}]   ;;  %s4143_s8 = inlined_call_operand.vmem [shape: f32[256,1], index: 8, kind: output, shape index: {}]   ;;  %s4144_s7 = inlined_call_operand.<no memory space> [shape: f32[1,1], index: 7, kind: input, shape index: {}]  }
   0x1   :  { %v13_v0 = vstv %s4142_s6  ;;  %v15_v1 = vstv %s4144_s7  ;;  %s3468_s11 = smov 0   ;;  %s3470_s12 = smov 0  }
   0x2   :  { %14 = vst [vmem:[#allocation5] sm:$0x1] %v13_v0  ;;  %16 = vst [vmem:[#allocation6] sm:$0x1] %v15_v1  ;;  %s3472_s13 = smov 0  }
   0x3 LB: > { %s31_s6 = sadd.s32 1, %s3399_s11  ;;  %s34_s7 = sadd.s32 1, %s3403_s12  ;;  %s3407_s13 = sphi %s3472_s13, %s22_s13   ;;  %s3403_s12 = sphi %s3470_s12, %s4148_s12   ;;  %s3399_s11 = sphi %s3468_s11, %s4147_s11   ;;  %s3395_s10 = sphi %s3466_s10, %s4146_s10   ;;  %s3391_s9 = sphi %s3464_s9, %s4145_s9  }
   0x4   : > { %p32_p0 = scmp.ge.s32.totalorder %s31_s6, 2  ;;  %p2576_p1 = scmp.ge.s32.totalorder %s3407_s13, 1 }
   0x5   : > { %p280_p2 = scmp.lt.s32.totalorder %s3407_s13, 9 }
   0x6   : > { %s4150_s6 = smov (%p32_p0, %s31_s6), 0  ;;  %s4152_s7 = smov (!%p32_p0, %s34_s7), %s3403_s12 }
   0x7   : > { %p281_p3 = pnand %p2576_p1, %p280_p2  ;;  %p36_p4 = scmp.ge.s32.totalorder %s4152_s7, 4 }
   0x8   : > { %s2577_s14 = sshll.u32 (!%p281_p3), %s3391_s9, 4  ;;  %s3496_s15 = sshll.u32 (!%p281_p3), %s3391_s9, 7 }
   0x9   : > { %s4154_s7 = smov (%p36_p4, %s4152_s7), 0  ;;  %284 = sbr.rel (%p281_p3) target bundleno = 1766 (0x6e6), region = 52 }
   0xa   : > { %p316_p5 = scmp.lt.s32.totalorder (!%p281_p3), %s2577_s14, 31  ;;  %p330_p6 = scmp.eq.s32.totalorder (!%p281_p3), %s3395_s10, 0 }
   0xb   : > { %p331_p7 = scmp.eq.s32.totalorder (!%p281_p3), %s3391_s9, 0 }
   0xd   : > { %p332_p8 = pnand (!%p281_p3), %p331_p7, %p330_p6 }
  0x10   : > { %s4156_s14 = smov (!%p316_p5, %s2577_s14), 31  ;;  %335 = sbr.rel (%p332_p8) target bundleno = 297 (0x129), region = 56 }
  0x11   : > { %s2716_s16 = sshll.u32 %s4156_s14, 3  ;;  %v3157_v2 = vld [vmem:[%s4140_s4] sm:$0xff] (!%p332_p8)   ;;  %vm407_vm0 = vcmask (!%p332_p8), 130048   ;;  %v3160_v5 = vld [vmem:[%s4137_s1 + $0x8] sm:$0xff] (!%p332_p8)   ;;  %v3163_v8 = vld [vmem:[%s4137_s1 + $0x10] sm:$0xff] (!%p332_p8)  }
  0x12   : > { %s3502_s19 = scalar_lea.vmem %s4136_s0, %s2716_s16  ;;  %s3507_s22 = scalar_lea.vmem %s4143_s8, %s2716_s16  ;;  %v3158_v3 = vld [vmem:[%s4138_s2] sm:$0xff] (!%p332_p8)   ;;  %2913 = vmatprep.subr.bf16.mxu0 (!%p332_p8), %v3157_v2  ;;  %v3164_v9 = vld [vmem:[%s4137_s1 + $0x18] sm:$0xff] (!%p332_p8)   ;;  %v3166_v11 = vld [vmem:[%s4137_s1 + $0x28] sm:$0xff] (!%p332_p8)  }
  0x13   : > { %v3159_v4 = vld [vmem:[%s4137_s1] sm:$0xff] (!%p332_p8)   ;;  %2931 = vmatprep.subr.bf16.mxu1 (!%p332_p8), %v3158_v3  ;;  %2914 = vmatpush3.bf16.msra.mxu0 (!%p332_p8), %v3157_v2  ;;  %v3167_v12 = vld [vmem:[%s4137_s1 + $0x30] sm:$0xff] (!%p332_p8)   ;;  %v3168_v13 = vld [vmem:[%s4137_s1 + $0x38] sm:$0xff] (!%p332_p8)  }
  0x14   : > { %2932 = vmatpush3.bf16.msra.mxu1 (!%p332_p8), %v3158_v3  ;;  %2915 = vmatprep.mubr.msk.bf16.mxu0 (!%p332_p8), %vm407_vm0, %v3159_v4  ;;  %v3161_v6 = vld [vmem:[%s4140_s4] sm:$0xff] (!%p332_p8)   ;;  %v3170_v15 = vld [vmem:[%s4137_s1 + $0x48] sm:$0xff] (!%p332_p8)   ;;  %v3171_v16 = vld [vmem:[%s4137_s1 + $0x50] sm:$0xff] (!%p332_p8)  }
  0x15   : > { %2933 = vmatprep.mubr.msk.bf16.mxu1 (!%p332_p8), %vm407_vm0, %v3159_v4  ;;  %v3162_v7 = vld [vmem:[%s4138_s2] sm:$0xff] (!%p332_p8)   ;;  %2949 = vmatprep.subr.bf16.mxu0 (!%p332_p8), %v3161_v6  ;;  %v3172_v17 = vld [vmem:[%s4137_s1 + $0x58] sm:$0xff] (!%p332_p8)   ;;  %v3174_v19 = vld [vmem:[%s4137_s1 + $0x68] sm:$0xff] (!%p332_p8)  }
  0x16   : > { %2916 = vmatmul.mubr.msk.bf16.vlgmr.msra.gmra.mrb[0].mxu0 (!%p332_p8), %vm407_vm0, %v3160_v5  ;;  %2967 = vmatprep.subr.bf16.mxu1 (!%p332_p8), %v3162_v7  ;;  %v3165_v10 = vld [vmem:[%s4137_s1 + $0x20] sm:$0xff] (!%p332_p8)   ;;  %v3175_v20 = vld [vmem:[%s4137_s1 + $0x70] sm:$0xff] (!%p332_p8)   ;;  %v3176_v21 = vld [vmem:[%s4137_s1 + $0x78] sm:$0xff] (!%p332_p8)  }
  0x17   : > { %2934 = vmatmul.mubr.msk.bf16.vlgmr.msra.gmra.mrb[0].mxu1 %vm407_vm0, %v3160_v5  ;;  %2950 = vmatpush3.bf16.msra.mxu0 %v3161_v6  ;;  %v3169_v14 = vld [vmem:[%s4137_s1 + $0x40] sm:$0xff]  }
  0x18   : > { %2968 = vmatpush3.bf16.msra.mxu1 %v3162_v7  ;;  %2919 = vmatprep.mubr.msk.bf16.mxu0 %vm407_vm0, %v3163_v8  ;;  %v3173_v18 = vld [vmem:[%s4137_s1 + $0x60] sm:$0xff]  }
  0x19   : > { %2937 = vmatprep.mubr.msk.bf16.mxu1 %vm407_vm0, %v3163_v8  ;;  %v3604_v22 = vld [vmem:[%s4141_s5] ss:$0 sm:$0xff] }
  0x1e   : > { %2920 = vmatmul.mubr.msk.bf16.gmra.mrb[4].mxu0 %vm407_vm0, %v3164_v9 }
  0x1f   : > { %2938 = vmatmul.mubr.msk.bf16.gmra.mrb[4].mxu1 %vm407_vm0, %v3164_v9  ;;  %2923 = vmatprep.mubr.msk.bf16.mxu0 %vm407_vm0, %v3165_v10 }
  0x20   : > { %2941 = vmatprep.mubr.msk.bf16.mxu1 %vm407_vm0, %v3165_v10 }
  0x26   : > { %2924 = vmatmul.mubr.msk.bf16.gmra.mrb[8].mxu0 %vm407_vm0, %v3166_v11 }
  0x27   : > { %2942 = vmatmul.mubr.msk.bf16.gmra.mrb[8].mxu1 %vm407_vm0, %v3166_v11  ;;  %2927 = vmatprep.mubr.msk.bf16.mxu0 %vm407_vm0, %v3167_v12 }
  0x28   : > { %2945 = vmatprep.mubr.msk.bf16.mxu1 %vm407_vm0, %v3167_v12 }
  0x2e   : > { %2928 = vmatmul.mubr.msk.bf16.gmra.mrb[12].mxu0 %vm407_vm0, %v3168_v13 }
  0x2f   : > { %2946 = vmatmul.mubr.msk.bf16.gmra.mrb[12].mxu1 %vm407_vm0, %v3168_v13  ;;  %2951 = vmatprep.mubr.msk.bf16.mxu0 %vm407_vm0, %v3169_v14 }
  0x30   : > { %2969 = vmatprep.mubr.msk.bf16.mxu1 %vm407_vm0, %v3169_v14 }
  0x36   : > { %2952 = vmatmul.mubr.msk.bf16.vlgmr.msra.gmra.mrb[16].mxu0 %vm407_vm0, %v3170_v15 }
  0x37   : > { %2970 = vmatmul.mubr.msk.bf16.vlgmr.msra.gmra.mrb[16].mxu1 %vm407_vm0, %v3170_v15  ;;  %2955 = vmatprep.mubr.msk.bf16.mxu0 %vm407_vm0, %v3171_v16 }
  0x38   : > { %2973 = vmatprep.mubr.msk.bf16.mxu1 %vm407_vm0, %v3171_v16 }
  0x3e   : > { %2956 = vmatmul.mubr.msk.bf16.gmra.mrb[20].mxu0 %vm407_vm0, %v3172_v17 }
  0x3f   : > { %2974 = vmatmul.mubr.msk.bf16.gmra.mrb[20].mxu1 %vm407_vm0, %v3172_v17  ;;  %2959 = vmatprep.mubr.msk.bf16.mxu0 %vm407_vm0, %v3173_v18 }
  0x40   : > { %2977 = vmatprep.mubr.msk.bf16.mxu1 %vm407_vm0, %v3173_v18 }
  0x46   : > { %2960 = vmatmul.mubr.msk.bf16.gmra.mrb[24].mxu0 %vm407_vm0, %v3174_v19 }
  0x47   : > { %2978 = vmatmul.mubr.msk.bf16.gmra.mrb[24].mxu1 %vm407_vm0, %v3174_v19  ;;  %2963 = vmatprep.mubr.msk.bf16.mxu0 %vm407_vm0, %v3175_v20 }
  0x48   : > { %2981 = vmatprep.mubr.msk.bf16.mxu1 %vm407_vm0, %v3175_v20 }
  0x4e   : > { %2964 = vmatmul.mubr.msk.bf16.gmra.mrb[28].mxu0 %vm407_vm0, %v3176_v21 }
  0x4f   : > { %2982 = vmatmul.mubr.msk.bf16.gmra.mrb[28].mxu1 %vm407_vm0, %v3176_v21 }
  0xe9   : > { %v2917_v23 = vpop.f32.mrb[0].mxu0 }
  0xea   : > { %v475_v24 = vadd.f32 %v2917_v23, %v3604_v22  ;;  %v2935_v25 = vpop.f32.mrb[0].mxu1  ;;  %v466_v26 = vpop.f32.mrb[1].mxu0 }
  0xeb   : > { %v467_v27 = vadd.f32 %v3604_v22, %v466_v26  ;;  %v587_v28 = vpop.f32.mrb[1].mxu1  ;;  %v2918_v29 = vpop.f32.mrb[2].mxu0 }
  0xec   : > { %531 = vst [vmem:[#allocation4 + $0x10] sm:$0xff] %v475_v24  ;;  %v478_v30 = vadd.f32 %v2918_v29, %v3604_v22  ;;  %v2936_v31 = vpop.f32.mrb[2].mxu1  ;;  %v469_v32 = vpop.f32.mrb[3].mxu0 }
  0xed   : > { %529 = vst [vmem:[#allocation4] sm:$0xff] %v467_v27  ;;  %v651_v33 = vpack.c.bf16 %v2936_v31, %v2935_v25  ;;  %v470_v34 = vadd.f32 %v3604_v22, %v469_v32  ;;  %v590_v35 = vpop.f32.mrb[3].mxu1 }
  0xee   : > { %532 = vst [vmem:[#allocation4 + $0x18] sm:$0xff] %v478_v30  ;;  %v650_v36 = vpack.c.bf16 %v590_v35, %v587_v28 }
  0xef   : > { %659 = vst [vmem:[#allocation2 + $0x8] sm:$0xff] %v651_v33  ;;  %530 = vst [vmem:[#allocation4 + $0x8] sm:$0xff] %v470_v34 }
  0xf0   : > { %658 = vst [vmem:[#allocation2] sm:$0xff] %v650_v36 }
  0xf1   : > { %v2921_v37 = vpop.f32.mrb[4].mxu0 }
  0xf2   : > { %v491_v38 = vadd.f32 %v2921_v37, %v3604_v22  ;;  %v2939_v39 = vpop.f32.mrb[4].mxu1  ;;  %v482_v40 = vpop.f32.mrb[5].mxu0 }
  0xf3   : > { %v483_v41 = vadd.f32 %v3604_v22, %v482_v40  ;;  %v603_v42 = vpop.f32.mrb[5].mxu1  ;;  %v2922_v43 = vpop.f32.mrb[6].mxu0 }
  0xf4   : > { %535 = vst [vmem:[#allocation4 + $0x30] sm:$0xff] %v491_v38  ;;  %v494_v44 = vadd.f32 %v2922_v43, %v3604_v22  ;;  %v2940_v45 = vpop.f32.mrb[6].mxu1  ;;  %v485_v46 = vpop.f32.mrb[7].mxu0 }
  0xf5   : > { %533 = vst [vmem:[#allocation4 + $0x20] sm:$0xff] %v483_v41  ;;  %v653_v47 = vpack.c.bf16 %v2940_v45, %v2939_v39  ;;  %v486_v48 = vadd.f32 %v3604_v22, %v485_v46  ;;  %v606_v49 = vpop.f32.mrb[7].mxu1 }
  0xf6   : > { %536 = vst [vmem:[#allocation4 + $0x38] sm:$0xff] %v494_v44  ;;  %v652_v50 = vpack.c.bf16 %v606_v49, %v603_v42 }
  0xf7   : > { %661 = vst [vmem:[#allocation2 + $0x18] sm:$0xff] %v653_v47  ;;  %534 = vst [vmem:[#allocation4 + $0x28] sm:$0xff] %v486_v48 }
  0xf8   : > { %660 = vst [vmem:[#allocation2 + $0x10] sm:$0xff] %v652_v50 }
  0xf9   : > { %v2925_v51 = vpop.f32.mrb[8].mxu0 }
  0xfa   : > { %v507_v52 = vadd.f32 %v2925_v51, %v3604_v22  ;;  %v2943_v53 = vpop.f32.mrb[8].mxu1  ;;  %v498_v54 = vpop.f32.mrb[9].mxu0 }
  0xfb   : > { %v499_v55 = vadd.f32 %v3604_v22, %v498_v54  ;;  %v619_v56 = vpop.f32.mrb[9].mxu1  ;;  %v2926_v57 = vpop.f32.mrb[10].mxu0 }
  0xfc   : > { %539 = vst [vmem:[#allocation4 + $0x50] sm:$0xff] %v507_v52  ;;  %v510_v58 = vadd.f32 %v2926_v57, %v3604_v22  ;;  %v2944_v59 = vpop.f32.mrb[10].mxu1  ;;  %v501_v60 = vpop.f32.mrb[11].mxu0 }
  0xfd   : > { %537 = vst [vmem:[#allocation4 + $0x40] sm:$0xff] %v499_v55  ;;  %v655_v61 = vpack.c.bf16 %v2944_v59, %v2943_v53  ;;  %v502_v62 = vadd.f32 %v3604_v22, %v501_v60  ;;  %v622_v63 = vpop.f32.mrb[11].mxu1 }
  0xfe   : > { %540 = vst [vmem:[#allocation4 + $0x58] sm:$0xff] %v510_v58  ;;  %v654_v0 = vpack.c.bf16 %v622_v63, %v619_v56 }
  0xff   : > { %663 = vst [vmem:[#allocation2 + $0x28] sm:$0xff] %v655_v61  ;;  %538 = vst [vmem:[#allocation4 + $0x48] sm:$0xff] %v502_v62 }
 0x100   : > { %662 = vst [vmem:[#allocation2 + $0x20] sm:$0xff] %v654_v0 }
 0x101   : > { %v2929_v1 = vpop.f32.mrb[12].mxu0 }
 0x102   : > { %v523_v2 = vadd.f32 %v2929_v1, %v3604_v22  ;;  %v2947_v3 = vpop.f32.mrb[12].mxu1  ;;  %v514_v4 = vpop.f32.mrb[13].mxu0 }
 0x103   : > { %v515_v5 = vadd.f32 %v3604_v22, %v514_v4  ;;  %v635_v6 = vpop.f32.mrb[13].mxu1  ;;  %v2930_v7 = vpop.f32.mrb[14].mxu0 }
 0x104   : > { %543 = vst [vmem:[#allocation4 + $0x70] sm:$0xff] %v523_v2  ;;  %v526_v8 = vadd.f32 %v2930_v7, %v3604_v22  ;;  %v2948_v9 = vpop.f32.mrb[14].mxu1  ;;  %v517_v10 = vpop.f32.mrb[15].mxu0 }
 0x105   : > { %541 = vst [vmem:[#allocation4 + $0x60] sm:$0xff] %v515_v5  ;;  %v657_v11 = vpack.c.bf16 %v2948_v9, %v2947_v3  ;;  %v518_v12 = vadd.f32 %v3604_v22, %v517_v10  ;;  %v638_v13 = vpop.f32.mrb[15].mxu1 }
 0x106   : > { %544 = vst [vmem:[#allocation4 + $0x78] sm:$0xff] %v526_v8  ;;  %v656_v14 = vpack.c.bf16 %v638_v13, %v635_v6 }
 0x107   : > { %665 = vst [vmem:[#allocation2 + $0x38] sm:$0xff] %v657_v11  ;;  %542 = vst [vmem:[#allocation4 + $0x68] sm:$0xff] %v518_v12 }
 0x108   : > { %664 = vst [vmem:[#allocation2 + $0x30] sm:$0xff] %v656_v14 }
 0x109   : > { %v2953_v15 = vpop.f32.mrb[16].mxu0 }
 0x10a   : > { %v805_v16 = vadd.f32 %v2953_v15, %v3604_v22  ;;  %v2971_v17 = vpop.f32.mrb[16].mxu1  ;;  %v796_v18 = vpop.f32.mrb[17].mxu0 }
 0x10b   : > { %v797_v19 = vadd.f32 %v3604_v22, %v796_v18  ;;  %v918_v20 = vpop.f32.mrb[17].mxu1  ;;  %v2954_v21 = vpop.f32.mrb[18].mxu0 }
 0x10c   : > { %862 = vst [vmem:[#allocation4 + $0x90] sm:$0xff] %v805_v16  ;;  %v808_v23 = vadd.f32 %v2954_v21, %v3604_v22  ;;  %v2972_v24 = vpop.f32.mrb[18].mxu1  ;;  %v799_v25 = vpop.f32.mrb[19].mxu0 }
 0x10d   : > { %860 = vst [vmem:[#allocation4 + $0x80] sm:$0xff] %v797_v19  ;;  %v982_v26 = vpack.c.bf16 %v2972_v24, %v2971_v17  ;;  %v800_v27 = vadd.f32 %v3604_v22, %v799_v25  ;;  %v921_v28 = vpop.f32.mrb[19].mxu1 }
 0x10e   : > { %863 = vst [vmem:[#allocation4 + $0x98] sm:$0xff] %v808_v23  ;;  %v981_v29 = vpack.c.bf16 %v921_v28, %v918_v20 }
 0x10f   : > { %991 = vst [vmem:[#allocation2 + $0x48] sm:$0xff] %v982_v26  ;;  %861 = vst [vmem:[#allocation4 + $0x88] sm:$0xff] %v800_v27 }
 0x110   : > { %990 = vst [vmem:[#allocation2 + $0x40] sm:$0xff] %v981_v29 }
 0x111   : > { %v2957_v30 = vpop.f32.mrb[20].mxu0 }
 0x112   : > { %v821_v31 = vadd.f32 %v2957_v30, %v3604_v22  ;;  %v2975_v32 = vpop.f32.mrb[20].mxu1  ;;  %v812_v33 = vpop.f32.mrb[21].mxu0 }
 0x113   : > { %v813_v34 = vadd.f32 %v3604_v22, %v812_v33  ;;  %v934_v35 = vpop.f32.mrb[21].mxu1  ;;  %v2958_v36 = vpop.f32.mrb[22].mxu0 }
 0x114   : > { %866 = vst [vmem:[#allocation4 + $0xb0] sm:$0xff] %v821_v31  ;;  %v824_v37 = vadd.f32 %v2958_v36, %v3604_v22  ;;  %v2976_v38 = vpop.f32.mrb[22].mxu1  ;;  %v815_v39 = vpop.f32.mrb[23].mxu0 }
 0x115   : > { %864 = vst [vmem:[#allocation4 + $0xa0] sm:$0xff] %v813_v34  ;;  %v984_v40 = vpack.c.bf16 %v2976_v38, %v2975_v32  ;;  %v816_v41 = vadd.f32 %v3604_v22, %v815_v39  ;;  %v937_v42 = vpop.f32.mrb[23].mxu1 }
 0x116   : > { %867 = vst [vmem:[#allocation4 + $0xb8] sm:$0xff] %v824_v37  ;;  %v983_v43 = vpack.c.bf16 %v937_v42, %v934_v35 }
 0x117   : > { %993 = vst [vmem:[#allocation2 + $0x58] sm:$0xff] %v984_v40  ;;  %865 = vst [vmem:[#allocation4 + $0xa8] sm:$0xff] %v816_v41 }
 0x118   : > { %992 = vst [vmem:[#allocation2 + $0x50] sm:$0xff] %v983_v43 }
 0x119   : > { %v2961_v44 = vpop.f32.mrb[24].mxu0 }
 0x11a   : > { %v837_v45 = vadd.f32 %v2961_v44, %v3604_v22  ;;  %v2979_v46 = vpop.f32.mrb[24].mxu1  ;;  %v828_v47 = vpop.f32.mrb[25].mxu0 }
 0x11b   : > { %v829_v48 = vadd.f32 %v3604_v22, %v828_v47  ;;  %v950_v49 = vpop.f32.mrb[25].mxu1  ;;  %v2962_v50 = vpop.f32.mrb[26].mxu0 }
 0x11c   : > { %870 = vst [vmem:[#allocation4 + $0xd0] sm:$0xff] %v837_v45  ;;  %v840_v51 = vadd.f32 %v2962_v50, %v3604_v22  ;;  %v2980_v52 = vpop.f32.mrb[26].mxu1  ;;  %v831_v53 = vpop.f32.mrb[27].mxu0 }
 0x11d   : > { %868 = vst [vmem:[#allocation4 + $0xc0] sm:$0xff] %v829_v48  ;;  %v986_v54 = vpack.c.bf16 %v2980_v52, %v2979_v46  ;;  %v832_v55 = vadd.f32 %v3604_v22, %v831_v53  ;;  %v953_v56 = vpop.f32.mrb[27].mxu1 }
 0x11e   : > { %871 = vst [vmem:[#allocation4 + $0xd8] sm:$0xff] %v840_v51  ;;  %v985_v57 = vpack.c.bf16 %v953_v56, %v950_v49 }
 0x11f   : > { %995 = vst [vmem:[#allocation2 + $0x68] sm:$0xff] %v986_v54  ;;  %869 = vst [vmem:[#allocation4 + $0xc8] sm:$0xff] %v832_v55 }
 0x120   : > { %994 = vst [vmem:[#allocation2 + $0x60] sm:$0xff] %v985_v57 }
 0x121   : > { %v2965_v58 = vpop.f32.mrb[28].mxu0 }
 0x122   : > { %v853_v59 = vadd.f32 %v2965_v58, %v3604_v22  ;;  %v2983_v60 = vpop.f32.mrb[28].mxu1  ;;  %v844_v61 = vpop.f32.mrb[29].mxu0 }
 0x123   : > { %v845_v62 = vadd.f32 %v3604_v22, %v844_v61  ;;  %v966_v63 = vpop.f32.mrb[29].mxu1  ;;  %v2966_v0 = vpop.f32.mrb[30].mxu0 }
 0x124   : > { %874 = vst [vmem:[#allocation4 + $0xf0] sm:$0xff] %v853_v59  ;;  %v856_v1 = vadd.f32 %v2966_v0, %v3604_v22  ;;  %v2984_v2 = vpop.f32.mrb[30].mxu1  ;;  %v847_v3 = vpop.f32.mrb[31].mxu0 }
 0x125   : > { %872 = vst [vmem:[#allocation4 + $0xe0] sm:$0xff] %v845_v62  ;;  %v988_v4 = vpack.c.bf16 %v2984_v2, %v2983_v60  ;;  %v848_v5 = vadd.f32 %v3604_v22, %v847_v3  ;;  %v969_v6 = vpop.f32.mrb[31].mxu1 }
 0x126   : > { %875 = vst [vmem:[#allocation4 + $0xf8] sm:$0xff] %v856_v1  ;;  %v987_v7 = vpack.c.bf16 %v969_v6, %v966_v63 }
 0x127   : > { %997 = vst [vmem:[#allocation2 + $0x78] sm:$0xff] %v988_v4  ;;  %873 = vst [vmem:[#allocation4 + $0xe8] sm:$0xff] %v848_v5 }
 0x128   : > { %996 = vst [vmem:[#allocation2 + $0x70] sm:$0xff] %v987_v7 }
 0x129 PF: > { %p998_p9 = scmp.lt.s32.totalorder %s3395_s10, 0  ;;  %s999_s18 = ssub.s32 0, %s3395_s10 }
 0x12a   : > { %s2653_s20 = smin.u32 %s3395_s10, %s999_s18 }
 0x12b   : > { %s1001_s21 = sand.u32 1, %s2653_s20  }
 0x12c   : > { %s1002_s23 = ssub.s32 0, %s1001_s21 }
 0x12d   : > { %s4158_s23 = smov (!%p998_p9, %s1002_s23), %s1001_s21 }
 0x12e   : > { %p2654_p10 = scmp.ne.s32.totalorder %s4158_s23, 0 }
 0x12f   : > { %v1032_v22 = vld [vmem:[#allocation2 + $0x40] sm:$0xff] (!%p2654_p10)  ;;  %v1033_v9 = vld [vmem:[#allocation2 + $0x48] sm:$0xff] (!%p2654_p10)  ;;  %v1034_v11 = vld [vmem:[#allocation2 + $0x50] sm:$0xff] (!%p2654_p10)  ;;  %s3661_s24 = scalar_lea.vmem (!%p2654_p10), [#allocation4], %s3496_s15  ;;  %p2671_p11 = scmp.ge.s32.totalorder (!%p2654_p10), %s3395_s10, 3 }
 0x130   : > { %1007 = sbr.rel (%p2654_p10) target bundleno = 1034 (0x40a), region = 60  ;;  %v1024_v8 = vld [vmem:[#allocation2] sm:$0xff] (!%p2654_p10)  ;;  %2753 = vmatprep.subr.bf16.mxu0 (!%p2654_p10), %v1032_v22  ;;  %3049 = vmatprep.subr.bf16.mxu1 (!%p2654_p10), %v1032_v22  ;;  %v1025_v10 = vld [vmem:[#allocation2 + $0x8] sm:$0xff] (!%p2654_p10)  ;;  %v1026_v13 = vld [vmem:[#allocation2 + $0x10] sm:$0xff] (!%p2654_p10) }
 0x131   : > { %2754 = vmatpush3.bf16.msra.mxu0 (!%p2654_p10), %v1024_v8  ;;  %3057 = vmatpush3.bf16.msra.mxu1 (!%p2654_p10), %v1024_v8  ;;  %v3179_v12 = vld [vmem:[%s3502_s19 + $0x4] ss:$8 sps:$4 sm:$0xff] (!%p2654_p10)   ;;  %v1035_v15 = vld [vmem:[#allocation2 + $0x58] sm:$0xff] (!%p2654_p10)  ;;  %v1038_v21 = vld [vmem:[#allocation2 + $0x70] sm:$0xff] (!%p2654_p10) }
 0x132   : > { %2755 = vmatprep.subr.bf16.mxu0 (!%p2654_p10), %v1033_v9  ;;  %3050 = vmatprep.subr.bf16.mxu1 (!%p2654_p10), %v1033_v9  ;;  %v3182_v14 = vld [vmem:[%s3502_s19 + $0x44] ss:$8 sps:$4 sm:$0xff] (!%p2654_p10)   ;;  %v1027_v16 = vld [vmem:[#allocation2 + $0x18] sm:$0xff] (!%p2654_p10)  ;;  %v1030_v23 = vld [vmem:[#allocation2 + $0x30] sm:$0xff] (!%p2654_p10) }
 0x133   : > { %1169 = vmatprep.mubr.bf16.mxu0 (!%p2654_p10), %v3179_v12  ;;  %1201 = vmatprep.mubr.bf16.mxu1 (!%p2654_p10), %v3182_v14  ;;  %v1036_v17 = vld [vmem:[#allocation2 + $0x60] sm:$0xff] (!%p2654_p10)  ;;  %v1037_v19 = vld [vmem:[#allocation2 + $0x68] sm:$0xff] (!%p2654_p10)  ;;  %v1039_v24 = vld [vmem:[#allocation2 + $0x78] sm:$0xff] (!%p2654_p10) }
 0x134   : > { %v1028_v18 = vld [vmem:[#allocation2 + $0x20] sm:$0xff] (!%p2654_p10)  ;;  %v1029_v20 = vld [vmem:[#allocation2 + $0x28] sm:$0xff] (!%p2654_p10)  ;;  %v1031_v25 = vld [vmem:[#allocation2 + $0x38] sm:$0xff] (!%p2654_p10) }
 0x135   : > { %2756 = vmatpush3.bf16.msra.mxu0 (!%p2654_p10), %v1025_v10  ;;  %3058 = vmatpush3.bf16.msra.mxu1 (!%p2654_p10), %v1025_v10  ;;  %v3177_v26 = vld [vmem:[%s3502_s19] ss:$8 sps:$4 sm:$0xff] (!%p2654_p10)   ;;  %v3183_v28 = vld [vmem:[%s3502_s19 + $0x14] ss:$8 sps:$4 sm:$0xff] (!%p2654_p10)   ;;  %v3187_v30 = vld [vmem:[%s3502_s19 + $0x10] ss:$8 sps:$4 sm:$0xff] (!%p2654_p10)  }
 0x136   : > { %2757 = vmatprep.subr.bf16.mxu0 (!%p2654_p10), %v1034_v11  ;;  %3051 = vmatprep.subr.bf16.mxu1 (!%p2654_p10), %v1034_v11  ;;  %v3180_v27 = vld [vmem:[%s3502_s19 + $0x40] ss:$8 sps:$4 sm:$0xff] (!%p2654_p10)   ;;  %v3185_v29 = vld [vmem:[%s3502_s19 + $0x54] ss:$8 sps:$4 sm:$0xff] (!%p2654_p10)   ;;  %v3188_v31 = vld [vmem:[%s3502_s19 + $0x50] ss:$8 sps:$4 sm:$0xff] (!%p2654_p10)  }
 0x137   : > { %v3189_v32 = vld [vmem:[%s3502_s19 + $0x24] ss:$8 sps:$4 sm:$0xff]   ;;  %v3193_v34 = vld [vmem:[%s3502_s19 + $0x20] ss:$8 sps:$4 sm:$0xff]   ;;  %v3195_v36 = vld [vmem:[%s3502_s19 + $0x34] ss:$8 sps:$4 sm:$0xff]  }
 0x138   : > { %v3191_v33 = vld [vmem:[%s3502_s19 + $0x64] ss:$8 sps:$4 sm:$0xff]   ;;  %v3194_v35 = vld [vmem:[%s3502_s19 + $0x60] ss:$8 sps:$4 sm:$0xff]   ;;  %v3197_v37 = vld [vmem:[%s3502_s19 + $0x74] ss:$8 sps:$4 sm:$0xff]  }
 0x139   : > { %2758 = vmatpush3.bf16.msra.mxu0 %v1026_v13  ;;  %3059 = vmatpush3.bf16.msra.mxu1 %v1026_v13  ;;  %v3199_v38 = vld [vmem:[%s3502_s19 + $0x30] ss:$8 sps:$4 sm:$0xff]   ;;  %v1041_v42 = vld [vmem:[%s3661_s24] sm:$0xff]  ;;  %v1042_v50 = vld [vmem:[%s3661_s24 + $0x8] sm:$0xff]  ;;  %s1415_s27 = sshra.s32 (!%p2671_p11), %s3496_s15, 4 }
 0x13a   : > { %2759 = vmatprep.subr.bf16.mxu0 %v1035_v15  ;;  %3052 = vmatprep.subr.bf16.mxu1 %v1035_v15  ;;  %v3200_v39 = vld [vmem:[%s3502_s19 + $0x70] ss:$8 sps:$4 sm:$0xff]   ;;  %v1049_v44 = vld [vmem:[%s3661_s24 + $0x40] sm:$0xff]  ;;  %v1050_v52 = vld [vmem:[%s3661_s24 + $0x48] sm:$0xff]  ;;  %s2680_s28 = sshll.u32 (!%p2671_p11), %s1415_s27, 3 }
 0x13b   : > { %v1043_v62 = vld [vmem:[%s3661_s24 + $0x10] sm:$0xff]  ;;  %v1044_v6 = vld [vmem:[%s3661_s24 + $0x18] sm:$0xff]  ;;  %s1418_s29 = scalar_lea.vmem (!%p2671_p11), [#allocation3], %s2680_s28 }
 0x13c   : > { %v1051_v0 = vld [vmem:[%s3661_s24 + $0x50] sm:$0xff]  ;;  %v1052_v22 = vld [vmem:[%s3661_s24 + $0x58] sm:$0xff] }
 0x13d   : > { %2760 = vmatpush3.bf16.msra.mxu0 %v1027_v16  ;;  %3060 = vmatpush3.bf16.msra.mxu1 %v1027_v16 }
 0x13e   : > { %2761 = vmatprep.subr.bf16.mxu0 %v1036_v17  ;;  %3053 = vmatprep.subr.bf16.mxu1 %v1036_v17  ;;  %v1045_v17 = vld [vmem:[%s3661_s24 + $0x20] sm:$0xff] }
 0x141   : > { %2762 = vmatpush3.bf16.msra.mxu0 %v1028_v18  ;;  %3061 = vmatpush3.bf16.msra.mxu1 %v1028_v18 }
 0x142   : > { %2763 = vmatprep.subr.bf16.mxu0 %v1037_v19  ;;  %3054 = vmatprep.subr.bf16.mxu1 %v1037_v19  ;;  %v1053_v19 = vld [vmem:[%s3661_s24 + $0x60] sm:$0xff] }
 0x145   : > { %2764 = vmatpush3.bf16.msra.mxu0 %v1029_v20  ;;  %3062 = vmatpush3.bf16.msra.mxu1 %v1029_v20 }
 0x146   : > { %2765 = vmatprep.subr.bf16.mxu0 %v1038_v21  ;;  %3055 = vmatprep.subr.bf16.mxu1 %v1038_v21 }
 0x149   : > { %2766 = vmatpush3.bf16.msra.mxu0 %v1030_v23  ;;  %3063 = vmatpush3.bf16.msra.mxu1 %v1030_v23 }
 0x14a   : > { %2767 = vmatprep.subr.bf16.mxu0 %v1039_v24  ;;  %3056 = vmatprep.subr.bf16.mxu1 %v1039_v24 }
 0x14d   : > { %2768 = vmatpush3.bf16.msra.mxu0 %v1031_v25  ;;  %3064 = vmatpush3.bf16.msra.mxu1 %v1031_v25 }
 0x150   : > { %1170 = vmatmul.mubr.bf16.vlgmr.msra.gmra.mrb[0].mxu0 %v3177_v26  ;;  %1202 = vmatmul.mubr.bf16.vlgmr.msra.gmra.mrb[0].mxu1 %v3180_v27  ;;  %v1046_v26 = vld [vmem:[%s3661_s24 + $0x28] sm:$0xff] }
 0x151   : > { %1177 = vmatprep.mubr.bf16.mxu0 %v3183_v28  ;;  %1209 = vmatprep.mubr.bf16.mxu1 %v3185_v29  ;;  %v1054_v28 = vld [vmem:[%s3661_s24 + $0x68] sm:$0xff] }
 0x158   : > { %1178 = vmatmul.mubr.bf16.gmra.mrb[4].mxu0 %v3187_v30  ;;  %1210 = vmatmul.mubr.bf16.gmra.mrb[4].mxu1 %v3188_v31 }
 0x159   : > { %1185 = vmatprep.mubr.bf16.mxu0 %v3189_v32  ;;  %1217 = vmatprep.mubr.bf16.mxu1 %v3191_v33 }
 0x160   : > { %1186 = vmatmul.mubr.bf16.gmra.mrb[8].mxu0 %v3193_v34  ;;  %1218 = vmatmul.mubr.bf16.gmra.mrb[8].mxu1 %v3194_v35 }
 0x161   : > { %1193 = vmatprep.mubr.bf16.mxu0 %v3195_v36  ;;  %1225 = vmatprep.mubr.bf16.mxu1 %v3197_v37 }
 0x168   : > { %1194 = vmatmul.mubr.bf16.gmra.mrb[12].mxu0 %v3199_v38  ;;  %1226 = vmatmul.mubr.bf16.gmra.mrb[12].mxu1 %v3200_v39  ;;  %v1047_v38 = vld [vmem:[%s3661_s24 + $0x30] sm:$0xff] }
 0x223   : > { %v2769_v40 = vpop.f32.mrb[0].mxu0  ;;  %v2793_v41 = vpop.f32.mrb[0].mxu1 }
 0x224   : > { %v2770_v43 = vpop.f32.mrb[1].mxu0  ;;  %v2794_v45 = vpop.f32.mrb[1].mxu1 }
 0x225   : > { %v2771_v46 = vadd.f32 %v2770_v43, %v2769_v40  ;;  %v2795_v47 = vadd.f32 %v2794_v45, %v2793_v41  ;;  %v2772_v48 = vpop.f32.mrb[2].mxu0  ;;  %v2796_v49 = vpop.f32.mrb[2].mxu1  ;;  %v1055_v40 = vld [vmem:[%s3661_s24 + $0x70] sm:$0xff] }
 0x226   : > { %v2773_v51 = vpop.f32.mrb[3].mxu0  ;;  %v2797_v53 = vpop.f32.mrb[3].mxu1 }
 0x227   : > { %v3667_v54 = vadd.f32 %v2771_v46, %v1041_v42  ;;  %v3669_v55 = vadd.f32 %v2795_v47, %v1049_v44  ;;  %v2774_v56 = vadd.f32 %v2773_v51, %v2772_v48  ;;  %v2798_v57 = vadd.f32 %v2797_v53, %v2796_v49  ;;  %v1048_v46 = vld [vmem:[%s3661_s24 + $0x38] sm:$0xff] }
 0x228   : > { %v1056_v48 = vld [vmem:[%s3661_s24 + $0x78] sm:$0xff] }
 0x229   : > { %v3671_v58 = vadd.f32 %v2774_v56, %v1042_v50  ;;  %v3673_v59 = vadd.f32 %v2798_v57, %v1050_v52 }
 0x22b   : > { %v2775_v60 = vpop.f32.mrb[4].mxu0  ;;  %v2799_v61 = vpop.f32.mrb[4].mxu1 }
 0x22c   : > { %v2776_v63 = vpop.f32.mrb[5].mxu0  ;;  %v2800_v1 = vpop.f32.mrb[5].mxu1 }
 0x22d   : > { %v2777_v2 = vadd.f32 %v2776_v63, %v2775_v60  ;;  %v2801_v3 = vadd.f32 %v2800_v1, %v2799_v61  ;;  %v2778_v4 = vpop.f32.mrb[6].mxu0  ;;  %v2802_v5 = vpop.f32.mrb[6].mxu1  ;;  %v3201_v60 = vld [vmem:[%s4139_s3] sm:$0xff] (!%p2671_p11)   ;;  %v3202_v61 = vld [vmem:[%s4139_s3 + $0x8] sm:$0xff] (!%p2671_p11)   ;;  %v1242_v63 = vpack.c.bf16 (!%p2671_p11), %v3673_v59, %v3669_v55  ;;  %v3204_v1 = vld [vmem:[%s4139_s3 + $0x18] sm:$0xff] (!%p2671_p11)  }
 0x22e   : > { %v2779_v7 = vpop.f32.mrb[7].mxu0  ;;  %v2803_v8 = vpop.f32.mrb[7].mxu1  ;;  %2985 = vmatprep.subr.bf16.mxu0 (!%p2671_p11), %v3201_v60  ;;  %3065 = vmatprep.subr.bf16.mxu1 (!%p2671_p11), %v3201_v60 }
 0x22f   : > { %v3679_v9 = vadd.f32 %v2777_v2, %v1043_v62  ;;  %v3681_v10 = vadd.f32 %v2801_v3, %v1051_v0  ;;  %v2780_v11 = vadd.f32 %v2779_v7, %v2778_v4  ;;  %v2804_v12 = vadd.f32 %v2803_v8, %v2802_v5  ;;  %2986 = vmatpush3.bf16.msra.mxu0 (!%p2671_p11), %v3201_v60  ;;  %v3203_v0 = vld [vmem:[%s4139_s3 + $0x10] sm:$0xff] (!%p2671_p11)   ;;  %v3205_v2 = vld [vmem:[%s4139_s3 + $0x20] sm:$0xff] (!%p2671_p11)   ;;  %v3206_v3 = vld [vmem:[%s4139_s3 + $0x28] sm:$0xff] (!%p2671_p11)  }
 0x230   : > { %v1238_v62 = vpack.c.bf16 (!%p2671_p11), %v3671_v58, %v3667_v54  ;;  %3073 = vmatpush3.bf16.msra.mxu1 (!%p2671_p11), %v3201_v60  ;;  %2987 = vmatprep.subr.bf16.mxu0 (!%p2671_p11), %v3202_v61  ;;  %v3207_v4 = vld [vmem:[%s4139_s3 + $0x30] sm:$0xff] (!%p2671_p11)   ;;  %v3208_v5 = vld [vmem:[%s4139_s3 + $0x38] sm:$0xff] (!%p2671_p11)  }
 0x231   : > { %v3683_v13 = vadd.f32 %v2780_v11, %v1044_v6  ;;  %v3685_v14 = vadd.f32 %v2804_v12, %v1052_v22  ;;  %3066 = vmatprep.subr.bf16.mxu1 (!%p2671_p11), %v3202_v61  ;;  %3009 = vmatprep.mubr.bf16.mxu1 (!%p2671_p11), %v1242_v63 }
 0x232   : > { %3001 = vmatprep.mubr.bf16.mxu0 (!%p2671_p11), %v1238_v62 }
 0x233   : > { %v2781_v15 = vpop.f32.mrb[8].mxu0  ;;  %v2805_v16 = vpop.f32.mrb[8].mxu1  ;;  %2988 = vmatpush3.bf16.msra.mxu0 (!%p2671_p11), %v3202_v61  ;;  %v1239_v6 = vpack.c.bf16 (!%p2671_p11), %v3683_v13, %v3679_v9  ;;  %v1243_v7 = vpack.c.bf16 (!%p2671_p11), %v3685_v14, %v3681_v10 }
 0x234   : > { %v2782_v18 = vpop.f32.mrb[9].mxu0  ;;  %v2806_v20 = vpop.f32.mrb[9].mxu1  ;;  %3074 = vmatpush3.bf16.msra.mxu1 (!%p2671_p11), %v3202_v61  ;;  %2989 = vmatprep.subr.bf16.mxu0 (!%p2671_p11), %v3203_v0 }
 0x235   : > { %v2783_v21 = vadd.f32 %v2782_v18, %v2781_v15  ;;  %v2807_v23 = vadd.f32 %v2806_v20, %v2805_v16  ;;  %v2784_v24 = vpop.f32.mrb[10].mxu0  ;;  %v2808_v25 = vpop.f32.mrb[10].mxu1  ;;  %3067 = vmatprep.subr.bf16.mxu1 (!%p2671_p11), %v3203_v0 }
 0x236   : > { %v2785_v27 = vpop.f32.mrb[11].mxu0  ;;  %v2809_v29 = vpop.f32.mrb[11].mxu1 }
 0x237   : > { %v3691_v30 = vadd.f32 %v2783_v21, %v1045_v17  ;;  %v3693_v31 = vadd.f32 %v2807_v23, %v1053_v19  ;;  %v2786_v32 = vadd.f32 %v2785_v27, %v2784_v24  ;;  %v2810_v33 = vadd.f32 %v2809_v29, %v2808_v25  ;;  %2990 = vmatpush3.bf16.msra.mxu0 (!%p2671_p11), %v3203_v0 }
 0x238   : > { %3075 = vmatpush3.bf16.msra.mxu1 (!%p2671_p11), %v3203_v0  ;;  %2991 = vmatprep.subr.bf16.mxu0 (!%p2671_p11), %v3204_v1 }
 0x239   : > { %v3695_v34 = vadd.f32 %v2786_v32, %v1046_v26  ;;  %v3697_v35 = vadd.f32 %v2810_v33, %v1054_v28  ;;  %3068 = vmatprep.subr.bf16.mxu1 (!%p2671_p11), %v3204_v1 }
 0x23b   : > { %v2787_v36 = vpop.f32.mrb[12].mxu0  ;;  %v2811_v37 = vpop.f32.mrb[12].mxu1  ;;  %1237 = sbr.rel (%p2671_p11) target bundleno = 817 (0x331), region = 64  ;;  %2992 = vmatpush3.bf16.msra.mxu0 (!%p2671_p11), %v3204_v1  ;;  %v1240_v22 = vpack.c.bf16 (!%p2671_p11), %v3695_v34, %v3691_v30  ;;  %v1244_v8 = vpack.c.bf16 (!%p2671_p11), %v3697_v35, %v3693_v31 }
 0x23c   : > { %v2788_v39 = vpop.f32.mrb[13].mxu0  ;;  %v2812_v41 = vpop.f32.mrb[13].mxu1  ;;  %3076 = vmatpush3.bf16.msra.mxu1 (!%p2671_p11), %v3204_v1  ;;  %2993 = vmatprep.subr.bf16.mxu0 (!%p2671_p11), %v3205_v2 }
 0x23d   : > { %v2789_v42 = vadd.f32 %v2788_v39, %v2787_v36  ;;  %v2813_v43 = vadd.f32 %v2812_v41, %v2811_v37  ;;  %v2790_v44 = vpop.f32.mrb[14].mxu0  ;;  %v2814_v45 = vpop.f32.mrb[14].mxu1  ;;  %3069 = vmatprep.subr.bf16.mxu1 (!%p2671_p11), %v3205_v2 }
 0x23e   : > { %v2791_v47 = vpop.f32.mrb[15].mxu0  ;;  %v2815_v49 = vpop.f32.mrb[15].mxu1 }
 0x23f   : > { %v3703_v50 = vadd.f32 %v2789_v42, %v1047_v38  ;;  %v3705_v51 = vadd.f32 %v2813_v43, %v1055_v40  ;;  %v2792_v52 = vadd.f32 %v2791_v47, %v2790_v44  ;;  %v2816_v53 = vadd.f32 %v2815_v49, %v2814_v45  ;;  %2994 = vmatpush3.bf16.msra.mxu0 (!%p2671_p11), %v3205_v2 }
 0x240   : > { %3077 = vmatpush3.bf16.msra.mxu1 (!%p2671_p11), %v3205_v2  ;;  %2995 = vmatprep.subr.bf16.mxu0 (!%p2671_p11), %v3206_v3 }
 0x241   : > { %v3707_v56 = vadd.f32 %v2792_v52, %v1048_v46  ;;  %v3709_v57 = vadd.f32 %v2816_v53, %v1056_v48  ;;  %3070 = vmatprep.subr.bf16.mxu1 (!%p2671_p11), %v3206_v3 }
 0x243   : > { %2996 = vmatpush3.bf16.msra.mxu0 %v3206_v3  ;;  %v1241_v11 = vpack.c.bf16 %v3707_v56, %v3703_v50  ;;  %v1245_v12 = vpack.c.bf16 %v3709_v57, %v3705_v51 }
 0x244   : > { %3078 = vmatpush3.bf16.msra.mxu1 %v3206_v3  ;;  %2997 = vmatprep.subr.bf16.mxu0 %v3207_v4 }
 0x245   : > { %3071 = vmatprep.subr.bf16.mxu1 %v3207_v4 }
 0x247   : > { %2998 = vmatpush3.bf16.msra.mxu0 %v3207_v4 }
 0x248   : > { %3079 = vmatpush3.bf16.msra.mxu1 %v3207_v4  ;;  %2999 = vmatprep.subr.bf16.mxu0 %v3208_v5 }
 0x249   : > { %3072 = vmatprep.subr.bf16.mxu1 %v3208_v5 }
 0x24b   : > { %3000 = vmatpush3.bf16.msra.mxu0 %v3208_v5 }
 0x24c   : > { %3080 = vmatpush3.bf16.msra.mxu1 %v3208_v5 }
 0x24e   : > { %3002 = vmatmul.mubr.bf16.vlgmr.msra.gmra.mrb[0].mxu0 %v1239_v6 }
 0x24f   : > { %3010 = vmatmul.mubr.bf16.vlgmr.msra.gmra.mrb[0].mxu1 %v1243_v7  ;;  %3005 = vmatprep.mubr.bf16.mxu0 %v1240_v22 }
 0x250   : > { %3013 = vmatprep.mubr.bf16.mxu1 %v1244_v8 }
 0x256   : > { %3006 = vmatmul.mubr.bf16.gmra.mrb[4].mxu0 %v1241_v11 }
 0x257   : > { %3014 = vmatmul.mubr.bf16.gmra.mrb[4].mxu1 %v1245_v12 }
 0x321   : > { %v3003_v15 = vpop.f32.mrb[0].mxu0 }
 0x322   : > { %v3011_v16 = vpop.f32.mrb[0].mxu1  ;;  %v1344_v17 = vpop.f32.mrb[1].mxu0 }
 0x323   : > { %v1376_v18 = vpop.f32.mrb[1].mxu1  ;;  %v3004_v19 = vpop.f32.mrb[2].mxu0 }
 0x324   : > { %v3012_v20 = vpop.f32.mrb[2].mxu1  ;;  %v1408_v21 = vpack.c.bf16 %v3004_v19, %v3003_v15  ;;  %v1347_v24 = vpop.f32.mrb[3].mxu0 }
 0x325   : > { %v1412_v23 = vpack.c.bf16 %v3012_v20, %v3011_v16  ;;  %v1379_v25 = vpop.f32.mrb[3].mxu1  ;;  %v1407_v26 = vpack.c.bf16 %v1347_v24, %v1344_v17 }
 0x326   : > { %v1411_v27 = vpack.c.bf16 %v1379_v25, %v1376_v18  ;;  %1420 = vst [vmem:[%s1418_s29 + $0x8] sm:$0xff] %v1408_v21 }
 0x327   : > { %1424 = vst [vmem:[%s1418_s29 + $0x28] sm:$0xff] %v1412_v23  ;;  %1419 = vst [vmem:[%s1418_s29] sm:$0xff] %v1407_v26 }
 0x328   : > { %1423 = vst [vmem:[%s1418_s29 + $0x20] sm:$0xff] %v1411_v27 }
 0x329   : > { %v3007_v28 = vpop.f32.mrb[4].mxu0 }
 0x32a   : > { %v3015_v29 = vpop.f32.mrb[4].mxu1  ;;  %v1360_v32 = vpop.f32.mrb[5].mxu0 }
 0x32b   : > { %v1392_v33 = vpop.f32.mrb[5].mxu1  ;;  %v3008_v36 = vpop.f32.mrb[6].mxu0 }
 0x32c   : > { %v3016_v37 = vpop.f32.mrb[6].mxu1  ;;  %v1410_v38 = vpack.c.bf16 %v3008_v36, %v3007_v28  ;;  %v1363_v40 = vpop.f32.mrb[7].mxu0 }
 0x32d   : > { %v1414_v39 = vpack.c.bf16 %v3016_v37, %v3015_v29  ;;  %v1395_v41 = vpop.f32.mrb[7].mxu1  ;;  %v1409_v42 = vpack.c.bf16 %v1363_v40, %v1360_v32 }
 0x32e   : > { %v1413_v43 = vpack.c.bf16 %v1395_v41, %v1392_v33  ;;  %1422 = vst [vmem:[%s1418_s29 + $0x18] sm:$0xff] %v1410_v38 }
 0x32f   : > { %1426 = vst [vmem:[%s1418_s29 + $0x38] sm:$0xff] %v1414_v39  ;;  %1421 = vst [vmem:[%s1418_s29 + $0x10] sm:$0xff] %v1409_v42 }
 0x330   : > { %1425 = vst [vmem:[%s1418_s29 + $0x30] sm:$0xff] %v1413_v43 }
 0x331 PF: > { %p2681_p12 = scmp.ne.s32.totalorder %s3395_s10, 3 }
 0x332   : > { %s3409_s30 = smov (!%p2681_p12), 127   ;;  %s3410_s9 = smov (!%p2681_p12), 126   ;;  %v3796_v11 = vld [vmem:[#allocation5] ss:$0 sm:$0xff] (!%p2681_p12)  ;;  %v3800_v18 = vld [vmem:[#allocation6] ss:$0 sm:$0xff] (!%p2681_p12) }
 0x333   : > { %1430 = sbr.rel (%p2681_p12) target bundleno = 1034 (0x40a), region = 68  ;;  %1451 = vrot.lane.b32.xlu1 (!%p2681_p12), %v3679_v9, %s3409_s30  ;;  %1447 = vrot.lane.b32.xlu0 (!%p2681_p12), %v3667_v54, %s3409_s30  ;;  %vm1733_vm1 = vcmask (!%p2681_p12), 7168  }
 0x337   : > { %1453 = vrot.lane.b32.xlu1 (!%p2681_p12), %v3683_v13, %s3409_s30  ;;  %1449 = vrot.lane.b32.xlu0 (!%p2681_p12), %v3671_v58, %s3409_s30 }
 0x33b   : > { %1457 = vrot.lane.b32.xlu1 %v3695_v34, %s3409_s30  ;;  %1455 = vrot.lane.b32.xlu0 %v3691_v30, %s3409_s30 }
 0x33f   : > { %1461 = vrot.lane.b32.xlu1 %v3707_v56, %s3409_s30  ;;  %1459 = vrot.lane.b32.xlu0 %v3703_v50, %s3409_s30 }
 0x343   : > { %1465 = vrot.lane.b32.xlu1 %v3673_v59, %s3409_s30  ;;  %1463 = vrot.lane.b32.xlu0 %v3669_v55, %s3409_s30 }
 0x347   : > { %1469 = vrot.lane.b32.xlu1 %v3685_v14, %s3409_s30  ;;  %1467 = vrot.lane.b32.xlu0 %v3681_v10, %s3409_s30 }
 0x34b   : > { %1473 = vrot.lane.b32.xlu1 %v3697_v35, %s3409_s30  ;;  %1471 = vrot.lane.b32.xlu0 %v3693_v31, %s3409_s30 }
 0x34f   : > { %1477 = vrot.lane.b32.xlu1 %v3709_v57, %s3409_s30  ;;  %1475 = vrot.lane.b32.xlu0 %v3705_v51, %s3409_s30 }
 0x353   : > { %1513 = vrot.lane.b32.xlu1 %v3671_v58, %s3410_s9  ;;  %1511 = vrot.lane.b32.xlu0 %v3667_v54, %s3410_s9 }
 0x357   : > { %1517 = vrot.lane.b32.xlu1 %v3683_v13, %s3410_s9  ;;  %1515 = vrot.lane.b32.xlu0 %v3679_v9, %s3410_s9 }
 0x35b   : > { %1521 = vrot.lane.b32.xlu1 %v3695_v34, %s3410_s9  ;;  %1519 = vrot.lane.b32.xlu0 %v3691_v30, %s3410_s9 }
 0x35f   : > { %1525 = vrot.lane.b32.xlu1 %v3707_v56, %s3410_s9  ;;  %1523 = vrot.lane.b32.xlu0 %v3703_v50, %s3410_s9 }
 0x363   : > { %1529 = vrot.lane.b32.xlu1 %v3673_v59, %s3410_s9  ;;  %1527 = vrot.lane.b32.xlu0 %v3669_v55, %s3410_s9 }
 0x367   : > { %1533 = vrot.lane.b32.xlu1 %v3685_v14, %s3410_s9  ;;  %1531 = vrot.lane.b32.xlu0 %v3681_v10, %s3410_s9 }
 0x36b   : > { %1537 = vrot.lane.b32.xlu1 %v3697_v35, %s3410_s9  ;;  %1535 = vrot.lane.b32.xlu0 %v3693_v31, %s3410_s9 }
 0x36f   : > { %1541 = vrot.lane.b32.xlu1 %v3709_v57, %s3410_s9  ;;  %1539 = vrot.lane.b32.xlu0 %v3705_v51, %s3410_s9 }
 0x3a5   : > { %v1452_v44 = vpop.permute.xlu1 %1451  ;;  %v1448_v45 = vpop.permute.xlu0 %1447 }
 0x3a6   : > { %v1495_v4 = vadd.f32 %v1448_v45, %v3667_v54  ;;  %v1497_v12 = vadd.f32 %v1452_v44, %v3679_v9 }
 0x3a9   : > { %v1454_v46 = vpop.permute.xlu1 %1453  ;;  %v1450_v47 = vpop.permute.xlu0 %1449 }
 0x3aa   : > { %v1496_v5 = vadd.f32 %v1450_v47, %v3671_v58  ;;  %v1498_v15 = vadd.f32 %v1454_v46, %v3683_v13 }
 0x3ad   : > { %v1458_v48 = vpop.permute.xlu1 %1457  ;;  %v1456_v49 = vpop.permute.xlu0 %1455 }
 0x3ae   : > { %v1500_v13 = vadd.f32 %v1458_v48, %v3695_v34  ;;  %v1499_v27 = vadd.f32 %v1456_v49, %v3691_v30 }
 0x3b1   : > { %v1462_v52 = vpop.permute.xlu1 %1461  ;;  %v1460_v53 = vpop.permute.xlu0 %1459 }
 0x3b2   : > { %v1502_v38 = vadd.f32 %v1462_v52, %v3707_v56  ;;  %v1501_v39 = vadd.f32 %v1460_v53, %v3703_v50 }
 0x3b5   : > { %v1466_v60 = vpop.permute.xlu1 %1465  ;;  %v1464_v61 = vpop.permute.xlu0 %1463 }
 0x3b6   : > { %v1504_v44 = vadd.f32 %v1466_v60, %v3673_v59  ;;  %v1503_v45 = vadd.f32 %v1464_v61, %v3669_v55 }
 0x3b9   : > { %v1470_v62 = vpop.permute.xlu1 %1469  ;;  %v1468_v63 = vpop.permute.xlu0 %1467 }
 0x3ba   : > { %v1505_v55 = vadd.f32 %v1468_v63, %v3681_v10 }
 0x3bd   : > { %v3786_v0 = vpop.permute.xlu1 %1473  ;;  %v3788_v1 = vpop.permute.xlu0 %1471 }
 0x3be   : > { %v1508_v10 = vadd.f32 %v3786_v0, %v3697_v35 }
 0x3c1   : > { %v3790_v2 = vpop.permute.xlu1 %1477  ;;  %v3792_v3 = vpop.permute.xlu0 %1475 }
 0x3c2   : > { %v1510_v35 = vadd.f32 %v3790_v2, %v3709_v57 }
 0x3c5   : > { %v1514_v6 = vpop.permute.xlu1 %1513  ;;  %v1512_v7 = vpop.permute.xlu0 %1511 }
 0x3c6   : > { %v1560_v22 = vadd.f32 %v1514_v6, %v1496_v5  ;;  %v1559_v8 = vadd.f32 %v1512_v7, %v1495_v4  ;;  %v1506_v6 = vadd.f32 %v1470_v62, %v3685_v14 }
 0x3c8   : > { %v1576_v16 = vmul.f32 0.33333334, %v1560_v22  ;;  %v1575_v17 = vmul.f32 0.33333334, %v1559_v8 }
 0x3c9   : > { %v1518_v19 = vpop.permute.xlu1 %1517  ;;  %v1516_v20 = vpop.permute.xlu0 %1515 }
 0x3ca   : > { %v1599_v54 = vmul.f32 %v3796_v11, %v1576_v16  ;;  %v1598_v58 = vmul.f32 %v3796_v11, %v1575_v17  ;;  %v1562_v21 = vadd.f32 %v1518_v19, %v1498_v15  ;;  %v1561_v23 = vadd.f32 %v1516_v20, %v1497_v12 }
 0x3cc   : > { %v1622_v24 = vadd.f32 %v3800_v18, %v1599_v54  ;;  %v1621_v25 = vadd.f32 %v3800_v18, %v1598_v58  ;;  %v1578_v26 = vmul.f32 0.33333334, %v1562_v21  ;;  %v1577_v9 = vmul.f32 0.33333334, %v1561_v23 }
 0x3cd   : > { %v1522_v28 = vpop.permute.xlu1 %1521  ;;  %v1520_v29 = vpop.permute.xlu0 %1519  ;;  %v1507_v21 = vadd.f32 %v3788_v1, %v3693_v31 }
 0x3ce   : > { %v1638_v32 = vsub.f32 0.0, %v1622_v24  ;;  %v1637_v33 = vsub.f32 0.0, %v1621_v25  ;;  %v1601_v36 = vmul.f32 %v3796_v11, %v1578_v26  ;;  %v1600_v37 = vmul.f32 %v3796_v11, %v1577_v9 }
 0x3cf   : > { %v1564_v40 = vadd.f32 %v1522_v28, %v1500_v13  ;;  %v1563_v41 = vadd.f32 %v1520_v29, %v1499_v27 }
 0x3d0   : > { %v1655_v42 = vmul.f32 1.442695, %v1638_v32  ;;  %v1653_v43 = vmul.f32 1.442695, %v1637_v33  ;;  %v1624_v34 = vadd.f32 %v3800_v18, %v1601_v36  ;;  %v1623_v30 = vadd.f32 %v3800_v18, %v1600_v37 }
 0x3d1   : > { %v1580_v46 = vmul.f32 0.33333334, %v1564_v40  ;;  %v1579_v47 = vmul.f32 0.33333334, %v1563_v41  ;;  %v1526_v48 = vpop.permute.xlu1 %1525  ;;  %v1524_v49 = vpop.permute.xlu0 %1523 }
 0x3d2   : > { %3209 = vpow2.f32 %v1655_v42  ;;  %v1640_v56 = vsub.f32 0.0, %v1624_v34  ;;  %v1639_v52 = vsub.f32 0.0, %v1623_v30  ;;  %v1566_v50 = vadd.f32 %v1526_v48, %v1502_v38 }
 0x3d3   : > { %3211 = vpow2.f32 %v1653_v43  ;;  %v1603_v53 = vmul.f32 %v3796_v11, %v1580_v46  ;;  %v1602_v4 = vmul.f32 %v3796_v11, %v1579_v47  ;;  %v1565_v5 = vadd.f32 %v1524_v49, %v1501_v39 }
 0x3d4   : > { %v1659_v7 = vmul.f32 1.442695, %v1640_v56  ;;  %v1657_v59 = vmul.f32 1.442695, %v1639_v52  ;;  %v1582_v60 = vmul.f32 0.33333334, %v1566_v50  ;;  %v1509_v38 = vadd.f32 %v3792_v3, %v3705_v51 }
 0x3d5   : > { %v1626_v61 = vadd.f32 %v3800_v18, %v1603_v53  ;;  %v1625_v22 = vadd.f32 %v3800_v18, %v1602_v4  ;;  %v1581_v8 = vmul.f32 0.33333334, %v1565_v5  ;;  %v1530_v12 = vpop.permute.xlu1 %1529  ;;  %v1528_v15 = vpop.permute.xlu0 %1527 }
 0x3d6   : > { %3213 = vpow2.f32 %v1659_v7  ;;  %v1605_v16 = vmul.f32 %v3796_v11, %v1582_v60  ;;  %v1568_v17 = vadd.f32 %v1530_v12, %v1504_v44  ;;  %v1567_v19 = vadd.f32 %v1528_v15, %v1503_v45 }
 0x3d7   : > { %3215 = vpow2.f32 %v1657_v59  ;;  %v1642_v20 = vsub.f32 0.0, %v1626_v61  ;;  %v1641_v14 = vsub.f32 0.0, %v1625_v22  ;;  %v1604_v62 = vmul.f32 %v3796_v11, %v1581_v8 }
 0x3d8   : > { %v1628_v63 = vadd.f32 %v3800_v18, %v1605_v16  ;;  %v1584_v54 = vmul.f32 0.33333334, %v1568_v17  ;;  %v1583_v58 = vmul.f32 0.33333334, %v1567_v19 }
 0x3d9   : > { %v1663_v23 = vmul.f32 1.442695, %v1642_v20  ;;  %v1661_v24 = vmul.f32 1.442695, %v1641_v14  ;;  %v1627_v25 = vadd.f32 %v3800_v18, %v1604_v62  ;;  %v1534_v26 = vpop.permute.xlu1 %1533  ;;  %v1532_v9 = vpop.permute.xlu0 %1531 }
 0x3da   : > { %v1644_v13 = vsub.f32 0.0, %v1628_v63  ;;  %v1607_v27 = vmul.f32 %v3796_v11, %v1584_v54  ;;  %v1606_v28 = vmul.f32 %v3796_v11, %v1583_v58  ;;  %v1570_v29 = vadd.f32 %v1534_v26, %v1506_v6 }
 0x3db   : > { %3217 = vpow2.f32 %v1663_v23  ;;  %v1643_v0 = vsub.f32 0.0, %v1627_v25  ;;  %v1569_v32 = vadd.f32 %v1532_v9, %v1505_v55 }
 0x3dc   : > { %v3210_v33 = vpop.eup %3209  ;;  %3219 = vpow2.f32 %v1661_v24  ;;  %v1667_v31 = vmul.f32 1.442695, %v1644_v13  ;;  %v1630_v1 = vadd.f32 %v3800_v18, %v1607_v27  ;;  %v1629_v36 = vadd.f32 %v3800_v18, %v1606_v28 }
 0x3dd   : > { %v3212_v37 = vpop.eup %3211  ;;  %v1686_v39 = vadd.f32 1.0, %v3210_v33  ;;  %v1665_v40 = vmul.f32 1.442695, %v1643_v0  ;;  %v1586_v41 = vmul.f32 0.33333334, %v1570_v29  ;;  %v1538_v42 = vpop.permute.xlu1 %1537 }
 0x3de   : > { %v1536_v43 = vpop.permute.xlu0 %1535  ;;  %v1685_v57 = vadd.f32 1.0, %v3212_v37  ;;  %3221 = vpow2.f32 %v1667_v31  ;;  %v1646_v2 = vsub.f32 0.0, %v1630_v1  ;;  %v1645_v34 = vsub.f32 0.0, %v1629_v36 }
 0x3df   : > { %3223 = vrcp.f32 %v1686_v39  ;;  %v1609_v30 = vmul.f32 %v3796_v11, %v1586_v41  ;;  %v1585_v44 = vmul.f32 0.33333334, %v1569_v32  ;;  %v1572_v45 = vadd.f32 %v1538_v42, %v1508_v10 }
 0x3e0   : > { %v3214_v46 = vpop.eup %3213  ;;  %3225 = vrcp.f32 %v1685_v57  ;;  %v1671_v47 = vmul.f32 1.442695, %v1646_v2  ;;  %v1669_v48 = vmul.f32 1.442695, %v1645_v34  ;;  %v1571_v51 = vadd.f32 %v1536_v43, %v1507_v21 }
 0x3e1   : > { %v3216_v3 = vpop.eup %3215  ;;  %v1688_v49 = vadd.f32 1.0, %v3214_v46  ;;  %3227 = vpow2.f32 %v1665_v40  ;;  %v1632_v56 = vadd.f32 %v3800_v18, %v1609_v30  ;;  %v1608_v52 = vmul.f32 %v3796_v11, %v1585_v44  ;;  %v1542_v50 = vpop.permute.xlu1 %1541 }
 0x3e2   : > { %v1540_v53 = vpop.permute.xlu0 %1539  ;;  %v1687_v4 = vadd.f32 1.0, %v3216_v3  ;;  %3229 = vpow2.f32 %v1671_v47  ;;  %v1588_v5 = vmul.f32 0.33333334, %v1572_v45  ;;  %v1587_v6 = vmul.f32 0.33333334, %v1571_v51 }
 0x3e3   : > { %3231 = vrcp.f32 %v1688_v49  ;;  %v1648_v7 = vsub.f32 0.0, %v1632_v56  ;;  %v1631_v59 = vadd.f32 %v3800_v18, %v1608_v52  ;;  %v1574_v60 = vadd.f32 %v1542_v50, %v1510_v35 }
 0x3e4   : > { %3233 = vrcp.f32 %v1687_v4  ;;  %v1611_v55 = vmul.f32 %v3796_v11, %v1588_v5  ;;  %v1610_v61 = vmul.f32 %v3796_v11, %v1587_v6  ;;  %v1573_v22 = vadd.f32 %v1540_v53, %v1509_v38 }
 0x3e5   : > { %v3218_v8 = vpop.eup %3217  ;;  %3235 = vpow2.f32 %v1669_v48  ;;  %v1675_v12 = vmul.f32 1.442695, %v1648_v7  ;;  %v1647_v15 = vsub.f32 0.0, %v1631_v59  ;;  %v1590_v16 = vmul.f32 0.33333334, %v1574_v60 }
 0x3e6   : > { %v3220_v17 = vpop.eup %3219  ;;  %v1690_v19 = vadd.f32 1.0, %v3218_v8  ;;  %v1634_v20 = vadd.f32 %v3800_v18, %v1611_v55  ;;  %v1633_v14 = vadd.f32 %v3800_v18, %v1610_v61  ;;  %v1589_v62 = vmul.f32 0.33333334, %v1573_v22 }
 0x3e7   : > { %v1689_v10 = vadd.f32 1.0, %v3220_v17  ;;  %3237 = vpow2.f32 %v1675_v12  ;;  %v1673_v63 = vmul.f32 1.442695, %v1647_v15  ;;  %v1613_v54 = vmul.f32 %v3796_v11, %v1590_v16 }
 0x3e8   : > { %v3222_v58 = vpop.eup %3221  ;;  %3239 = vrcp.f32 %v1690_v19  ;;  %v1650_v21 = vsub.f32 0.0, %v1634_v20  ;;  %v1649_v23 = vsub.f32 0.0, %v1633_v14  ;;  %v1612_v24 = vmul.f32 %v3796_v11, %v1589_v62 }
 0x3e9   : > { %v3224_v25 = vpop.eup %3223  ;;  %3241 = vrcp.f32 %v1689_v10  ;;  %v1692_v26 = vadd.f32 1.0, %v3222_v58  ;;  %v1636_v9 = vadd.f32 %v3800_v18, %v1613_v54 }
 0x3ea   : > { %v3226_v13 = vpop.eup %3225  ;;  %1735 = vst.msk [vmem:[%s3507_s22 + $0x8] sm:$0xff] %vm1733_vm1, %v3224_v25  ;;  %3243 = vpow2.f32 %v1673_v63  ;;  %v1679_v27 = vmul.f32 1.442695, %v1650_v21  ;;  %v1677_v28 = vmul.f32 1.442695, %v1649_v23  ;;  %v1635_v29 = vadd.f32 %v3800_v18, %v1612_v24 }
 0x3eb   : > { %v3228_v35 = vpop.eup %3227  ;;  %1734 = vst.msk [vmem:[%s3507_s22] sm:$0xff] %vm1733_vm1, %v3226_v13  ;;  %3245 = vrcp.f32 %v1692_v26  ;;  %v1652_v11 = vsub.f32 0.0, %v1636_v9 }
 0x3ec   : > { %v3230_v0 = vpop.eup %3229  ;;  %v1691_v32 = vadd.f32 1.0, %v3228_v35  ;;  %3247 = vpow2.f32 %v1679_v27  ;;  %v1651_v33 = vsub.f32 0.0, %v1635_v29 }
 0x3ed   : > { %v3232_v31 = vpop.eup %3231  ;;  %v1694_v1 = vadd.f32 1.0, %v3230_v0  ;;  %3249 = vpow2.f32 %v1677_v28  ;;  %v1683_v36 = vmul.f32 1.442695, %v1652_v11 }
 0x3ee   : > { %v3234_v37 = vpop.eup %3233  ;;  %1737 = vst.msk [vmem:[%s3507_s22 + $0x18] sm:$0xff] %vm1733_vm1, %v3232_v31  ;;  %3251 = vrcp.f32 %v1691_v32  ;;  %v1681_v18 = vmul.f32 1.442695, %v1651_v33 }
 0x3ef   : > { %v3236_v38 = vpop.eup %3235  ;;  %1736 = vst.msk [vmem:[%s3507_s22 + $0x10] sm:$0xff] %vm1733_vm1, %v3234_v37  ;;  %3253 = vrcp.f32 %v1694_v1 }
 0x3f0   : > { %v1693_v39 = vadd.f32 1.0, %v3236_v38  ;;  %3255 = vpow2.f32 %v1683_v36 }
 0x3f1   : > { %v3238_v40 = vpop.eup %3237  ;;  %3257 = vpow2.f32 %v1681_v18 }
 0x3f2   : > { %v3240_v41 = vpop.eup %3239  ;;  %3259 = vrcp.f32 %v1693_v39  ;;  %v1696_v42 = vadd.f32 1.0, %v3238_v40 }
 0x3f3   : > { %v3242_v43 = vpop.eup %3241  ;;  %1739 = vst.msk [vmem:[%s3507_s22 + $0x28] sm:$0xff] %vm1733_vm1, %v3240_v41 }
 0x3f4   : > { %v3244_v57 = vpop.eup %3243  ;;  %1738 = vst.msk [vmem:[%s3507_s22 + $0x20] sm:$0xff] %vm1733_vm1, %v3242_v43  ;;  %3261 = vrcp.f32 %v1696_v42 }
 0x3f5   : > { %v3246_v2 = vpop.eup %3245  ;;  %v1695_v34 = vadd.f32 1.0, %v3244_v57 }
 0x3f6   : > { %v3248_v30 = vpop.eup %3247  ;;  %1741 = vst.msk [vmem:[%s3507_s22 + $0x38] sm:$0xff] %vm1733_vm1, %v3246_v2 }
 0x3f7   : > { %v3250_v44 = vpop.eup %3249  ;;  %3263 = vrcp.f32 %v1695_v34  ;;  %v1698_v45 = vadd.f32 1.0, %v3248_v30 }
 0x3f8   : > { %v3252_v46 = vpop.eup %3251  ;;  %v1697_v47 = vadd.f32 1.0, %v3250_v44 }
 0x3f9   : > { %v3254_v48 = vpop.eup %3253  ;;  %1740 = vst.msk [vmem:[%s3507_s22 + $0x30] sm:$0xff] %vm1733_vm1, %v3252_v46  ;;  %3265 = vrcp.f32 %v1698_v45 }
 0x3fa   : > { %v3256_v51 = vpop.eup %3255  ;;  %1743 = vst.msk [vmem:[%s3507_s22 + $0x48] sm:$0xff] %vm1733_vm1, %v3254_v48  ;;  %3267 = vrcp.f32 %v1697_v47 }
 0x3fb   : > { %v3258_v3 = vpop.eup %3257  ;;  %v1700_v49 = vadd.f32 1.0, %v3256_v51 }
 0x3fc   : > { %v3260_v56 = vpop.eup %3259  ;;  %v1699_v52 = vadd.f32 1.0, %v3258_v3 }
 0x3fd   : > { %1742 = vst.msk [vmem:[%s3507_s22 + $0x40] sm:$0xff] %vm1733_vm1, %v3260_v56  ;;  %3269 = vrcp.f32 %v1700_v49 }
 0x3fe   : > { %v3262_v50 = vpop.eup %3261  ;;  %3271 = vrcp.f32 %v1699_v52 }
 0x3ff   : > { %1745 = vst.msk [vmem:[%s3507_s22 + $0x58] sm:$0xff] %vm1733_vm1, %v3262_v50 }
 0x401   : > { %v3264_v53 = vpop.eup %3263 }
 0x402   : > { %1744 = vst.msk [vmem:[%s3507_s22 + $0x50] sm:$0xff] %vm1733_vm1, %v3264_v53 }
 0x403   : > { %v3266_v4 = vpop.eup %3265 }
 0x404   : > { %v3268_v5 = vpop.eup %3267  ;;  %1747 = vst.msk [vmem:[%s3507_s22 + $0x68] sm:$0xff] %vm1733_vm1, %v3266_v4 }
 0x405   : > { %1746 = vst.msk [vmem:[%s3507_s22 + $0x60] sm:$0xff] %vm1733_vm1, %v3268_v5 }
 0x407   : > { %v3270_v6 = vpop.eup %3269 }
 0x408   : > { %v3272_v7 = vpop.eup %3271  ;;  %1749 = vst.msk [vmem:[%s3507_s22 + $0x78] sm:$0xff] %vm1733_vm1, %v3270_v6 }
 0x409   : > { %1748 = vst.msk [vmem:[%s3507_s22 + $0x70] sm:$0xff] %vm1733_vm1, %v3272_v7 }
 0x40a PF: > { %p2684_p13 = scmp.eq.s32.totalorder %s4158_s23, 0 }
 0x40b   : > { %v1778_v59 = vld [vmem:[#allocation3 + $0x40] sm:$0xff] (!%p2684_p13)  ;;  %v1779_v55 = vld [vmem:[#allocation3 + $0x48] sm:$0xff] (!%p2684_p13)  ;;  %v1780_v22 = vld [vmem:[#allocation3 + $0x50] sm:$0xff] (!%p2684_p13)  ;;  %s3900_s23 = scalar_lea.vmem (!%p2684_p13), [#allocation4], %s3496_s15  ;;  %p2701_p0 = scmp.ge.s32.totalorder (!%p2684_p13), %s3395_s10, 3 }
 0x40c   : > { %1753 = sbr.rel (%p2684_p13) target bundleno = 1766 (0x6e6), region = 72  ;;  %v1770_v60 = vld [vmem:[#allocation3] sm:$0xff] (!%p2684_p13)  ;;  %2833 = vmatprep.subr.bf16.mxu0 (!%p2684_p13), %v1778_v59  ;;  %3081 = vmatprep.subr.bf16.mxu1 (!%p2684_p13), %v1778_v59  ;;  %v1771_v61 = vld [vmem:[#allocation3 + $0x8] sm:$0xff] (!%p2684_p13)  ;;  %v1772_v12 = vld [vmem:[#allocation3 + $0x10] sm:$0xff] (!%p2684_p13) }
 0x40d   : > { %2834 = vmatpush3.bf16.msra.mxu0 (!%p2684_p13), %v1770_v60  ;;  %3089 = vmatpush3.bf16.msra.mxu1 (!%p2684_p13), %v1770_v60  ;;  %v3275_v8 = vld [vmem:[%s3502_s19 + $0x4] ss:$8 sps:$4 sm:$0xff] (!%p2684_p13)   ;;  %v1781_v16 = vld [vmem:[#allocation3 + $0x58] sm:$0xff] (!%p2684_p13)  ;;  %v1784_v10 = vld [vmem:[#allocation3 + $0x70] sm:$0xff] (!%p2684_p13) }
 0x40e   : > { %2835 = vmatprep.subr.bf16.mxu0 (!%p2684_p13), %v1779_v55  ;;  %3082 = vmatprep.subr.bf16.mxu1 (!%p2684_p13), %v1779_v55  ;;  %v3278_v15 = vld [vmem:[%s3502_s19 + $0x44] ss:$8 sps:$4 sm:$0xff] (!%p2684_p13)   ;;  %v1773_v17 = vld [vmem:[#allocation3 + $0x18] sm:$0xff] (!%p2684_p13)  ;;  %v1776_v63 = vld [vmem:[#allocation3 + $0x30] sm:$0xff] (!%p2684_p13) }
 0x40f   : > { %1915 = vmatprep.mubr.bf16.mxu0 (!%p2684_p13), %v3275_v8  ;;  %1947 = vmatprep.mubr.bf16.mxu1 (!%p2684_p13), %v3278_v15  ;;  %v1782_v19 = vld [vmem:[#allocation3 + $0x60] sm:$0xff] (!%p2684_p13)  ;;  %v1783_v14 = vld [vmem:[#allocation3 + $0x68] sm:$0xff] (!%p2684_p13)  ;;  %v1785_v54 = vld [vmem:[#allocation3 + $0x78] sm:$0xff] (!%p2684_p13) }
 0x410   : > { %v1774_v20 = vld [vmem:[#allocation3 + $0x20] sm:$0xff] (!%p2684_p13)  ;;  %v1775_v62 = vld [vmem:[#allocation3 + $0x28] sm:$0xff] (!%p2684_p13)  ;;  %v1777_v58 = vld [vmem:[#allocation3 + $0x38] sm:$0xff] (!%p2684_p13) }
 0x411   : > { %2836 = vmatpush3.bf16.msra.mxu0 (!%p2684_p13), %v1771_v61  ;;  %3090 = vmatpush3.bf16.msra.mxu1 (!%p2684_p13), %v1771_v61  ;;  %v3273_v21 = vld [vmem:[%s3502_s19] ss:$8 sps:$4 sm:$0xff] (!%p2684_p13)   ;;  %v3279_v24 = vld [vmem:[%s3502_s19 + $0x14] ss:$8 sps:$4 sm:$0xff] (!%p2684_p13)   ;;  %v3283_v26 = vld [vmem:[%s3502_s19 + $0x10] ss:$8 sps:$4 sm:$0xff] (!%p2684_p13)  }
 0x412   : > { %2837 = vmatprep.subr.bf16.mxu0 (!%p2684_p13), %v1780_v22  ;;  %3083 = vmatprep.subr.bf16.mxu1 (!%p2684_p13), %v1780_v22  ;;  %v3276_v23 = vld [vmem:[%s3502_s19 + $0x40] ss:$8 sps:$4 sm:$0xff] (!%p2684_p13)   ;;  %v3281_v25 = vld [vmem:[%s3502_s19 + $0x54] ss:$8 sps:$4 sm:$0xff] (!%p2684_p13)   ;;  %v3284_v9 = vld [vmem:[%s3502_s19 + $0x50] ss:$8 sps:$4 sm:$0xff] (!%p2684_p13)  }
 0x413   : > { %v3285_v13 = vld [vmem:[%s3502_s19 + $0x24] ss:$8 sps:$4 sm:$0xff]   ;;  %v3289_v28 = vld [vmem:[%s3502_s19 + $0x20] ss:$8 sps:$4 sm:$0xff]   ;;  %v3291_v35 = vld [vmem:[%s3502_s19 + $0x34] ss:$8 sps:$4 sm:$0xff]  }
 0x414   : > { %v3287_v27 = vld [vmem:[%s3502_s19 + $0x64] ss:$8 sps:$4 sm:$0xff]   ;;  %v3290_v29 = vld [vmem:[%s3502_s19 + $0x60] ss:$8 sps:$4 sm:$0xff]   ;;  %v3293_v11 = vld [vmem:[%s3502_s19 + $0x74] ss:$8 sps:$4 sm:$0xff]  }
 0x415   : > { %2838 = vmatpush3.bf16.msra.mxu0 %v1772_v12  ;;  %3091 = vmatpush3.bf16.msra.mxu1 %v1772_v12  ;;  %v3295_v0 = vld [vmem:[%s3502_s19 + $0x30] ss:$8 sps:$4 sm:$0xff]   ;;  %v1787_v1 = vld [vmem:[%s3900_s23] sm:$0xff]  ;;  %v1788_v42 = vld [vmem:[%s3900_s23 + $0x8] sm:$0xff] }
 0x416   : > { %2839 = vmatprep.subr.bf16.mxu0 %v1781_v16  ;;  %3084 = vmatprep.subr.bf16.mxu1 %v1781_v16  ;;  %v3296_v32 = vld [vmem:[%s3502_s19 + $0x70] ss:$8 sps:$4 sm:$0xff]   ;;  %v1795_v37 = vld [vmem:[%s3900_s23 + $0x40] sm:$0xff]  ;;  %v1796_v57 = vld [vmem:[%s3900_s23 + $0x48] sm:$0xff]  ;;  %s2161_s19 = sshra.s32 (!%p2701_p0), %s3496_s15, 4 }
 0x417   : > { %v1789_v3 = vld [vmem:[%s3900_s23 + $0x10] sm:$0xff]  ;;  %v1790_v6 = vld [vmem:[%s3900_s23 + $0x18] sm:$0xff]  ;;  %s2710_s14 = sshll.u32 (!%p2701_p0), %s2161_s19, 3 }
 0x418   : > { %v1797_v56 = vld [vmem:[%s3900_s23 + $0x50] sm:$0xff]  ;;  %v1798_v59 = vld [vmem:[%s3900_s23 + $0x58] sm:$0xff]  ;;  %s2164_s16 = scalar_lea.vmem (!%p2701_p0), [#allocation2], %s2710_s14 }
 0x419   : > { %2840 = vmatpush3.bf16.msra.mxu0 %v1773_v17  ;;  %3092 = vmatpush3.bf16.msra.mxu1 %v1773_v17 }
 0x41a   : > { %2841 = vmatprep.subr.bf16.mxu0 %v1782_v19  ;;  %3085 = vmatprep.subr.bf16.mxu1 %v1782_v19  ;;  %v1791_v19 = vld [vmem:[%s3900_s23 + $0x20] sm:$0xff] }
 0x41d   : > { %2842 = vmatpush3.bf16.msra.mxu0 %v1774_v20  ;;  %3093 = vmatpush3.bf16.msra.mxu1 %v1774_v20 }
 0x41e   : > { %2843 = vmatprep.subr.bf16.mxu0 %v1783_v14  ;;  %3086 = vmatprep.subr.bf16.mxu1 %v1783_v14  ;;  %v1799_v14 = vld [vmem:[%s3900_s23 + $0x60] sm:$0xff] }
 0x421   : > { %2844 = vmatpush3.bf16.msra.mxu0 %v1775_v62  ;;  %3094 = vmatpush3.bf16.msra.mxu1 %v1775_v62 }
 0x422   : > { %2845 = vmatprep.subr.bf16.mxu0 %v1784_v10  ;;  %3087 = vmatprep.subr.bf16.mxu1 %v1784_v10 }
 0x425   : > { %2846 = vmatpush3.bf16.msra.mxu0 %v1776_v63  ;;  %3095 = vmatpush3.bf16.msra.mxu1 %v1776_v63 }
 0x426   : > { %2847 = vmatprep.subr.bf16.mxu0 %v1785_v54  ;;  %3088 = vmatprep.subr.bf16.mxu1 %v1785_v54 }
 0x429   : > { %2848 = vmatpush3.bf16.msra.mxu0 %v1777_v58  ;;  %3096 = vmatpush3.bf16.msra.mxu1 %v1777_v58 }
 0x42c   : > { %1916 = vmatmul.mubr.bf16.vlgmr.msra.gmra.mrb[0].mxu0 %v3273_v21  ;;  %1948 = vmatmul.mubr.bf16.vlgmr.msra.gmra.mrb[0].mxu1 %v3276_v23  ;;  %v1792_v21 = vld [vmem:[%s3900_s23 + $0x28] sm:$0xff] }
 0x42d   : > { %1923 = vmatprep.mubr.bf16.mxu0 %v3279_v24  ;;  %1955 = vmatprep.mubr.bf16.mxu1 %v3281_v25  ;;  %v1800_v24 = vld [vmem:[%s3900_s23 + $0x68] sm:$0xff] }
 0x434   : > { %1924 = vmatmul.mubr.bf16.gmra.mrb[4].mxu0 %v3283_v26  ;;  %1956 = vmatmul.mubr.bf16.gmra.mrb[4].mxu1 %v3284_v9 }
 0x435   : > { %1931 = vmatprep.mubr.bf16.mxu0 %v3285_v13  ;;  %1963 = vmatprep.mubr.bf16.mxu1 %v3287_v27 }
 0x43c   : > { %1932 = vmatmul.mubr.bf16.gmra.mrb[8].mxu0 %v3289_v28  ;;  %1964 = vmatmul.mubr.bf16.gmra.mrb[8].mxu1 %v3290_v29 }
 0x43d   : > { %1939 = vmatprep.mubr.bf16.mxu0 %v3291_v35  ;;  %1971 = vmatprep.mubr.bf16.mxu1 %v3293_v11 }
 0x444   : > { %1940 = vmatmul.mubr.bf16.gmra.mrb[12].mxu0 %v3295_v0  ;;  %1972 = vmatmul.mubr.bf16.gmra.mrb[12].mxu1 %v3296_v32  ;;  %v1793_v0 = vld [vmem:[%s3900_s23 + $0x30] sm:$0xff] }
 0x4ff   : > { %v2849_v33 = vpop.f32.mrb[0].mxu0  ;;  %v2873_v31 = vpop.f32.mrb[0].mxu1 }
 0x500   : > { %v2850_v36 = vpop.f32.mrb[1].mxu0  ;;  %v2874_v18 = vpop.f32.mrb[1].mxu1 }
 0x501   : > { %v2851_v38 = vadd.f32 %v2850_v36, %v2849_v33  ;;  %v2875_v39 = vadd.f32 %v2874_v18, %v2873_v31  ;;  %v2852_v40 = vpop.f32.mrb[2].mxu0  ;;  %v2876_v41 = vpop.f32.mrb[2].mxu1  ;;  %v1801_v33 = vld [vmem:[%s3900_s23 + $0x70] sm:$0xff] }
 0x502   : > { %v2853_v43 = vpop.f32.mrb[3].mxu0  ;;  %v2877_v2 = vpop.f32.mrb[3].mxu1 }
 0x503   : > { %v3906_v34 = vadd.f32 %v2851_v38, %v1787_v1  ;;  %v3908_v30 = vadd.f32 %v2875_v39, %v1795_v37  ;;  %v2854_v44 = vadd.f32 %v2853_v43, %v2852_v40  ;;  %v2878_v45 = vadd.f32 %v2877_v2, %v2876_v41  ;;  %v1794_v38 = vld [vmem:[%s3900_s23 + $0x38] sm:$0xff] }
 0x504   : > { %v1802_v40 = vld [vmem:[%s3900_s23 + $0x78] sm:$0xff] }
 0x505   : > { %v3910_v46 = vadd.f32 %v2854_v44, %v1788_v42  ;;  %v3912_v47 = vadd.f32 %v2878_v45, %v1796_v57 }
 0x507   : > { %v2855_v48 = vpop.f32.mrb[4].mxu0  ;;  %v2879_v51 = vpop.f32.mrb[4].mxu1 }
 0x508   : > { %v2856_v49 = vpop.f32.mrb[5].mxu0  ;;  %v2880_v52 = vpop.f32.mrb[5].mxu1 }
 0x509   : > { %v2857_v50 = vadd.f32 %v2856_v49, %v2855_v48  ;;  %v2881_v53 = vadd.f32 %v2880_v52, %v2879_v51  ;;  %v2858_v4 = vpop.f32.mrb[6].mxu0  ;;  %v2882_v5 = vpop.f32.mrb[6].mxu1  ;;  %v3297_v48 = vld [vmem:[%s4139_s3] sm:$0xff] (!%p2701_p0)   ;;  %v3298_v51 = vld [vmem:[%s4139_s3 + $0x8] sm:$0xff] (!%p2701_p0)   ;;  %v1988_v49 = vpack.c.bf16 (!%p2701_p0), %v3912_v47, %v3908_v30  ;;  %v3300_v52 = vld [vmem:[%s4139_s3 + $0x18] sm:$0xff] (!%p2701_p0)  }
 0x50a   : > { %v2859_v7 = vpop.f32.mrb[7].mxu0  ;;  %v2883_v60 = vpop.f32.mrb[7].mxu1  ;;  %3017 = vmatprep.subr.bf16.mxu0 (!%p2701_p0), %v3297_v48  ;;  %3097 = vmatprep.subr.bf16.mxu1 (!%p2701_p0), %v3297_v48 }
 0x50b   : > { %v3918_v55 = vadd.f32 %v2857_v50, %v1789_v3  ;;  %v3920_v61 = vadd.f32 %v2881_v53, %v1797_v56  ;;  %v2860_v22 = vadd.f32 %v2859_v7, %v2858_v4  ;;  %v2884_v8 = vadd.f32 %v2883_v60, %v2882_v5  ;;  %3018 = vmatpush3.bf16.msra.mxu0 (!%p2701_p0), %v3297_v48  ;;  %v3299_v56 = vld [vmem:[%s4139_s3 + $0x10] sm:$0xff] (!%p2701_p0)   ;;  %v3301_v50 = vld [vmem:[%s4139_s3 + $0x20] sm:$0xff] (!%p2701_p0)   ;;  %v3302_v53 = vld [vmem:[%s4139_s3 + $0x28] sm:$0xff] (!%p2701_p0)  }
 0x50c   : > { %v1984_v3 = vpack.c.bf16 (!%p2701_p0), %v3910_v46, %v3906_v34  ;;  %3105 = vmatpush3.bf16.msra.mxu1 (!%p2701_p0), %v3297_v48  ;;  %3019 = vmatprep.subr.bf16.mxu0 (!%p2701_p0), %v3298_v51  ;;  %v3303_v4 = vld [vmem:[%s4139_s3 + $0x30] sm:$0xff] (!%p2701_p0)   ;;  %v3304_v5 = vld [vmem:[%s4139_s3 + $0x38] sm:$0xff] (!%p2701_p0)  }
 0x50d   : > { %v3922_v12 = vadd.f32 %v2860_v22, %v1790_v6  ;;  %v3924_v15 = vadd.f32 %v2884_v8, %v1798_v59  ;;  %3098 = vmatprep.subr.bf16.mxu1 (!%p2701_p0), %v3298_v51  ;;  %3041 = vmatprep.mubr.bf16.mxu1 (!%p2701_p0), %v1988_v49 }
 0x50e   : > { %3033 = vmatprep.mubr.bf16.mxu0 (!%p2701_p0), %v1984_v3 }
 0x50f   : > { %v2861_v16 = vpop.f32.mrb[8].mxu0  ;;  %v2885_v17 = vpop.f32.mrb[8].mxu1  ;;  %3020 = vmatpush3.bf16.msra.mxu0 (!%p2701_p0), %v3298_v51  ;;  %v1985_v6 = vpack.c.bf16 (!%p2701_p0), %v3922_v12, %v3918_v55  ;;  %v1989_v7 = vpack.c.bf16 (!%p2701_p0), %v3924_v15, %v3920_v61 }
 0x510   : > { %v2862_v20 = vpop.f32.mrb[9].mxu0  ;;  %v2886_v62 = vpop.f32.mrb[9].mxu1  ;;  %3106 = vmatpush3.bf16.msra.mxu1 (!%p2701_p0), %v3298_v51  ;;  %3021 = vmatprep.subr.bf16.mxu0 (!%p2701_p0), %v3299_v56 }
 0x511   : > { %v2863_v10 = vadd.f32 %v2862_v20, %v2861_v16  ;;  %v2887_v63 = vadd.f32 %v2886_v62, %v2885_v17  ;;  %v2864_v54 = vpop.f32.mrb[10].mxu0  ;;  %v2888_v58 = vpop.f32.mrb[10].mxu1  ;;  %3099 = vmatprep.subr.bf16.mxu1 (!%p2701_p0), %v3299_v56 }
 0x512   : > { %v2865_v23 = vpop.f32.mrb[11].mxu0  ;;  %v2889_v25 = vpop.f32.mrb[11].mxu1 }
 0x513   : > { %v3930_v26 = vadd.f32 %v2863_v10, %v1791_v19  ;;  %v3932_v9 = vadd.f32 %v2887_v63, %v1799_v14  ;;  %v2866_v13 = vadd.f32 %v2865_v23, %v2864_v54  ;;  %v2890_v27 = vadd.f32 %v2889_v25, %v2888_v58  ;;  %3022 = vmatpush3.bf16.msra.mxu0 (!%p2701_p0), %v3299_v56 }
 0x514   : > { %3107 = vmatpush3.bf16.msra.mxu1 (!%p2701_p0), %v3299_v56  ;;  %3023 = vmatprep.subr.bf16.mxu0 (!%p2701_p0), %v3300_v52 }
 0x515   : > { %v3934_v28 = vadd.f32 %v2866_v13, %v1792_v21  ;;  %v3936_v29 = vadd.f32 %v2890_v27, %v1800_v24  ;;  %3100 = vmatprep.subr.bf16.mxu1 (!%p2701_p0), %v3300_v52 }
 0x517   : > { %v2867_v35 = vpop.f32.mrb[12].mxu0  ;;  %v2891_v11 = vpop.f32.mrb[12].mxu1  ;;  %1983 = sbr.rel (%p2701_p0) target bundleno = 1549 (0x60d), region = 76  ;;  %3024 = vmatpush3.bf16.msra.mxu0 (!%p2701_p0), %v3300_v52  ;;  %v1986_v59 = vpack.c.bf16 (!%p2701_p0), %v3934_v28, %v3930_v26  ;;  %v1990_v60 = vpack.c.bf16 (!%p2701_p0), %v3936_v29, %v3932_v9 }
 0x518   : > { %v2868_v32 = vpop.f32.mrb[13].mxu0  ;;  %v2892_v31 = vpop.f32.mrb[13].mxu1  ;;  %3108 = vmatpush3.bf16.msra.mxu1 (!%p2701_p0), %v3300_v52  ;;  %3025 = vmatprep.subr.bf16.mxu0 (!%p2701_p0), %v3301_v50 }
 0x519   : > { %v2869_v1 = vadd.f32 %v2868_v32, %v2867_v35  ;;  %v2893_v36 = vadd.f32 %v2892_v31, %v2891_v11  ;;  %v2870_v37 = vpop.f32.mrb[14].mxu0  ;;  %v2894_v18 = vpop.f32.mrb[14].mxu1  ;;  %3101 = vmatprep.subr.bf16.mxu1 (!%p2701_p0), %v3301_v50 }
 0x51a   : > { %v2871_v39 = vpop.f32.mrb[15].mxu0  ;;  %v2895_v41 = vpop.f32.mrb[15].mxu1 }
 0x51b   : > { %v3942_v42 = vadd.f32 %v2869_v1, %v1793_v0  ;;  %v3944_v43 = vadd.f32 %v2893_v36, %v1801_v33  ;;  %v2872_v57 = vadd.f32 %v2871_v39, %v2870_v37  ;;  %v2896_v2 = vadd.f32 %v2895_v41, %v2894_v18  ;;  %3026 = vmatpush3.bf16.msra.mxu0 (!%p2701_p0), %v3301_v50 }
 0x51c   : > { %3109 = vmatpush3.bf16.msra.mxu1 (!%p2701_p0), %v3301_v50  ;;  %3027 = vmatprep.subr.bf16.mxu0 (!%p2701_p0), %v3302_v53 }
 0x51d   : > { %v3946_v44 = vadd.f32 %v2872_v57, %v1794_v38  ;;  %v3948_v45 = vadd.f32 %v2896_v2, %v1802_v40  ;;  %3102 = vmatprep.subr.bf16.mxu1 (!%p2701_p0), %v3302_v53 }
 0x51f   : > { %3028 = vmatpush3.bf16.msra.mxu0 %v3302_v53  ;;  %v1987_v22 = vpack.c.bf16 %v3946_v44, %v3942_v42  ;;  %v1991_v8 = vpack.c.bf16 %v3948_v45, %v3944_v43 }
 0x520   : > { %3110 = vmatpush3.bf16.msra.mxu1 %v3302_v53  ;;  %3029 = vmatprep.subr.bf16.mxu0 %v3303_v4 }
 0x521   : > { %3103 = vmatprep.subr.bf16.mxu1 %v3303_v4 }
 0x523   : > { %3030 = vmatpush3.bf16.msra.mxu0 %v3303_v4 }
 0x524   : > { %3111 = vmatpush3.bf16.msra.mxu1 %v3303_v4  ;;  %3031 = vmatprep.subr.bf16.mxu0 %v3304_v5 }
 0x525   : > { %3104 = vmatprep.subr.bf16.mxu1 %v3304_v5 }
 0x527   : > { %3032 = vmatpush3.bf16.msra.mxu0 %v3304_v5 }
 0x528   : > { %3112 = vmatpush3.bf16.msra.mxu1 %v3304_v5 }
 0x52a   : > { %3034 = vmatmul.mubr.bf16.vlgmr.msra.gmra.mrb[0].mxu0 %v1985_v6 }
 0x52b   : > { %3042 = vmatmul.mubr.bf16.vlgmr.msra.gmra.mrb[0].mxu1 %v1989_v7  ;;  %3037 = vmatprep.mubr.bf16.mxu0 %v1986_v59 }
 0x52c   : > { %3045 = vmatprep.mubr.bf16.mxu1 %v1990_v60 }
 0x532   : > { %3038 = vmatmul.mubr.bf16.gmra.mrb[4].mxu0 %v1987_v22 }
 0x533   : > { %3046 = vmatmul.mubr.bf16.gmra.mrb[4].mxu1 %v1991_v8 }
 0x5fd   : > { %v3035_v16 = vpop.f32.mrb[0].mxu0 }
 0x5fe   : > { %v3043_v17 = vpop.f32.mrb[0].mxu1  ;;  %v2090_v19 = vpop.f32.mrb[1].mxu0 }
 0x5ff   : > { %v2122_v20 = vpop.f32.mrb[1].mxu1  ;;  %v3036_v14 = vpop.f32.mrb[2].mxu0 }
 0x600   : > { %v3044_v62 = vpop.f32.mrb[2].mxu1  ;;  %v2154_v10 = vpack.c.bf16 %v3036_v14, %v3035_v16  ;;  %v2093_v54 = vpop.f32.mrb[3].mxu0 }
 0x601   : > { %v2158_v63 = vpack.c.bf16 %v3044_v62, %v3043_v17  ;;  %v2125_v58 = vpop.f32.mrb[3].mxu1  ;;  %v2153_v21 = vpack.c.bf16 %v2093_v54, %v2090_v19 }
 0x602   : > { %v2157_v23 = vpack.c.bf16 %v2125_v58, %v2122_v20  ;;  %2166 = vst [vmem:[%s2164_s16 + $0x8] sm:$0xff] %v2154_v10 }
 0x603   : > { %2170 = vst [vmem:[%s2164_s16 + $0x28] sm:$0xff] %v2158_v63  ;;  %2165 = vst [vmem:[%s2164_s16] sm:$0xff] %v2153_v21 }
 0x604   : > { %2169 = vst [vmem:[%s2164_s16 + $0x20] sm:$0xff] %v2157_v23 }
 0x605   : > { %v3039_v24 = vpop.f32.mrb[4].mxu0 }
 0x606   : > { %v3047_v25 = vpop.f32.mrb[4].mxu1  ;;  %v2106_v13 = vpop.f32.mrb[5].mxu0 }
 0x607   : > { %v2138_v27 = vpop.f32.mrb[5].mxu1  ;;  %v3040_v35 = vpop.f32.mrb[6].mxu0 }
 0x608   : > { %v3048_v11 = vpop.f32.mrb[6].mxu1  ;;  %v2156_v0 = vpack.c.bf16 %v3040_v35, %v3039_v24  ;;  %v2109_v33 = vpop.f32.mrb[7].mxu0 }
 0x609   : > { %v2160_v32 = vpack.c.bf16 %v3048_v11, %v3047_v25  ;;  %v2141_v31 = vpop.f32.mrb[7].mxu1  ;;  %v2155_v1 = vpack.c.bf16 %v2109_v33, %v2106_v13 }
 0x60a   : > { %v2159_v36 = vpack.c.bf16 %v2141_v31, %v2138_v27  ;;  %2168 = vst [vmem:[%s2164_s16 + $0x18] sm:$0xff] %v2156_v0 }
 0x60b   : > { %2172 = vst [vmem:[%s2164_s16 + $0x38] sm:$0xff] %v2160_v32  ;;  %2167 = vst [vmem:[%s2164_s16 + $0x10] sm:$0xff] %v2155_v1 }
 0x60c   : > { %2171 = vst [vmem:[%s2164_s16 + $0x30] sm:$0xff] %v2159_v36 }
 0x60d PF: > { %p2711_p1 = scmp.ne.s32.totalorder %s3395_s10, 3 }
 0x60e   : > { %s3411_s15 = smov (!%p2711_p1), 127   ;;  %s3412_s10 = smov (!%p2711_p1), 126   ;;  %v4035_v22 = vld [vmem:[#allocation5] ss:$0 sm:$0xff] (!%p2711_p1)  ;;  %v4039_v20 = vld [vmem:[#allocation6] ss:$0 sm:$0xff] (!%p2711_p1) }
 0x60f   : > { %2176 = sbr.rel (%p2711_p1) target bundleno = 1766 (0x6e6), region = 80  ;;  %2197 = vrot.lane.b32.xlu1 (!%p2711_p1), %v3918_v55, %s3411_s15  ;;  %2193 = vrot.lane.b32.xlu0 (!%p2711_p1), %v3906_v34, %s3411_s15  ;;  %vm2479_vm2 = vcmask (!%p2711_p1), 7168  }
 0x613   : > { %2199 = vrot.lane.b32.xlu1 (!%p2711_p1), %v3922_v12, %s3411_s15  ;;  %2195 = vrot.lane.b32.xlu0 (!%p2711_p1), %v3910_v46, %s3411_s15 }
 0x617   : > { %2203 = vrot.lane.b32.xlu1 %v3934_v28, %s3411_s15  ;;  %2201 = vrot.lane.b32.xlu0 %v3930_v26, %s3411_s15 }
 0x61b   : > { %2207 = vrot.lane.b32.xlu1 %v3946_v44, %s3411_s15  ;;  %2205 = vrot.lane.b32.xlu0 %v3942_v42, %s3411_s15 }
 0x61f   : > { %2211 = vrot.lane.b32.xlu1 %v3912_v47, %s3411_s15  ;;  %2209 = vrot.lane.b32.xlu0 %v3908_v30, %s3411_s15 }
 0x623   : > { %2215 = vrot.lane.b32.xlu1 %v3924_v15, %s3411_s15  ;;  %2213 = vrot.lane.b32.xlu0 %v3920_v61, %s3411_s15 }
 0x627   : > { %2219 = vrot.lane.b32.xlu1 %v3936_v29, %s3411_s15  ;;  %2217 = vrot.lane.b32.xlu0 %v3932_v9, %s3411_s15 }
 0x62b   : > { %2223 = vrot.lane.b32.xlu1 %v3948_v45, %s3411_s15  ;;  %2221 = vrot.lane.b32.xlu0 %v3944_v43, %s3411_s15 }
 0x62f   : > { %2259 = vrot.lane.b32.xlu1 %v3910_v46, %s3412_s10  ;;  %2257 = vrot.lane.b32.xlu0 %v3906_v34, %s3412_s10 }
 0x633   : > { %2263 = vrot.lane.b32.xlu1 %v3922_v12, %s3412_s10  ;;  %2261 = vrot.lane.b32.xlu0 %v3918_v55, %s3412_s10 }
 0x637   : > { %2267 = vrot.lane.b32.xlu1 %v3934_v28, %s3412_s10  ;;  %2265 = vrot.lane.b32.xlu0 %v3930_v26, %s3412_s10 }
 0x63b   : > { %2271 = vrot.lane.b32.xlu1 %v3946_v44, %s3412_s10  ;;  %2269 = vrot.lane.b32.xlu0 %v3942_v42, %s3412_s10 }
 0x63f   : > { %2275 = vrot.lane.b32.xlu1 %v3912_v47, %s3412_s10  ;;  %2273 = vrot.lane.b32.xlu0 %v3908_v30, %s3412_s10 }
 0x643   : > { %2279 = vrot.lane.b32.xlu1 %v3924_v15, %s3412_s10  ;;  %2277 = vrot.lane.b32.xlu0 %v3920_v61, %s3412_s10 }
 0x647   : > { %2283 = vrot.lane.b32.xlu1 %v3936_v29, %s3412_s10  ;;  %2281 = vrot.lane.b32.xlu0 %v3932_v9, %s3412_s10 }
 0x64b   : > { %2287 = vrot.lane.b32.xlu1 %v3948_v45, %s3412_s10  ;;  %2285 = vrot.lane.b32.xlu0 %v3944_v43, %s3412_s10 }
 0x681   : > { %v2198_v37 = vpop.permute.xlu1 %2197  ;;  %v2194_v18 = vpop.permute.xlu0 %2193 }
 0x682   : > { %v2241_v4 = vadd.f32 %v2194_v18, %v3906_v34  ;;  %v2243_v8 = vadd.f32 %v2198_v37, %v3918_v55 }
 0x685   : > { %v2200_v38 = vpop.permute.xlu1 %2199  ;;  %v2196_v39 = vpop.permute.xlu0 %2195 }
 0x686   : > { %v2242_v5 = vadd.f32 %v2196_v39, %v3910_v46  ;;  %v2244_v16 = vadd.f32 %v2200_v38, %v3922_v12 }
 0x689   : > { %v2204_v40 = vpop.permute.xlu1 %2203  ;;  %v2202_v41 = vpop.permute.xlu0 %2201 }
 0x68a   : > { %v2246_v12 = vadd.f32 %v2204_v40, %v3934_v28  ;;  %v2245_v23 = vadd.f32 %v2202_v41, %v3930_v26 }
 0x68d   : > { %v2208_v57 = vpop.permute.xlu1 %2207  ;;  %v2206_v2 = vpop.permute.xlu0 %2205 }
 0x68e   : > { %v2248_v0 = vadd.f32 %v2208_v57, %v3946_v44  ;;  %v2247_v32 = vadd.f32 %v2206_v2, %v3942_v42 }
 0x691   : > { %v2212_v48 = vpop.permute.xlu1 %2211  ;;  %v2210_v51 = vpop.permute.xlu0 %2209 }
 0x692   : > { %v2250_v37 = vadd.f32 %v2212_v48, %v3912_v47  ;;  %v2249_v18 = vadd.f32 %v2210_v51, %v3908_v30 }
 0x695   : > { %v2216_v3 = vpop.permute.xlu1 %2215  ;;  %v2214_v49 = vpop.permute.xlu0 %2213 }
 0x696   : > { %v2251_v30 = vadd.f32 %v2214_v49, %v3920_v61 }
 0x699   : > { %v4025_v56 = vpop.permute.xlu1 %2219  ;;  %v4027_v52 = vpop.permute.xlu0 %2217 }
 0x69a   : > { %v2254_v61 = vadd.f32 %v4025_v56, %v3936_v29 }
 0x69d   : > { %v4029_v50 = vpop.permute.xlu1 %2223  ;;  %v4031_v53 = vpop.permute.xlu0 %2221 }
 0x69e   : > { %v2256_v29 = vadd.f32 %v4029_v50, %v3948_v45 }
 0x6a1   : > { %v2260_v6 = vpop.permute.xlu1 %2259  ;;  %v2258_v7 = vpop.permute.xlu0 %2257 }
 0x6a2   : > { %v2306_v59 = vadd.f32 %v2260_v6, %v2242_v5  ;;  %v2305_v60 = vadd.f32 %v2258_v7, %v2241_v4  ;;  %v2252_v6 = vadd.f32 %v2216_v3, %v3924_v15 }
 0x6a4   : > { %v2322_v17 = vmul.f32 0.33333334, %v2306_v59  ;;  %v2321_v19 = vmul.f32 0.33333334, %v2305_v60 }
 0x6a5   : > { %v2264_v14 = vpop.permute.xlu1 %2263  ;;  %v2262_v62 = vpop.permute.xlu0 %2261 }
 0x6a6   : > { %v2345_v34 = vmul.f32 %v4035_v22, %v2322_v17  ;;  %v2344_v46 = vmul.f32 %v4035_v22, %v2321_v19  ;;  %v2308_v10 = vadd.f32 %v2264_v14, %v2244_v16  ;;  %v2307_v63 = vadd.f32 %v2262_v62, %v2243_v8 }
 0x6a8   : > { %v2368_v54 = vadd.f32 %v4039_v20, %v2345_v34  ;;  %v2367_v58 = vadd.f32 %v4039_v20, %v2344_v46  ;;  %v2324_v21 = vmul.f32 0.33333334, %v2308_v10  ;;  %v2323_v55 = vmul.f32 0.33333334, %v2307_v63 }
 0x6a9   : > { %v2268_v24 = vpop.permute.xlu1 %2267  ;;  %v2266_v25 = vpop.permute.xlu0 %2265  ;;  %v2253_v10 = vadd.f32 %v4027_v52, %v3932_v9 }
 0x6aa   : > { %v2384_v13 = vsub.f32 0.0, %v2368_v54  ;;  %v2383_v27 = vsub.f32 0.0, %v2367_v58  ;;  %v2347_v35 = vmul.f32 %v4035_v22, %v2324_v21  ;;  %v2346_v11 = vmul.f32 %v4035_v22, %v2323_v55 }
 0x6ab   : > { %v2310_v33 = vadd.f32 %v2268_v24, %v2246_v12  ;;  %v2309_v31 = vadd.f32 %v2266_v25, %v2245_v23 }
 0x6ac   : > { %v2401_v1 = vmul.f32 1.442695, %v2384_v13  ;;  %v2399_v36 = vmul.f32 1.442695, %v2383_v27  ;;  %v2370_v28 = vadd.f32 %v4039_v20, %v2347_v35  ;;  %v2369_v26 = vadd.f32 %v4039_v20, %v2346_v11 }
 0x6ad   : > { %v2326_v38 = vmul.f32 0.33333334, %v2310_v33  ;;  %v2325_v39 = vmul.f32 0.33333334, %v2309_v31  ;;  %v2272_v40 = vpop.permute.xlu1 %2271  ;;  %v2270_v41 = vpop.permute.xlu0 %2269 }
 0x6ae   : > { %3305 = vpow2.f32 %v2401_v1  ;;  %v2386_v44 = vsub.f32 0.0, %v2370_v28  ;;  %v2385_v57 = vsub.f32 0.0, %v2369_v26  ;;  %v2312_v42 = vadd.f32 %v2272_v40, %v2248_v0 }
 0x6af   : > { %3307 = vpow2.f32 %v2399_v36  ;;  %v2349_v2 = vmul.f32 %v4035_v22, %v2326_v38  ;;  %v2348_v4 = vmul.f32 %v4035_v22, %v2325_v39  ;;  %v2311_v5 = vadd.f32 %v2270_v41, %v2247_v32 }
 0x6b0   : > { %v2405_v7 = vmul.f32 1.442695, %v2386_v44  ;;  %v2403_v47 = vmul.f32 1.442695, %v2385_v57  ;;  %v2328_v48 = vmul.f32 0.33333334, %v2312_v42  ;;  %v2255_v0 = vadd.f32 %v4031_v53, %v3944_v43 }
 0x6b1   : > { %v2372_v51 = vadd.f32 %v4039_v20, %v2349_v2  ;;  %v2371_v59 = vadd.f32 %v4039_v20, %v2348_v4  ;;  %v2327_v60 = vmul.f32 0.33333334, %v2311_v5  ;;  %v2276_v8 = vpop.permute.xlu1 %2275  ;;  %v2274_v16 = vpop.permute.xlu0 %2273 }
 0x6b2   : > { %3309 = vpow2.f32 %v2405_v7  ;;  %v2351_v17 = vmul.f32 %v4035_v22, %v2328_v48  ;;  %v2314_v19 = vadd.f32 %v2276_v8, %v2250_v37  ;;  %v2313_v14 = vadd.f32 %v2274_v16, %v2249_v18 }
 0x6b3   : > { %3311 = vpow2.f32 %v2403_v47  ;;  %v2388_v62 = vsub.f32 0.0, %v2372_v51  ;;  %v2387_v15 = vsub.f32 0.0, %v2371_v59  ;;  %v2350_v3 = vmul.f32 %v4035_v22, %v2327_v60 }
 0x6b4   : > { %v2374_v49 = vadd.f32 %v4039_v20, %v2351_v17  ;;  %v2330_v34 = vmul.f32 0.33333334, %v2314_v19  ;;  %v2329_v46 = vmul.f32 0.33333334, %v2313_v14 }
 0x6b5   : > { %v2409_v63 = vmul.f32 1.442695, %v2388_v62  ;;  %v2407_v54 = vmul.f32 1.442695, %v2387_v15  ;;  %v2373_v58 = vadd.f32 %v4039_v20, %v2350_v3  ;;  %v2280_v21 = vpop.permute.xlu1 %2279  ;;  %v2278_v55 = vpop.permute.xlu0 %2277 }
 0x6b6   : > { %v2390_v12 = vsub.f32 0.0, %v2374_v49  ;;  %v2353_v23 = vmul.f32 %v4035_v22, %v2330_v34  ;;  %v2352_v24 = vmul.f32 %v4035_v22, %v2329_v46  ;;  %v2316_v25 = vadd.f32 %v2280_v21, %v2252_v6 }
 0x6b7   : > { %3313 = vpow2.f32 %v2409_v63  ;;  %v2389_v56 = vsub.f32 0.0, %v2373_v58  ;;  %v2315_v13 = vadd.f32 %v2278_v55, %v2251_v30 }
 0x6b8   : > { %v3306_v27 = vpop.eup %3305  ;;  %3315 = vpow2.f32 %v2407_v54  ;;  %v2413_v9 = vmul.f32 1.442695, %v2390_v12  ;;  %v2376_v52 = vadd.f32 %v4039_v20, %v2353_v23  ;;  %v2375_v35 = vadd.f32 %v4039_v20, %v2352_v24 }
 0x6b9   : > { %v3308_v11 = vpop.eup %3307  ;;  %v2432_v32 = vadd.f32 1.0, %v3306_v27  ;;  %v2411_v33 = vmul.f32 1.442695, %v2389_v56  ;;  %v2332_v31 = vmul.f32 0.33333334, %v2316_v25  ;;  %v2284_v1 = vpop.permute.xlu1 %2283 }
 0x6ba   : > { %v2282_v36 = vpop.permute.xlu0 %2281  ;;  %v2431_v45 = vadd.f32 1.0, %v3308_v11  ;;  %3317 = vpow2.f32 %v2413_v9  ;;  %v2392_v50 = vsub.f32 0.0, %v2376_v52  ;;  %v2391_v28 = vsub.f32 0.0, %v2375_v35 }
 0x6bb   : > { %3319 = vrcp.f32 %v2432_v32  ;;  %v2355_v26 = vmul.f32 %v4035_v22, %v2332_v31  ;;  %v2331_v37 = vmul.f32 0.33333334, %v2315_v13  ;;  %v2318_v18 = vadd.f32 %v2284_v1, %v2254_v61 }
 0x6bc   : > { %v3310_v38 = vpop.eup %3309  ;;  %3321 = vrcp.f32 %v2431_v45  ;;  %v2417_v39 = vmul.f32 1.442695, %v2392_v50  ;;  %v2415_v40 = vmul.f32 1.442695, %v2391_v28  ;;  %v2317_v43 = vadd.f32 %v2282_v36, %v2253_v10 }
 0x6bd   : > { %v3312_v53 = vpop.eup %3311  ;;  %v2434_v41 = vadd.f32 1.0, %v3310_v38  ;;  %3323 = vpow2.f32 %v2411_v33  ;;  %v2378_v44 = vadd.f32 %v4039_v20, %v2355_v26  ;;  %v2354_v57 = vmul.f32 %v4035_v22, %v2331_v37  ;;  %v2288_v42 = vpop.permute.xlu1 %2287 }
 0x6be   : > { %v2286_v2 = vpop.permute.xlu0 %2285  ;;  %v2433_v4 = vadd.f32 1.0, %v3312_v53  ;;  %3325 = vpow2.f32 %v2417_v39  ;;  %v2334_v5 = vmul.f32 0.33333334, %v2318_v18  ;;  %v2333_v6 = vmul.f32 0.33333334, %v2317_v43 }
 0x6bf   : > { %3327 = vrcp.f32 %v2434_v41  ;;  %v2394_v7 = vsub.f32 0.0, %v2378_v44  ;;  %v2377_v47 = vadd.f32 %v4039_v20, %v2354_v57  ;;  %v2320_v48 = vadd.f32 %v2288_v42, %v2256_v29 }
 0x6c0   : > { %3329 = vrcp.f32 %v2433_v4  ;;  %v2357_v30 = vmul.f32 %v4035_v22, %v2334_v5  ;;  %v2356_v51 = vmul.f32 %v4035_v22, %v2333_v6  ;;  %v2319_v59 = vadd.f32 %v2286_v2, %v2255_v0 }
 0x6c1   : > { %v3314_v60 = vpop.eup %3313  ;;  %3331 = vpow2.f32 %v2415_v40  ;;  %v2421_v8 = vmul.f32 1.442695, %v2394_v7  ;;  %v2393_v16 = vsub.f32 0.0, %v2377_v47  ;;  %v2336_v17 = vmul.f32 0.33333334, %v2320_v48 }
 0x6c2   : > { %v3316_v19 = vpop.eup %3315  ;;  %v2436_v14 = vadd.f32 1.0, %v3314_v60  ;;  %v2380_v62 = vadd.f32 %v4039_v20, %v2357_v30  ;;  %v2379_v15 = vadd.f32 %v4039_v20, %v2356_v51  ;;  %v2335_v3 = vmul.f32 0.33333334, %v2319_v59 }
 0x6c3   : > { %v2435_v61 = vadd.f32 1.0, %v3316_v19  ;;  %3333 = vpow2.f32 %v2421_v8  ;;  %v2419_v49 = vmul.f32 1.442695, %v2393_v16  ;;  %v2359_v34 = vmul.f32 %v4035_v22, %v2336_v17 }
 0x6c4   : > { %v3318_v46 = vpop.eup %3317  ;;  %3335 = vrcp.f32 %v2436_v14  ;;  %v2396_v10 = vsub.f32 0.0, %v2380_v62  ;;  %v2395_v63 = vsub.f32 0.0, %v2379_v15  ;;  %v2358_v54 = vmul.f32 %v4035_v22, %v2335_v3 }
 0x6c5   : > { %v3320_v58 = vpop.eup %3319  ;;  %3337 = vrcp.f32 %v2435_v61  ;;  %v2438_v21 = vadd.f32 1.0, %v3318_v46  ;;  %v2382_v55 = vadd.f32 %v4039_v20, %v2359_v34 }
 0x6c6   : > { %v3322_v12 = vpop.eup %3321  ;;  %2481 = vst.msk [vmem:[%s3507_s22 + $0x8] sm:$0xff] %vm2479_vm2, %v3320_v58  ;;  %3339 = vpow2.f32 %v2419_v49  ;;  %v2425_v23 = vmul.f32 1.442695, %v2396_v10  ;;  %v2423_v24 = vmul.f32 1.442695, %v2395_v63  ;;  %v2381_v25 = vadd.f32 %v4039_v20, %v2358_v54 }
 0x6c7   : > { %v3324_v29 = vpop.eup %3323  ;;  %2480 = vst.msk [vmem:[%s3507_s22] sm:$0xff] %vm2479_vm2, %v3322_v12  ;;  %3341 = vrcp.f32 %v2438_v21  ;;  %v2398_v22 = vsub.f32 0.0, %v2382_v55 }
 0x6c8   : > { %v3326_v56 = vpop.eup %3325  ;;  %v2437_v13 = vadd.f32 1.0, %v3324_v29  ;;  %3343 = vpow2.f32 %v2425_v23  ;;  %v2397_v27 = vsub.f32 0.0, %v2381_v25 }
 0x6c9   : > { %v3328_v9 = vpop.eup %3327  ;;  %v2440_v52 = vadd.f32 1.0, %v3326_v56  ;;  %3345 = vpow2.f32 %v2423_v24  ;;  %v2429_v35 = vmul.f32 1.442695, %v2398_v22 }
 0x6ca   : > { %v3330_v11 = vpop.eup %3329  ;;  %2483 = vst.msk [vmem:[%s3507_s22 + $0x18] sm:$0xff] %vm2479_vm2, %v3328_v9  ;;  %3347 = vrcp.f32 %v2437_v13  ;;  %v2427_v20 = vmul.f32 1.442695, %v2397_v27 }
 0x6cb   : > { %v3332_v0 = vpop.eup %3331  ;;  %2482 = vst.msk [vmem:[%s3507_s22 + $0x10] sm:$0xff] %vm2479_vm2, %v3330_v11  ;;  %3349 = vrcp.f32 %v2440_v52 }
 0x6cc   : > { %v2439_v32 = vadd.f32 1.0, %v3332_v0  ;;  %3351 = vpow2.f32 %v2429_v35 }
 0x6cd   : > { %v3334_v33 = vpop.eup %3333  ;;  %3353 = vpow2.f32 %v2427_v20 }
 0x6ce   : > { %v3336_v31 = vpop.eup %3335  ;;  %3355 = vrcp.f32 %v2439_v32  ;;  %v2442_v1 = vadd.f32 1.0, %v3334_v33 }
 0x6cf   : > { %v3338_v36 = vpop.eup %3337  ;;  %2485 = vst.msk [vmem:[%s3507_s22 + $0x28] sm:$0xff] %vm2479_vm2, %v3336_v31 }
 0x6d0   : > { %v3340_v45 = vpop.eup %3339  ;;  %2484 = vst.msk [vmem:[%s3507_s22 + $0x20] sm:$0xff] %vm2479_vm2, %v3338_v36  ;;  %3357 = vrcp.f32 %v2442_v1 }
 0x6d1   : > { %v3342_v50 = vpop.eup %3341  ;;  %v2441_v28 = vadd.f32 1.0, %v3340_v45 }
 0x6d2   : > { %v3344_v26 = vpop.eup %3343  ;;  %2487 = vst.msk [vmem:[%s3507_s22 + $0x38] sm:$0xff] %vm2479_vm2, %v3342_v50 }
 0x6d3   : > { %v3346_v37 = vpop.eup %3345  ;;  %3359 = vrcp.f32 %v2441_v28  ;;  %v2444_v18 = vadd.f32 1.0, %v3344_v26 }
 0x6d4   : > { %v3348_v38 = vpop.eup %3347  ;;  %v2443_v39 = vadd.f32 1.0, %v3346_v37 }
 0x6d5   : > { %v3350_v40 = vpop.eup %3349  ;;  %2486 = vst.msk [vmem:[%s3507_s22 + $0x30] sm:$0xff] %vm2479_vm2, %v3348_v38  ;;  %3361 = vrcp.f32 %v2444_v18 }
 0x6d6   : > { %v3352_v43 = vpop.eup %3351  ;;  %2489 = vst.msk [vmem:[%s3507_s22 + $0x48] sm:$0xff] %vm2479_vm2, %v3350_v40  ;;  %3363 = vrcp.f32 %v2443_v39 }
 0x6d7   : > { %v3354_v53 = vpop.eup %3353  ;;  %v2446_v41 = vadd.f32 1.0, %v3352_v43 }
 0x6d8   : > { %v3356_v44 = vpop.eup %3355  ;;  %v2445_v57 = vadd.f32 1.0, %v3354_v53 }
 0x6d9   : > { %2488 = vst.msk [vmem:[%s3507_s22 + $0x40] sm:$0xff] %vm2479_vm2, %v3356_v44  ;;  %3365 = vrcp.f32 %v2446_v41 }
 0x6da   : > { %v3358_v42 = vpop.eup %3357  ;;  %3367 = vrcp.f32 %v2445_v57 }
 0x6db   : > { %2491 = vst.msk [vmem:[%s3507_s22 + $0x58] sm:$0xff] %vm2479_vm2, %v3358_v42 }
 0x6dd   : > { %v3360_v2 = vpop.eup %3359 }
 0x6de   : > { %2490 = vst.msk [vmem:[%s3507_s22 + $0x50] sm:$0xff] %vm2479_vm2, %v3360_v2 }
 0x6df   : > { %v3362_v4 = vpop.eup %3361 }
 0x6e0   : > { %v3364_v5 = vpop.eup %3363  ;;  %2493 = vst.msk [vmem:[%s3507_s22 + $0x68] sm:$0xff] %vm2479_vm2, %v3362_v4 }
 0x6e1   : > { %2492 = vst.msk [vmem:[%s3507_s22 + $0x60] sm:$0xff] %vm2479_vm2, %v3364_v5 }
 0x6e3   : > { %v3366_v6 = vpop.eup %3365 }
 0x6e4   : > { %v3368_v7 = vpop.eup %3367  ;;  %2495 = vst.msk [vmem:[%s3507_s22 + $0x78] sm:$0xff] %vm2479_vm2, %v3366_v6 }
 0x6e5   : > { %2494 = vst.msk [vmem:[%s3507_s22 + $0x70] sm:$0xff] %vm2479_vm2, %v3368_v7 }
 0x6e6 PF: > { %s22_s13 = sadd.s32 1, %s3407_s13   ;;  %s4145_s9 = smov %s3399_s11 }
 0x6e7   : > { %p19_p2 = scmp.ge.s32.totalorder %s22_s13, 10   ;;  %s4146_s10 = smov %s3403_s12 }
 0x6e8   : > { %s4147_s11 = smov %s4150_s6  ;;  %s4148_s12 = smov %s4154_s7 }
 0x6e9   :  { %21 = sbr.rel (!%p19_p2) target bundleno = 3 (0x3), region = 117 }

// kernel: arma_net_bench_forward.2
= control target key start
LH: loop header
LB: loop body
LE: loop exit
PB: predicated region body
PF: predicated region fallthrough
CT: control target
= control target key end

     0   :  { %s3179_s27 = smov 0   ;;  %s3181_s28 = smov 0   ;;  %s3883_s0 = inlined_call_operand.vmem [shape: bf16[256,256], index: 0, kind: input, shape index: {}]   ;;  %s3884_s1 = inlined_call_operand.vmem [shape: bf16[256,8], index: 1, kind: input, shape index: {}]   ;;  %s3885_s2 = inlined_call_operand.vmem [shape: bf16[8,128], index: 2, kind: input, shape index: {}]   ;;  %s3886_s3 = inlined_call_operand.vmem [shape: bf16[128,128], index: 3, kind: input, shape index: {}]   ;;  %s3887_s4 = inlined_call_operand.vmem [shape: bf16[8,128], index: 4, kind: input, shape index: {}]   ;;  %s3888_s5 = inlined_call_operand.vmem [shape: f32[1,128], index: 5, kind: input, shape index: {}]   ;;  %s3889_s6 = inlined_call_operand.vmem [shape: f32[1,16], index: 6, kind: input, shape index: {}]   ;;  %s3890_s7 = inlined_call_operand.vmem [shape: f32[1,16], index: 7, kind: input, shape index: {}]   ;;  %s3891_s8 = inlined_call_operand.vmem [shape: f32[256,16], index: 8, kind: output, shape index: {}]  }
   0x1   :  { %s3183_s29 = smov 0   ;;  %s3185_s30 = smov 0  }
   0x2   :  { %s3187_s9 = smov 0  }
   0x3 LB: > { %s27_s10 = sadd.s32 1, %s3120_s29  ;;  %s30_s11 = sadd.s32 1, %s3124_s30  ;;  %s3128_s9 = sphi %s3187_s9, %s18_s9   ;;  %s3124_s30 = sphi %s3185_s30, %s3895_s30   ;;  %s3120_s29 = sphi %s3183_s29, %s3894_s29   ;;  %s3116_s28 = sphi %s3181_s28, %s3893_s28   ;;  %s3112_s27 = sphi %s3179_s27, %s3892_s27  }
   0x4   : > { %p28_p0 = scmp.ge.s32.totalorder %s27_s10, 2  ;;  %p2429_p1 = scmp.ge.s32.totalorder %s3128_s9, 1 }
   0x5   : > { %p276_p2 = scmp.lt.s32.totalorder %s3128_s9, 9 }
   0x6   : > { %s3897_s10 = smov (%p28_p0, %s27_s10), 0  ;;  %s3899_s11 = smov (!%p28_p0, %s30_s11), %s3124_s30 }
   0x7   : > { %p277_p3 = pnand %p2429_p1, %p276_p2  ;;  %p32_p4 = scmp.ge.s32.totalorder %s3899_s11, 4 }
   0x8   : > { %s2430_s12 = sshll.u32 (!%p277_p3), %s3112_s27, 4  ;;  %s3211_s13 = sshll.u32 (!%p277_p3), %s3112_s27, 7 }
   0x9   : > { %s3901_s11 = smov (%p32_p4, %s3899_s11), 0  ;;  %280 = sbr.rel (%p277_p3) target bundleno = 1716 (0x6b4), region = 52 }
   0xa   : > { %p312_p5 = scmp.lt.s32.totalorder (!%p277_p3), %s2430_s12, 31  ;;  %p326_p6 = scmp.eq.s32.totalorder (!%p277_p3), %s3116_s28, 0 }
   0xb   : > { %p327_p7 = scmp.eq.s32.totalorder (!%p277_p3), %s3112_s27, 0 }
   0xd   : > { %p328_p8 = pnand (!%p277_p3), %p327_p7, %p326_p6 }
  0x10   : > { %s3903_s12 = smov (!%p312_p5, %s2430_s12), 31  ;;  %331 = sbr.rel (%p328_p8) target bundleno = 297 (0x129), region = 56 }
  0x11   : > { %s2565_s14 = sshll.u32 %s3903_s12, 3  ;;  %v348_v0 = vld [vmem:[%s3887_s4] sm:$0xf] (!%p328_p8)  ;;  %vm421_vm0 = vcmask (!%p328_p8), 1043456   ;;  %vm396_vm1 = vcmask (!%p328_p8), 64512   ;;  %v3011_v5 = vld [vmem:[%s3884_s1 + $0x8] sm:$0xff] (!%p328_p8)  }
  0x12   : > { %s3217_s17 = scalar_lea.vmem %s3883_s0, %s2565_s14  ;;  %s3222_s20 = scalar_lea.vmem %s3891_s8, %s2565_s14  ;;  %v538_v1 = vld [vmem:[%s3885_s2] sm:$0xf] (!%p328_p8)  ;;  %2962 = vmatprep.subr.msk.bf16.mxu0 (!%p328_p8), %vm421_vm0, %v348_v0  ;;  %v423_v3 = vsel (!%p328_p8), %vm421_vm0, %v348_v0, 0  ;;  %v3012_v10 = vld [vmem:[%s3884_s1 + $0x10] sm:$0xff] (!%p328_p8)   ;;  %v3013_v11 = vld [vmem:[%s3884_s1 + $0x18] sm:$0xff] (!%p328_p8)  }
  0x13   : > { %v3010_v2 = vld [vmem:[%s3884_s1] sm:$0xff] (!%p328_p8)   ;;  %2963 = vmatprep.subr.msk.bf16.mxu1 (!%p328_p8), %vm421_vm0, %v538_v1  ;;  %v540_v4 = vsel (!%p328_p8), %vm421_vm0, %v538_v1, 0  ;;  %2763 = vmatpush3.bf16.msra.mxu0 (!%p328_p8), %v423_v3  ;;  %v3015_v13 = vld [vmem:[%s3884_s1 + $0x28] sm:$0xff] (!%p328_p8)   ;;  %v3016_v14 = vld [vmem:[%s3884_s1 + $0x30] sm:$0xff] (!%p328_p8)  }
  0x14   : > { %2781 = vmatpush3.bf16.msra.mxu1 (!%p328_p8), %v540_v4  ;;  %2764 = vmatprep.mubr.msk.bf16.mxu0 (!%p328_p8), %vm396_vm1, %v3010_v2  ;;  %v672_v6 = vld [vmem:[%s3887_s4] sm:$0xf] (!%p328_p8)  ;;  %v3017_v15 = vld [vmem:[%s3884_s1 + $0x38] sm:$0xff] (!%p328_p8)   ;;  %v3019_v17 = vld [vmem:[%s3884_s1 + $0x48] sm:$0xff] (!%p328_p8)  }
  0x15   : > { %2782 = vmatprep.mubr.msk.bf16.mxu1 (!%p328_p8), %vm396_vm1, %v3010_v2  ;;  %v861_v7 = vld [vmem:[%s3885_s2] sm:$0xf] (!%p328_p8)  ;;  %2964 = vmatprep.subr.msk.bf16.mxu0 (!%p328_p8), %vm421_vm0, %v672_v6  ;;  %v745_v8 = vsel (!%p328_p8), %vm421_vm0, %v672_v6, 0  ;;  %v3020_v18 = vld [vmem:[%s3884_s1 + $0x50] sm:$0xff] (!%p328_p8)   ;;  %v3021_v19 = vld [vmem:[%s3884_s1 + $0x58] sm:$0xff] (!%p328_p8)  }
  0x16   : > { %2965 = vmatprep.subr.msk.bf16.mxu1 (!%p328_p8), %vm421_vm0, %v861_v7  ;;  %v863_v9 = vsel (!%p328_p8), %vm421_vm0, %v861_v7, 0  ;;  %2765 = vmatmul.mubr.msk.bf16.vlgmr.msra.gmra.mrb[0].mxu0 (!%p328_p8), %vm396_vm1, %v3011_v5  ;;  %v3014_v12 = vld [vmem:[%s3884_s1 + $0x20] sm:$0xff] (!%p328_p8)   ;;  %v3023_v21 = vld [vmem:[%s3884_s1 + $0x68] sm:$0xff] (!%p328_p8)   ;;  %v3024_v22 = vld [vmem:[%s3884_s1 + $0x70] sm:$0xff] (!%p328_p8)  }
  0x17   : > { %2783 = vmatmul.mubr.msk.bf16.vlgmr.msra.gmra.mrb[0].mxu1 %vm396_vm1, %v3011_v5  ;;  %2799 = vmatpush3.bf16.msra.mxu0 %v745_v8  ;;  %v3018_v16 = vld [vmem:[%s3884_s1 + $0x40] sm:$0xff]   ;;  %v3025_v23 = vld [vmem:[%s3884_s1 + $0x78] sm:$0xff]  }
  0x18   : > { %2817 = vmatpush3.bf16.msra.mxu1 %v863_v9  ;;  %2768 = vmatprep.mubr.msk.bf16.mxu0 %vm396_vm1, %v3012_v10  ;;  %v3022_v20 = vld [vmem:[%s3884_s1 + $0x60] sm:$0xff]  }
  0x19   : > { %2786 = vmatprep.mubr.msk.bf16.mxu1 %vm396_vm1, %v3012_v10  ;;  %v3327_v24 = vld [vmem:[%s3888_s5] ss:$0 sm:$0xff] }
  0x1e   : > { %2769 = vmatmul.mubr.msk.bf16.gmra.mrb[4].mxu0 %vm396_vm1, %v3013_v11 }
  0x1f   : > { %2787 = vmatmul.mubr.msk.bf16.gmra.mrb[4].mxu1 %vm396_vm1, %v3013_v11  ;;  %2772 = vmatprep.mubr.msk.bf16.mxu0 %vm396_vm1, %v3014_v12 }
  0x20   : > { %2790 = vmatprep.mubr.msk.bf16.mxu1 %vm396_vm1, %v3014_v12 }
  0x26   : > { %2773 = vmatmul.mubr.msk.bf16.gmra.mrb[8].mxu0 %vm396_vm1, %v3015_v13 }
  0x27   : > { %2791 = vmatmul.mubr.msk.bf16.gmra.mrb[8].mxu1 %vm396_vm1, %v3015_v13  ;;  %2776 = vmatprep.mubr.msk.bf16.mxu0 %vm396_vm1, %v3016_v14 }
  0x28   : > { %2794 = vmatprep.mubr.msk.bf16.mxu1 %vm396_vm1, %v3016_v14 }
  0x2e   : > { %2777 = vmatmul.mubr.msk.bf16.gmra.mrb[12].mxu0 %vm396_vm1, %v3017_v15 }
  0x2f   : > { %2795 = vmatmul.mubr.msk.bf16.gmra.mrb[12].mxu1 %vm396_vm1, %v3017_v15  ;;  %2800 = vmatprep.mubr.msk.bf16.mxu0 %vm396_vm1, %v3018_v16 }
  0x30   : > { %2818 = vmatprep.mubr.msk.bf16.mxu1 %vm396_vm1, %v3018_v16 }
  0x36   : > { %2801 = vmatmul.mubr.msk.bf16.vlgmr.msra.gmra.mrb[16].mxu0 %vm396_vm1, %v3019_v17 }
  0x37   : > { %2819 = vmatmul.mubr.msk.bf16.vlgmr.msra.gmra.mrb[16].mxu1 %vm396_vm1, %v3019_v17  ;;  %2804 = vmatprep.mubr.msk.bf16.mxu0 %vm396_vm1, %v3020_v18 }
  0x38   : > { %2822 = vmatprep.mubr.msk.bf16.mxu1 %vm396_vm1, %v3020_v18 }
  0x3e   : > { %2805 = vmatmul.mubr.msk.bf16.gmra.mrb[20].mxu0 %vm396_vm1, %v3021_v19 }
  0x3f   : > { %2823 = vmatmul.mubr.msk.bf16.gmra.mrb[20].mxu1 %vm396_vm1, %v3021_v19  ;;  %2808 = vmatprep.mubr.msk.bf16.mxu0 %vm396_vm1, %v3022_v20 }
  0x40   : > { %2826 = vmatprep.mubr.msk.bf16.mxu1 %vm396_vm1, %v3022_v20 }
  0x46   : > { %2809 = vmatmul.mubr.msk.bf16.gmra.mrb[24].mxu0 %vm396_vm1, %v3023_v21 }
  0x47   : > { %2827 = vmatmul.mubr.msk.bf16.gmra.mrb[24].mxu1 %vm396_vm1, %v3023_v21  ;;  %2812 = vmatprep.mubr.msk.bf16.mxu0 %vm396_vm1, %v3024_v22 }
  0x48   : > { %2830 = vmatprep.mubr.msk.bf16.mxu1 %vm396_vm1, %v3024_v22 }
  0x4e   : > { %2813 = vmatmul.mubr.msk.bf16.gmra.mrb[28].mxu0 %vm396_vm1, %v3025_v23 }
  0x4f   : > { %2831 = vmatmul.mubr.msk.bf16.gmra.mrb[28].mxu1 %vm396_vm1, %v3025_v23 }
  0xe9   : > { %v2766_v25 = vpop.f32.mrb[0].mxu0 }
  0xea   : > { %v2784_v26 = vpop.f32.mrb[0].mxu1  ;;  %v468_v27 = vadd.f32 %v2766_v25, %v3327_v24  ;;  %v459_v28 = vpop.f32.mrb[1].mxu0 }
  0xeb   : > { %v576_v29 = vpop.f32.mrb[1].mxu1  ;;  %v460_v30 = vadd.f32 %v3327_v24, %v459_v28  ;;  %v2767_v31 = vpop.f32.mrb[2].mxu0 }
  0xec   : > { %v2785_v32 = vpop.f32.mrb[2].mxu1  ;;  %524 = vst [vmem:[#allocation4 + $0x10] sm:$0xff] %v468_v27  ;;  %v471_v33 = vadd.f32 %v2767_v31, %v3327_v24  ;;  %v462_v35 = vpop.f32.mrb[3].mxu0 }
  0xed   : > { %v640_v34 = vpack.c.bf16 %v2785_v32, %v2784_v26  ;;  %v579_v36 = vpop.f32.mrb[3].mxu1  ;;  %522 = vst [vmem:[#allocation4] sm:$0xff] %v460_v30  ;;  %v463_v37 = vadd.f32 %v3327_v24, %v462_v35 }
  0xee   : > { %v639_v38 = vpack.c.bf16 %v579_v36, %v576_v29  ;;  %525 = vst [vmem:[#allocation4 + $0x18] sm:$0xff] %v471_v33 }
  0xef   : > { %648 = vst [vmem:[#allocation2 + $0x8] sm:$0xff] %v640_v34  ;;  %523 = vst [vmem:[#allocation4 + $0x8] sm:$0xff] %v463_v37 }
  0xf0   : > { %647 = vst [vmem:[#allocation2] sm:$0xff] %v639_v38 }
  0xf1   : > { %v2770_v39 = vpop.f32.mrb[4].mxu0 }
  0xf2   : > { %v2788_v40 = vpop.f32.mrb[4].mxu1  ;;  %v484_v41 = vadd.f32 %v2770_v39, %v3327_v24  ;;  %v475_v42 = vpop.f32.mrb[5].mxu0 }
  0xf3   : > { %v592_v43 = vpop.f32.mrb[5].mxu1  ;;  %v476_v44 = vadd.f32 %v3327_v24, %v475_v42  ;;  %v2771_v45 = vpop.f32.mrb[6].mxu0 }
  0xf4   : > { %v2789_v46 = vpop.f32.mrb[6].mxu1  ;;  %528 = vst [vmem:[#allocation4 + $0x30] sm:$0xff] %v484_v41  ;;  %v487_v47 = vadd.f32 %v2771_v45, %v3327_v24  ;;  %v478_v49 = vpop.f32.mrb[7].mxu0 }
  0xf5   : > { %v642_v48 = vpack.c.bf16 %v2789_v46, %v2788_v40  ;;  %v595_v50 = vpop.f32.mrb[7].mxu1  ;;  %526 = vst [vmem:[#allocation4 + $0x20] sm:$0xff] %v476_v44  ;;  %v479_v51 = vadd.f32 %v3327_v24, %v478_v49 }
  0xf6   : > { %v641_v52 = vpack.c.bf16 %v595_v50, %v592_v43  ;;  %529 = vst [vmem:[#allocation4 + $0x38] sm:$0xff] %v487_v47 }
  0xf7   : > { %650 = vst [vmem:[#allocation2 + $0x18] sm:$0xff] %v642_v48  ;;  %527 = vst [vmem:[#allocation4 + $0x28] sm:$0xff] %v479_v51 }
  0xf8   : > { %649 = vst [vmem:[#allocation2 + $0x10] sm:$0xff] %v641_v52 }
  0xf9   : > { %v2774_v53 = vpop.f32.mrb[8].mxu0 }
  0xfa   : > { %v2792_v54 = vpop.f32.mrb[8].mxu1  ;;  %v500_v55 = vadd.f32 %v2774_v53, %v3327_v24  ;;  %v491_v56 = vpop.f32.mrb[9].mxu0 }
  0xfb   : > { %v608_v57 = vpop.f32.mrb[9].mxu1  ;;  %v492_v58 = vadd.f32 %v3327_v24, %v491_v56  ;;  %v2775_v59 = vpop.f32.mrb[10].mxu0 }
  0xfc   : > { %v2793_v60 = vpop.f32.mrb[10].mxu1  ;;  %532 = vst [vmem:[#allocation4 + $0x50] sm:$0xff] %v500_v55  ;;  %v503_v61 = vadd.f32 %v2775_v59, %v3327_v24  ;;  %v494_v63 = vpop.f32.mrb[11].mxu0 }
  0xfd   : > { %v644_v62 = vpack.c.bf16 %v2793_v60, %v2792_v54  ;;  %v611_v0 = vpop.f32.mrb[11].mxu1  ;;  %530 = vst [vmem:[#allocation4 + $0x40] sm:$0xff] %v492_v58  ;;  %v495_v1 = vadd.f32 %v3327_v24, %v494_v63 }
  0xfe   : > { %v643_v2 = vpack.c.bf16 %v611_v0, %v608_v57  ;;  %533 = vst [vmem:[#allocation4 + $0x58] sm:$0xff] %v503_v61 }
  0xff   : > { %652 = vst [vmem:[#allocation2 + $0x28] sm:$0xff] %v644_v62  ;;  %531 = vst [vmem:[#allocation4 + $0x48] sm:$0xff] %v495_v1 }
 0x100   : > { %651 = vst [vmem:[#allocation2 + $0x20] sm:$0xff] %v643_v2 }
 0x101   : > { %v2778_v3 = vpop.f32.mrb[12].mxu0 }
 0x102   : > { %v2796_v4 = vpop.f32.mrb[12].mxu1  ;;  %v516_v5 = vadd.f32 %v2778_v3, %v3327_v24  ;;  %v507_v6 = vpop.f32.mrb[13].mxu0 }
 0x103   : > { %v624_v7 = vpop.f32.mrb[13].mxu1  ;;  %v508_v8 = vadd.f32 %v3327_v24, %v507_v6  ;;  %v2779_v9 = vpop.f32.mrb[14].mxu0 }
 0x104   : > { %v2797_v10 = vpop.f32.mrb[14].mxu1  ;;  %536 = vst [vmem:[#allocation4 + $0x70] sm:$0xff] %v516_v5  ;;  %v519_v11 = vadd.f32 %v2779_v9, %v3327_v24  ;;  %v510_v13 = vpop.f32.mrb[15].mxu0 }
 0x105   : > { %v646_v12 = vpack.c.bf16 %v2797_v10, %v2796_v4  ;;  %v627_v14 = vpop.f32.mrb[15].mxu1  ;;  %534 = vst [vmem:[#allocation4 + $0x60] sm:$0xff] %v508_v8  ;;  %v511_v15 = vadd.f32 %v3327_v24, %v510_v13 }
 0x106   : > { %v645_v16 = vpack.c.bf16 %v627_v14, %v624_v7  ;;  %537 = vst [vmem:[#allocation4 + $0x78] sm:$0xff] %v519_v11 }
 0x107   : > { %654 = vst [vmem:[#allocation2 + $0x38] sm:$0xff] %v646_v12  ;;  %535 = vst [vmem:[#allocation4 + $0x68] sm:$0xff] %v511_v15 }
 0x108   : > { %653 = vst [vmem:[#allocation2 + $0x30] sm:$0xff] %v645_v16 }
 0x109   : > { %v2802_v17 = vpop.f32.mrb[16].mxu0 }
 0x10a   : > { %v2820_v18 = vpop.f32.mrb[16].mxu1  ;;  %v790_v19 = vadd.f32 %v2802_v17, %v3327_v24  ;;  %v781_v20 = vpop.f32.mrb[17].mxu0 }
 0x10b   : > { %v899_v21 = vpop.f32.mrb[17].mxu1  ;;  %v782_v22 = vadd.f32 %v3327_v24, %v781_v20  ;;  %v2803_v23 = vpop.f32.mrb[18].mxu0 }
 0x10c   : > { %v2821_v25 = vpop.f32.mrb[18].mxu1  ;;  %847 = vst [vmem:[#allocation4 + $0x90] sm:$0xff] %v790_v19  ;;  %v793_v26 = vadd.f32 %v2803_v23, %v3327_v24  ;;  %v784_v28 = vpop.f32.mrb[19].mxu0 }
 0x10d   : > { %v963_v27 = vpack.c.bf16 %v2821_v25, %v2820_v18  ;;  %v902_v29 = vpop.f32.mrb[19].mxu1  ;;  %845 = vst [vmem:[#allocation4 + $0x80] sm:$0xff] %v782_v22  ;;  %v785_v30 = vadd.f32 %v3327_v24, %v784_v28 }
 0x10e   : > { %v962_v31 = vpack.c.bf16 %v902_v29, %v899_v21  ;;  %848 = vst [vmem:[#allocation4 + $0x98] sm:$0xff] %v793_v26 }
 0x10f   : > { %972 = vst [vmem:[#allocation2 + $0x48] sm:$0xff] %v963_v27  ;;  %846 = vst [vmem:[#allocation4 + $0x88] sm:$0xff] %v785_v30 }
 0x110   : > { %971 = vst [vmem:[#allocation2 + $0x40] sm:$0xff] %v962_v31 }
 0x111   : > { %v2806_v32 = vpop.f32.mrb[20].mxu0 }
 0x112   : > { %v2824_v33 = vpop.f32.mrb[20].mxu1  ;;  %v806_v34 = vadd.f32 %v2806_v32, %v3327_v24  ;;  %v797_v35 = vpop.f32.mrb[21].mxu0 }
 0x113   : > { %v915_v36 = vpop.f32.mrb[21].mxu1  ;;  %v798_v37 = vadd.f32 %v3327_v24, %v797_v35  ;;  %v2807_v38 = vpop.f32.mrb[22].mxu0 }
 0x114   : > { %v2825_v39 = vpop.f32.mrb[22].mxu1  ;;  %851 = vst [vmem:[#allocation4 + $0xb0] sm:$0xff] %v806_v34  ;;  %v809_v40 = vadd.f32 %v2807_v38, %v3327_v24  ;;  %v800_v42 = vpop.f32.mrb[23].mxu0 }
 0x115   : > { %v965_v41 = vpack.c.bf16 %v2825_v39, %v2824_v33  ;;  %v918_v43 = vpop.f32.mrb[23].mxu1  ;;  %849 = vst [vmem:[#allocation4 + $0xa0] sm:$0xff] %v798_v37  ;;  %v801_v44 = vadd.f32 %v3327_v24, %v800_v42 }
 0x116   : > { %v964_v45 = vpack.c.bf16 %v918_v43, %v915_v36  ;;  %852 = vst [vmem:[#allocation4 + $0xb8] sm:$0xff] %v809_v40 }
 0x117   : > { %974 = vst [vmem:[#allocation2 + $0x58] sm:$0xff] %v965_v41  ;;  %850 = vst [vmem:[#allocation4 + $0xa8] sm:$0xff] %v801_v44 }
 0x118   : > { %973 = vst [vmem:[#allocation2 + $0x50] sm:$0xff] %v964_v45 }
 0x119   : > { %v2810_v46 = vpop.f32.mrb[24].mxu0 }
 0x11a   : > { %v2828_v47 = vpop.f32.mrb[24].mxu1  ;;  %v822_v48 = vadd.f32 %v2810_v46, %v3327_v24  ;;  %v813_v49 = vpop.f32.mrb[25].mxu0 }
 0x11b   : > { %v931_v50 = vpop.f32.mrb[25].mxu1  ;;  %v814_v51 = vadd.f32 %v3327_v24, %v813_v49  ;;  %v2811_v52 = vpop.f32.mrb[26].mxu0 }
 0x11c   : > { %v2829_v53 = vpop.f32.mrb[26].mxu1  ;;  %855 = vst [vmem:[#allocation4 + $0xd0] sm:$0xff] %v822_v48  ;;  %v825_v54 = vadd.f32 %v2811_v52, %v3327_v24  ;;  %v816_v56 = vpop.f32.mrb[27].mxu0 }
 0x11d   : > { %v967_v55 = vpack.c.bf16 %v2829_v53, %v2828_v47  ;;  %v934_v57 = vpop.f32.mrb[27].mxu1  ;;  %853 = vst [vmem:[#allocation4 + $0xc0] sm:$0xff] %v814_v51  ;;  %v817_v58 = vadd.f32 %v3327_v24, %v816_v56 }
 0x11e   : > { %v966_v59 = vpack.c.bf16 %v934_v57, %v931_v50  ;;  %856 = vst [vmem:[#allocation4 + $0xd8] sm:$0xff] %v825_v54 }
 0x11f   : > { %976 = vst [vmem:[#allocation2 + $0x68] sm:$0xff] %v967_v55  ;;  %854 = vst [vmem:[#allocation4 + $0xc8] sm:$0xff] %v817_v58 }
 0x120   : > { %975 = vst [vmem:[#allocation2 + $0x60] sm:$0xff] %v966_v59 }
 0x121   : > { %v2814_v60 = vpop.f32.mrb[28].mxu0 }
 0x122   : > { %v2832_v61 = vpop.f32.mrb[28].mxu1  ;;  %v838_v62 = vadd.f32 %v2814_v60, %v3327_v24  ;;  %v829_v63 = vpop.f32.mrb[29].mxu0 }
 0x123   : > { %v947_v0 = vpop.f32.mrb[29].mxu1  ;;  %v830_v1 = vadd.f32 %v3327_v24, %v829_v63  ;;  %v2815_v2 = vpop.f32.mrb[30].mxu0 }
 0x124   : > { %v2833_v3 = vpop.f32.mrb[30].mxu1  ;;  %859 = vst [vmem:[#allocation4 + $0xf0] sm:$0xff] %v838_v62  ;;  %v841_v4 = vadd.f32 %v2815_v2, %v3327_v24  ;;  %v832_v6 = vpop.f32.mrb[31].mxu0 }
 0x125   : > { %v969_v5 = vpack.c.bf16 %v2833_v3, %v2832_v61  ;;  %v950_v7 = vpop.f32.mrb[31].mxu1  ;;  %857 = vst [vmem:[#allocation4 + $0xe0] sm:$0xff] %v830_v1  ;;  %v833_v8 = vadd.f32 %v3327_v24, %v832_v6 }
 0x126   : > { %v968_v9 = vpack.c.bf16 %v950_v7, %v947_v0  ;;  %860 = vst [vmem:[#allocation4 + $0xf8] sm:$0xff] %v841_v4 }
 0x127   : > { %978 = vst [vmem:[#allocation2 + $0x78] sm:$0xff] %v969_v5  ;;  %858 = vst [vmem:[#allocation4 + $0xe8] sm:$0xff] %v833_v8 }
 0x128   : > { %977 = vst [vmem:[#allocation2 + $0x70] sm:$0xff] %v968_v9 }
 0x129 PF: > { %p979_p9 = scmp.lt.s32.totalorder %s3116_s28, 0  ;;  %s980_s24 = ssub.s32 0, %s3116_s28 }
 0x12a   : > { %s2502_s25 = smin.u32 %s3116_s28, %s980_s24 }
 0x12b   : > { %s982_s26 = sand.u32 1, %s2502_s25  }
 0x12c   : > { %s983_s27 = ssub.s32 0, %s982_s26 }
 0x12d   : > { %s3905_s27 = smov (!%p979_p9, %s983_s27), %s982_s26 }
 0x12e   : > { %p2503_p10 = scmp.ne.s32.totalorder %s3905_s27, 0 }
 0x12f   : > { %v1013_v24 = vld [vmem:[#allocation2 + $0x40] sm:$0xff] (!%p2503_p10)  ;;  %v1014_v11 = vld [vmem:[#allocation2 + $0x48] sm:$0xff] (!%p2503_p10)  ;;  %v1015_v13 = vld [vmem:[#allocation2 + $0x50] sm:$0xff] (!%p2503_p10)  ;;  %s3384_s12 = scalar_lea.vmem (!%p2503_p10), [#allocation4], %s3211_s13  ;;  %p2520_p11 = scmp.ge.s32.totalorder (!%p2503_p10), %s3116_s28, 3 }
 0x130   : > { %988 = sbr.rel (%p2503_p10) target bundleno = 1009 (0x3f1), region = 60  ;;  %v1005_v10 = vld [vmem:[#allocation2] sm:$0xff] (!%p2503_p10)  ;;  %2602 = vmatprep.subr.bf16.mxu0 (!%p2503_p10), %v1013_v24  ;;  %2898 = vmatprep.subr.bf16.mxu1 (!%p2503_p10), %v1013_v24  ;;  %v1006_v12 = vld [vmem:[#allocation2 + $0x8] sm:$0xff] (!%p2503_p10)  ;;  %v1007_v15 = vld [vmem:[#allocation2 + $0x10] sm:$0xff] (!%p2503_p10) }
 0x131   : > { %2603 = vmatpush3.bf16.msra.mxu0 (!%p2503_p10), %v1005_v10  ;;  %2906 = vmatpush3.bf16.msra.mxu1 (!%p2503_p10), %v1005_v10  ;;  %v3028_v14 = vld [vmem:[%s3217_s17 + $0x4] ss:$8 sps:$4 sm:$0xff] (!%p2503_p10)   ;;  %v1016_v17 = vld [vmem:[#allocation2 + $0x58] sm:$0xff] (!%p2503_p10)  ;;  %v1019_v23 = vld [vmem:[#allocation2 + $0x70] sm:$0xff] (!%p2503_p10) }
 0x132   : > { %2604 = vmatprep.subr.bf16.mxu0 (!%p2503_p10), %v1014_v11  ;;  %2899 = vmatprep.subr.bf16.mxu1 (!%p2503_p10), %v1014_v11  ;;  %v3031_v16 = vld [vmem:[%s3217_s17 + $0x44] ss:$8 sps:$4 sm:$0xff] (!%p2503_p10)   ;;  %v1008_v18 = vld [vmem:[#allocation2 + $0x18] sm:$0xff] (!%p2503_p10)  ;;  %v1011_v25 = vld [vmem:[#allocation2 + $0x30] sm:$0xff] (!%p2503_p10) }
 0x133   : > { %1150 = vmatprep.mubr.bf16.mxu0 (!%p2503_p10), %v3028_v14  ;;  %1182 = vmatprep.mubr.bf16.mxu1 (!%p2503_p10), %v3031_v16  ;;  %v1017_v19 = vld [vmem:[#allocation2 + $0x60] sm:$0xff] (!%p2503_p10)  ;;  %v1018_v21 = vld [vmem:[#allocation2 + $0x68] sm:$0xff] (!%p2503_p10)  ;;  %v1020_v26 = vld [vmem:[#allocation2 + $0x78] sm:$0xff] (!%p2503_p10) }
 0x134   : > { %v1009_v20 = vld [vmem:[#allocation2 + $0x20] sm:$0xff] (!%p2503_p10)  ;;  %v1010_v22 = vld [vmem:[#allocation2 + $0x28] sm:$0xff] (!%p2503_p10)  ;;  %v1012_v27 = vld [vmem:[#allocation2 + $0x38] sm:$0xff] (!%p2503_p10) }
 0x135   : > { %2605 = vmatpush3.bf16.msra.mxu0 (!%p2503_p10), %v1006_v12  ;;  %2907 = vmatpush3.bf16.msra.mxu1 (!%p2503_p10), %v1006_v12  ;;  %v3026_v28 = vld [vmem:[%s3217_s17] ss:$8 sps:$4 sm:$0xff] (!%p2503_p10)   ;;  %v3032_v30 = vld [vmem:[%s3217_s17 + $0x14] ss:$8 sps:$4 sm:$0xff] (!%p2503_p10)   ;;  %v3036_v32 = vld [vmem:[%s3217_s17 + $0x10] ss:$8 sps:$4 sm:$0xff] (!%p2503_p10)  }
 0x136   : > { %2606 = vmatprep.subr.bf16.mxu0 (!%p2503_p10), %v1015_v13  ;;  %2900 = vmatprep.subr.bf16.mxu1 (!%p2503_p10), %v1015_v13  ;;  %v3029_v29 = vld [vmem:[%s3217_s17 + $0x40] ss:$8 sps:$4 sm:$0xff] (!%p2503_p10)   ;;  %v3034_v31 = vld [vmem:[%s3217_s17 + $0x54] ss:$8 sps:$4 sm:$0xff] (!%p2503_p10)   ;;  %v3037_v33 = vld [vmem:[%s3217_s17 + $0x50] ss:$8 sps:$4 sm:$0xff] (!%p2503_p10)  }
 0x137   : > { %v3038_v34 = vld [vmem:[%s3217_s17 + $0x24] ss:$8 sps:$4 sm:$0xff]   ;;  %v3042_v36 = vld [vmem:[%s3217_s17 + $0x20] ss:$8 sps:$4 sm:$0xff]   ;;  %v3044_v38 = vld [vmem:[%s3217_s17 + $0x34] ss:$8 sps:$4 sm:$0xff]  }
 0x138   : > { %v3040_v35 = vld [vmem:[%s3217_s17 + $0x64] ss:$8 sps:$4 sm:$0xff]   ;;  %v3043_v37 = vld [vmem:[%s3217_s17 + $0x60] ss:$8 sps:$4 sm:$0xff]   ;;  %v3046_v39 = vld [vmem:[%s3217_s17 + $0x74] ss:$8 sps:$4 sm:$0xff]  }
 0x139   : > { %2607 = vmatpush3.bf16.msra.mxu0 %v1007_v15  ;;  %2908 = vmatpush3.bf16.msra.mxu1 %v1007_v15  ;;  %v3048_v40 = vld [vmem:[%s3217_s17 + $0x30] ss:$8 sps:$4 sm:$0xff]   ;;  %v1022_v44 = vld [vmem:[%s3384_s12] sm:$0xff]  ;;  %v1023_v52 = vld [vmem:[%s3384_s12 + $0x8] sm:$0xff]  ;;  %s1412_s19 = sshra.s32 (!%p2520_p11), %s3211_s13, 4 }
 0x13a   : > { %2608 = vmatprep.subr.bf16.mxu0 %v1016_v17  ;;  %2901 = vmatprep.subr.bf16.mxu1 %v1016_v17  ;;  %v3049_v41 = vld [vmem:[%s3217_s17 + $0x70] ss:$8 sps:$4 sm:$0xff]   ;;  %v1030_v46 = vld [vmem:[%s3384_s12 + $0x40] sm:$0xff]  ;;  %v1031_v54 = vld [vmem:[%s3384_s12 + $0x48] sm:$0xff]  ;;  %s2529_s21 = sshll.u32 (!%p2520_p11), %s1412_s19, 3 }
 0x13b   : > { %v1024_v4 = vld [vmem:[%s3384_s12 + $0x10] sm:$0xff]  ;;  %v1025_v11 = vld [vmem:[%s3384_s12 + $0x18] sm:$0xff]  ;;  %s1415_s22 = scalar_lea.vmem (!%p2520_p11), [#allocation3], %s2529_s21 }
 0x13c   : > { %v1032_v6 = vld [vmem:[%s3384_s12 + $0x50] sm:$0xff]  ;;  %v1033_v13 = vld [vmem:[%s3384_s12 + $0x58] sm:$0xff] }
 0x13d   : > { %2609 = vmatpush3.bf16.msra.mxu0 %v1008_v18  ;;  %2909 = vmatpush3.bf16.msra.mxu1 %v1008_v18 }
 0x13e   : > { %2610 = vmatprep.subr.bf16.mxu0 %v1017_v19  ;;  %2902 = vmatprep.subr.bf16.mxu1 %v1017_v19 }
 0x141   : > { %2611 = vmatpush3.bf16.msra.mxu0 %v1009_v20  ;;  %2910 = vmatpush3.bf16.msra.mxu1 %v1009_v20 }
 0x142   : > { %2612 = vmatprep.subr.bf16.mxu0 %v1018_v21  ;;  %2903 = vmatprep.subr.bf16.mxu1 %v1018_v21 }
 0x145   : > { %2613 = vmatpush3.bf16.msra.mxu0 %v1010_v22  ;;  %2911 = vmatpush3.bf16.msra.mxu1 %v1010_v22 }
 0x146   : > { %2614 = vmatprep.subr.bf16.mxu0 %v1019_v23  ;;  %2904 = vmatprep.subr.bf16.mxu1 %v1019_v23 }
 0x149   : > { %2615 = vmatpush3.bf16.msra.mxu0 %v1011_v25  ;;  %2912 = vmatpush3.bf16.msra.mxu1 %v1011_v25 }
 0x14a   : > { %2616 = vmatprep.subr.bf16.mxu0 %v1020_v26  ;;  %2905 = vmatprep.subr.bf16.mxu1 %v1020_v26 }
 0x14d   : > { %2617 = vmatpush3.bf16.msra.mxu0 %v1012_v27  ;;  %2913 = vmatpush3.bf16.msra.mxu1 %v1012_v27 }
 0x150   : > { %1151 = vmatmul.mubr.bf16.vlgmr.msra.gmra.mrb[0].mxu0 %v3026_v28  ;;  %1183 = vmatmul.mubr.bf16.vlgmr.msra.gmra.mrb[0].mxu1 %v3029_v29  ;;  %v1026_v28 = vld [vmem:[%s3384_s12 + $0x20] sm:$0xff] }
 0x151   : > { %1158 = vmatprep.mubr.bf16.mxu0 %v3032_v30  ;;  %1190 = vmatprep.mubr.bf16.mxu1 %v3034_v31  ;;  %v1034_v30 = vld [vmem:[%s3384_s12 + $0x60] sm:$0xff] }
 0x158   : > { %1159 = vmatmul.mubr.bf16.gmra.mrb[4].mxu0 %v3036_v32  ;;  %1191 = vmatmul.mubr.bf16.gmra.mrb[4].mxu1 %v3037_v33 }
 0x159   : > { %1166 = vmatprep.mubr.bf16.mxu0 %v3038_v34  ;;  %1198 = vmatprep.mubr.bf16.mxu1 %v3040_v35 }
 0x160   : > { %1167 = vmatmul.mubr.bf16.gmra.mrb[8].mxu0 %v3042_v36  ;;  %1199 = vmatmul.mubr.bf16.gmra.mrb[8].mxu1 %v3043_v37  ;;  %v1027_v36 = vld [vmem:[%s3384_s12 + $0x28] sm:$0xff] }
 0x161   : > { %1174 = vmatprep.mubr.bf16.mxu0 %v3044_v38  ;;  %1206 = vmatprep.mubr.bf16.mxu1 %v3046_v39  ;;  %v1035_v38 = vld [vmem:[%s3384_s12 + $0x68] sm:$0xff] }
 0x168   : > { %1175 = vmatmul.mubr.bf16.gmra.mrb[12].mxu0 %v3048_v40  ;;  %1207 = vmatmul.mubr.bf16.gmra.mrb[12].mxu1 %v3049_v41 }
 0x223   : > { %v2618_v42 = vpop.f32.mrb[0].mxu0  ;;  %v2642_v43 = vpop.f32.mrb[0].mxu1 }
 0x224   : > { %v2619_v45 = vpop.f32.mrb[1].mxu0  ;;  %v2643_v47 = vpop.f32.mrb[1].mxu1 }
 0x225   : > { %v2620_v48 = vadd.f32 %v2619_v45, %v2618_v42  ;;  %v2644_v49 = vadd.f32 %v2643_v47, %v2642_v43  ;;  %v2621_v50 = vpop.f32.mrb[2].mxu0  ;;  %v2645_v51 = vpop.f32.mrb[2].mxu1 }
 0x226   : > { %v2622_v53 = vpop.f32.mrb[3].mxu0  ;;  %v2646_v55 = vpop.f32.mrb[3].mxu1 }
 0x227   : > { %v1153_v56 = vadd.f32 %v2620_v48, %v1022_v44  ;;  %v1185_v57 = vadd.f32 %v2644_v49, %v1030_v46  ;;  %v2623_v58 = vadd.f32 %v2622_v53, %v2621_v50  ;;  %v2647_v59 = vadd.f32 %v2646_v55, %v2645_v51 }
 0x229   : > { %v3390_v60 = vmax.f32 %v1153_v56, 0.0  ;;  %v3392_v61 = vmax.f32 %v1185_v57, 0.0  ;;  %v1156_v62 = vadd.f32 %v2623_v58, %v1023_v52  ;;  %v1188_v63 = vadd.f32 %v2647_v59, %v1031_v54  ;;  %v1028_v52 = vld [vmem:[%s3384_s12 + $0x30] sm:$0xff] }
 0x22a   : > { %v1036_v54 = vld [vmem:[%s3384_s12 + $0x70] sm:$0xff] }
 0x22b   : > { %v3394_v0 = vmax.f32 %v1156_v62, 0.0  ;;  %v3396_v1 = vmax.f32 %v1188_v63, 0.0  ;;  %v2624_v2 = vpop.f32.mrb[4].mxu0  ;;  %v2648_v3 = vpop.f32.mrb[4].mxu1  ;;  %v1029_v62 = vld [vmem:[%s3384_s12 + $0x38] sm:$0xff] }
 0x22c   : > { %v2625_v5 = vpop.f32.mrb[5].mxu0  ;;  %v2649_v7 = vpop.f32.mrb[5].mxu1 }
 0x22d   : > { %v2626_v8 = vadd.f32 %v2625_v5, %v2624_v2  ;;  %v2650_v9 = vadd.f32 %v2649_v7, %v2648_v3  ;;  %v2627_v24 = vpop.f32.mrb[6].mxu0  ;;  %v2651_v10 = vpop.f32.mrb[6].mxu1  ;;  %v1037_v2 = vld [vmem:[%s3384_s12 + $0x78] sm:$0xff] }
 0x22e   : > { %v2628_v12 = vpop.f32.mrb[7].mxu0  ;;  %v2652_v14 = vpop.f32.mrb[7].mxu1 }
 0x22f   : > { %v1161_v15 = vadd.f32 %v2626_v8, %v1024_v4  ;;  %v1193_v16 = vadd.f32 %v2650_v9, %v1032_v6  ;;  %v2629_v17 = vadd.f32 %v2628_v12, %v2627_v24  ;;  %v2653_v18 = vadd.f32 %v2652_v14, %v2651_v10  ;;  %v3051_v14 = vld [vmem:[%s3886_s3 + $0x8] sm:$0xff] (!%p2520_p11)  }
 0x231   : > { %v3402_v19 = vmax.f32 %v1161_v15, 0.0  ;;  %v3404_v20 = vmax.f32 %v1193_v16, 0.0  ;;  %v1164_v21 = vadd.f32 %v2629_v17, %v1025_v11  ;;  %v1196_v22 = vadd.f32 %v2653_v18, %v1033_v13  ;;  %v3050_v13 = vld [vmem:[%s3886_s3] sm:$0xff] (!%p2520_p11)   ;;  %v3052_v17 = vld [vmem:[%s3886_s3 + $0x10] sm:$0xff] (!%p2520_p11)   ;;  %v3053_v18 = vld [vmem:[%s3886_s3 + $0x18] sm:$0xff] (!%p2520_p11)  }
 0x232   : > { %v1235_v15 = vpack.c.bf16 (!%p2520_p11), %v3394_v0, %v3390_v60  ;;  %v1239_v16 = vpack.c.bf16 (!%p2520_p11), %v3396_v1, %v3392_v61  ;;  %2834 = vmatprep.subr.bf16.mxu0 (!%p2520_p11), %v3050_v13  ;;  %2914 = vmatprep.subr.bf16.mxu1 (!%p2520_p11), %v3050_v13 }
 0x233   : > { %v3406_v23 = vmax.f32 %v1164_v21, 0.0  ;;  %v3408_v25 = vmax.f32 %v1196_v22, 0.0  ;;  %v2630_v26 = vpop.f32.mrb[8].mxu0  ;;  %v2654_v27 = vpop.f32.mrb[8].mxu1  ;;  %2835 = vmatpush3.bf16.msra.mxu0 (!%p2520_p11), %v3050_v13  ;;  %2922 = vmatpush3.bf16.msra.mxu1 (!%p2520_p11), %v3050_v13  ;;  %v3054_v21 = vld [vmem:[%s3886_s3 + $0x20] sm:$0xff] (!%p2520_p11)   ;;  %v3055_v22 = vld [vmem:[%s3886_s3 + $0x28] sm:$0xff] (!%p2520_p11)  }
 0x234   : > { %v2631_v29 = vpop.f32.mrb[9].mxu0  ;;  %v2655_v31 = vpop.f32.mrb[9].mxu1  ;;  %2836 = vmatprep.subr.bf16.mxu0 (!%p2520_p11), %v3051_v14  ;;  %2915 = vmatprep.subr.bf16.mxu1 (!%p2520_p11), %v3051_v14 }
 0x235   : > { %v2632_v32 = vadd.f32 %v2631_v29, %v2630_v26  ;;  %v2656_v33 = vadd.f32 %v2655_v31, %v2654_v27  ;;  %v2633_v34 = vpop.f32.mrb[10].mxu0  ;;  %v2657_v35 = vpop.f32.mrb[10].mxu1  ;;  %2850 = vmatprep.mubr.bf16.mxu0 (!%p2520_p11), %v1235_v15  ;;  %2858 = vmatprep.mubr.bf16.mxu1 (!%p2520_p11), %v1239_v16  ;;  %v3056_v26 = vld [vmem:[%s3886_s3 + $0x30] sm:$0xff] (!%p2520_p11)   ;;  %v3057_v27 = vld [vmem:[%s3886_s3 + $0x38] sm:$0xff] (!%p2520_p11)   ;;  %v1240_v29 = vpack.c.bf16 (!%p2520_p11), %v3408_v25, %v3404_v20 }
 0x236   : > { %v2634_v37 = vpop.f32.mrb[11].mxu0  ;;  %v2658_v39 = vpop.f32.mrb[11].mxu1 }
 0x237   : > { %v1169_v40 = vadd.f32 %v2632_v32, %v1026_v28  ;;  %v1201_v41 = vadd.f32 %v2656_v33, %v1034_v30  ;;  %v2635_v42 = vadd.f32 %v2634_v37, %v2633_v34  ;;  %v2659_v43 = vadd.f32 %v2658_v39, %v2657_v35  ;;  %2837 = vmatpush3.bf16.msra.mxu0 (!%p2520_p11), %v3051_v14 }
 0x238   : > { %2923 = vmatpush3.bf16.msra.mxu1 (!%p2520_p11), %v3051_v14  ;;  %2838 = vmatprep.subr.bf16.mxu0 (!%p2520_p11), %v3052_v17  ;;  %v1236_v28 = vpack.c.bf16 (!%p2520_p11), %v3406_v23, %v3402_v19 }
 0x239   : > { %v3414_v44 = vmax.f32 %v1169_v40, 0.0  ;;  %v3416_v45 = vmax.f32 %v1201_v41, 0.0  ;;  %v1172_v46 = vadd.f32 %v2635_v42, %v1027_v36  ;;  %v1204_v47 = vadd.f32 %v2659_v43, %v1035_v38  ;;  %2916 = vmatprep.subr.bf16.mxu1 (!%p2520_p11), %v3052_v17 }
 0x23b   : > { %v3418_v48 = vmax.f32 %v1172_v46, 0.0  ;;  %v3420_v49 = vmax.f32 %v1204_v47, 0.0  ;;  %v2636_v50 = vpop.f32.mrb[12].mxu0  ;;  %v2660_v51 = vpop.f32.mrb[12].mxu1  ;;  %2839 = vmatpush3.bf16.msra.mxu0 (!%p2520_p11), %v3052_v17 }
 0x23c   : > { %v2637_v53 = vpop.f32.mrb[13].mxu0  ;;  %v2661_v55 = vpop.f32.mrb[13].mxu1  ;;  %2924 = vmatpush3.bf16.msra.mxu1 (!%p2520_p11), %v3052_v17  ;;  %2840 = vmatprep.subr.bf16.mxu0 (!%p2520_p11), %v3053_v18 }
 0x23d   : > { %v2638_v56 = vadd.f32 %v2637_v53, %v2636_v50  ;;  %v2662_v57 = vadd.f32 %v2661_v55, %v2660_v51  ;;  %v2639_v58 = vpop.f32.mrb[14].mxu0  ;;  %v2663_v59 = vpop.f32.mrb[14].mxu1  ;;  %1234 = sbr.rel (%p2520_p11) target bundleno = 821 (0x335), region = 64  ;;  %2917 = vmatprep.subr.bf16.mxu1 (!%p2520_p11), %v3053_v18  ;;  %v1237_v30 = vpack.c.bf16 (!%p2520_p11), %v3418_v48, %v3414_v44  ;;  %v1241_v31 = vpack.c.bf16 (!%p2520_p11), %v3420_v49, %v3416_v45 }
 0x23e   : > { %v2640_v63 = vpop.f32.mrb[15].mxu0  ;;  %v2664_v3 = vpop.f32.mrb[15].mxu1 }
 0x23f   : > { %v1177_v4 = vadd.f32 %v2638_v56, %v1028_v52  ;;  %v1209_v5 = vadd.f32 %v2662_v57, %v1036_v54  ;;  %v2641_v6 = vadd.f32 %v2640_v63, %v2639_v58  ;;  %v2665_v7 = vadd.f32 %v2664_v3, %v2663_v59  ;;  %2841 = vmatpush3.bf16.msra.mxu0 (!%p2520_p11), %v3053_v18 }
 0x240   : > { %2925 = vmatpush3.bf16.msra.mxu1 (!%p2520_p11), %v3053_v18  ;;  %2842 = vmatprep.subr.bf16.mxu0 (!%p2520_p11), %v3054_v21 }
 0x241   : > { %v3426_v8 = vmax.f32 %v1177_v4, 0.0  ;;  %v3428_v9 = vmax.f32 %v1209_v5, 0.0  ;;  %v1180_v24 = vadd.f32 %v2641_v6, %v1029_v62  ;;  %v1212_v10 = vadd.f32 %v2665_v7, %v1037_v2  ;;  %2918 = vmatprep.subr.bf16.mxu1 (!%p2520_p11), %v3054_v21 }
 0x243   : > { %v3430_v11 = vmax.f32 %v1180_v24, 0.0  ;;  %v3432_v12 = vmax.f32 %v1212_v10, 0.0  ;;  %2843 = vmatpush3.bf16.msra.mxu0 (!%p2520_p11), %v3054_v21 }
 0x244   : > { %2926 = vmatpush3.bf16.msra.mxu1 %v3054_v21  ;;  %2844 = vmatprep.subr.bf16.mxu0 %v3055_v22 }
 0x245   : > { %2919 = vmatprep.subr.bf16.mxu1 %v3055_v22  ;;  %v1238_v32 = vpack.c.bf16 %v3430_v11, %v3426_v8  ;;  %v1242_v33 = vpack.c.bf16 %v3432_v12, %v3428_v9 }
 0x247   : > { %2845 = vmatpush3.bf16.msra.mxu0 %v3055_v22 }
 0x248   : > { %2927 = vmatpush3.bf16.msra.mxu1 %v3055_v22  ;;  %2846 = vmatprep.subr.bf16.mxu0 %v3056_v26 }
 0x249   : > { %2920 = vmatprep.subr.bf16.mxu1 %v3056_v26 }
 0x24b   : > { %2847 = vmatpush3.bf16.msra.mxu0 %v3056_v26 }
 0x24c   : > { %2928 = vmatpush3.bf16.msra.mxu1 %v3056_v26  ;;  %2848 = vmatprep.subr.bf16.mxu0 %v3057_v27 }
 0x24d   : > { %2921 = vmatprep.subr.bf16.mxu1 %v3057_v27 }
 0x24f   : > { %2849 = vmatpush3.bf16.msra.mxu0 %v3057_v27 }
 0x250   : > { %2929 = vmatpush3.bf16.msra.mxu1 %v3057_v27 }
 0x252   : > { %2851 = vmatmul.mubr.bf16.vlgmr.msra.gmra.mrb[0].mxu0 %v1236_v28 }
 0x253   : > { %2859 = vmatmul.mubr.bf16.vlgmr.msra.gmra.mrb[0].mxu1 %v1240_v29  ;;  %2854 = vmatprep.mubr.bf16.mxu0 %v1237_v30 }
 0x254   : > { %2862 = vmatprep.mubr.bf16.mxu1 %v1241_v31 }
 0x25a   : > { %2855 = vmatmul.mubr.bf16.gmra.mrb[4].mxu0 %v1238_v32 }
 0x25b   : > { %2863 = vmatmul.mubr.bf16.gmra.mrb[4].mxu1 %v1242_v33 }
 0x325   : > { %v2852_v34 = vpop.f32.mrb[0].mxu0 }
 0x326   : > { %v2860_v35 = vpop.f32.mrb[0].mxu1  ;;  %v1341_v36 = vpop.f32.mrb[1].mxu0 }
 0x327   : > { %v1373_v37 = vpop.f32.mrb[1].mxu1  ;;  %v2853_v38 = vpop.f32.mrb[2].mxu0 }
 0x328   : > { %v2861_v39 = vpop.f32.mrb[2].mxu1  ;;  %v1405_v40 = vpack.c.bf16 %v2853_v38, %v2852_v34  ;;  %v1344_v42 = vpop.f32.mrb[3].mxu0 }
 0x329   : > { %v1409_v41 = vpack.c.bf16 %v2861_v39, %v2860_v35  ;;  %v1376_v43 = vpop.f32.mrb[3].mxu1  ;;  %v1404_v46 = vpack.c.bf16 %v1344_v42, %v1341_v36 }
 0x32a   : > { %v1408_v47 = vpack.c.bf16 %v1376_v43, %v1373_v37  ;;  %1417 = vst [vmem:[%s1415_s22 + $0x8] sm:$0xff] %v1405_v40 }
 0x32b   : > { %1421 = vst [vmem:[%s1415_s22 + $0x28] sm:$0xff] %v1409_v41  ;;  %1416 = vst [vmem:[%s1415_s22] sm:$0xff] %v1404_v46 }
 0x32c   : > { %1420 = vst [vmem:[%s1415_s22 + $0x20] sm:$0xff] %v1408_v47 }
 0x32d   : > { %v2856_v50 = vpop.f32.mrb[4].mxu0 }
 0x32e   : > { %v2864_v51 = vpop.f32.mrb[4].mxu1  ;;  %v1357_v52 = vpop.f32.mrb[5].mxu0 }
 0x32f   : > { %v1389_v53 = vpop.f32.mrb[5].mxu1  ;;  %v2857_v54 = vpop.f32.mrb[6].mxu0 }
 0x330   : > { %v2865_v55 = vpop.f32.mrb[6].mxu1  ;;  %v1407_v56 = vpack.c.bf16 %v2857_v54, %v2856_v50  ;;  %v1360_v58 = vpop.f32.mrb[7].mxu0 }
 0x331   : > { %v1411_v57 = vpack.c.bf16 %v2865_v55, %v2864_v51  ;;  %v1392_v59 = vpop.f32.mrb[7].mxu1  ;;  %v1406_v62 = vpack.c.bf16 %v1360_v58, %v1357_v52 }
 0x332   : > { %v1410_v63 = vpack.c.bf16 %v1392_v59, %v1389_v53  ;;  %1419 = vst [vmem:[%s1415_s22 + $0x18] sm:$0xff] %v1407_v56 }
 0x333   : > { %1423 = vst [vmem:[%s1415_s22 + $0x38] sm:$0xff] %v1411_v57  ;;  %1418 = vst [vmem:[%s1415_s22 + $0x10] sm:$0xff] %v1406_v62 }
 0x334   : > { %1422 = vst [vmem:[%s1415_s22 + $0x30] sm:$0xff] %v1410_v63 }
 0x335 PF: > { %p2530_p12 = scmp.ne.s32.totalorder %s3116_s28, 3 }
 0x336   : > { %s3130_s23 = smov (!%p2530_p12), 112   ;;  %s3131_s24 = smov (!%p2530_p12), 96   ;;  %v3526_v32 = vld [vmem:[%s3889_s6] ss:$0 sm:$0xff] (!%p2530_p12)  ;;  %vm1650_vm2 = vcmask (!%p2530_p12), 130048  }
 0x337   : > { %1427 = sbr.rel (%p2530_p12) target bundleno = 1009 (0x3f1), region = 68  ;;  %1448 = vrot.lane.b32.xlu1 (!%p2530_p12), %v3402_v19, %s3130_s23  ;;  %1444 = vrot.lane.b32.xlu0 (!%p2530_p12), %v3390_v60, %s3130_s23 }
 0x33b   : > { %1450 = vrot.lane.b32.xlu1 (!%p2530_p12), %v3406_v23, %s3130_s23  ;;  %1446 = vrot.lane.b32.xlu0 (!%p2530_p12), %v3394_v0, %s3130_s23 }
 0x33f   : > { %1454 = vrot.lane.b32.xlu1 %v3418_v48, %s3130_s23  ;;  %1452 = vrot.lane.b32.xlu0 %v3414_v44, %s3130_s23 }
 0x343   : > { %1458 = vrot.lane.b32.xlu1 %v3430_v11, %s3130_s23  ;;  %1456 = vrot.lane.b32.xlu0 %v3426_v8, %s3130_s23 }
 0x347   : > { %1462 = vrot.lane.b32.xlu1 %v3396_v1, %s3130_s23  ;;  %1460 = vrot.lane.b32.xlu0 %v3392_v61, %s3130_s23 }
 0x34b   : > { %1466 = vrot.lane.b32.xlu1 %v3408_v25, %s3130_s23  ;;  %1464 = vrot.lane.b32.xlu0 %v3404_v20, %s3130_s23 }
 0x34f   : > { %1470 = vrot.lane.b32.xlu1 %v3420_v49, %s3130_s23  ;;  %1468 = vrot.lane.b32.xlu0 %v3416_v45, %s3130_s23 }
 0x353   : > { %1474 = vrot.lane.b32.xlu1 %v3432_v12, %s3130_s23  ;;  %1472 = vrot.lane.b32.xlu0 %v3428_v9, %s3130_s23 }
 0x357   : > { %1510 = vrot.lane.b32.xlu1 %v3394_v0, %s3131_s24  ;;  %1508 = vrot.lane.b32.xlu0 %v3390_v60, %s3131_s24 }
 0x35b   : > { %1514 = vrot.lane.b32.xlu1 %v3406_v23, %s3131_s24  ;;  %1512 = vrot.lane.b32.xlu0 %v3402_v19, %s3131_s24 }
 0x35f   : > { %1518 = vrot.lane.b32.xlu1 %v3418_v48, %s3131_s24  ;;  %1516 = vrot.lane.b32.xlu0 %v3414_v44, %s3131_s24 }
 0x363   : > { %1522 = vrot.lane.b32.xlu1 %v3430_v11, %s3131_s24  ;;  %1520 = vrot.lane.b32.xlu0 %v3426_v8, %s3131_s24 }
 0x367   : > { %1526 = vrot.lane.b32.xlu1 %v3396_v1, %s3131_s24  ;;  %1524 = vrot.lane.b32.xlu0 %v3392_v61, %s3131_s24 }
 0x36b   : > { %1530 = vrot.lane.b32.xlu1 %v3408_v25, %s3131_s24  ;;  %1528 = vrot.lane.b32.xlu0 %v3404_v20, %s3131_s24 }
 0x36f   : > { %1534 = vrot.lane.b32.xlu1 %v3420_v49, %s3131_s24  ;;  %1532 = vrot.lane.b32.xlu0 %v3416_v45, %s3131_s24 }
 0x373   : > { %1538 = vrot.lane.b32.xlu1 %v3432_v12, %s3131_s24  ;;  %1536 = vrot.lane.b32.xlu0 %v3428_v9, %s3131_s24 }
 0x3a9   : > { %v1449_v2 = vpop.permute.xlu1 %1448  ;;  %v1445_v3 = vpop.permute.xlu0 %1444 }
 0x3aa   : > { %v1492_v26 = vadd.f32 %v1445_v3, %v3390_v60  ;;  %v1494_v33 = vadd.f32 %v1449_v2, %v3402_v19  ;;  %v3533_v60 = vld [vmem:[%s3890_s7] ss:$0 sm:$0xff] }
 0x3ad   : > { %v1451_v4 = vpop.permute.xlu1 %1450  ;;  %v1447_v5 = vpop.permute.xlu0 %1446 }
 0x3ae   : > { %v1493_v27 = vadd.f32 %v1447_v5, %v3394_v0  ;;  %v1495_v34 = vadd.f32 %v1451_v4, %v3406_v23 }
 0x3b1   : > { %v1455_v6 = vpop.permute.xlu1 %1454  ;;  %v1453_v7 = vpop.permute.xlu0 %1452 }
 0x3b2   : > { %v1497_v46 = vadd.f32 %v1455_v6, %v3418_v48  ;;  %v1496_v47 = vadd.f32 %v1453_v7, %v3414_v44 }
 0x3b5   : > { %v1459_v24 = vpop.permute.xlu1 %1458  ;;  %v1457_v10 = vpop.permute.xlu0 %1456 }
 0x3b6   : > { %v1499_v58 = vadd.f32 %v1459_v24, %v3430_v11  ;;  %v1498_v59 = vadd.f32 %v1457_v10, %v3426_v8 }
 0x3b9   : > { %v1463_v13 = vpop.permute.xlu1 %1462  ;;  %v1461_v14 = vpop.permute.xlu0 %1460 }
 0x3ba   : > { %v1501_v24 = vadd.f32 %v1463_v13, %v3396_v1  ;;  %v1500_v10 = vadd.f32 %v1461_v14, %v3392_v61 }
 0x3bd   : > { %v3509_v15 = vpop.permute.xlu1 %1466  ;;  %v3511_v16 = vpop.permute.xlu0 %1464 }
 0x3c1   : > { %v3513_v17 = vpop.permute.xlu1 %1470  ;;  %v3515_v18 = vpop.permute.xlu0 %1468 }
 0x3c5   : > { %v3517_v21 = vpop.permute.xlu1 %1474  ;;  %v3519_v22 = vpop.permute.xlu0 %1472 }
 0x3c9   : > { %v1511_v28 = vpop.permute.xlu1 %1510  ;;  %v1509_v29 = vpop.permute.xlu0 %1508 }
 0x3ca   : > { %v1557_v30 = vadd.f32 %v1511_v28, %v1493_v27  ;;  %v1556_v31 = vadd.f32 %v1509_v29, %v1492_v26 }
 0x3cc   : > { %v1573_v35 = vmul.f32 0.33333334, %v1557_v30  ;;  %v1572_v36 = vmul.f32 0.33333334, %v1556_v31 }
 0x3cd   : > { %v1515_v0 = vpop.permute.xlu1 %1514  ;;  %v1513_v37 = vpop.permute.xlu0 %1512 }
 0x3ce   : > { %v1596_v38 = vmul.f32 %v3526_v32, %v1573_v35  ;;  %v1595_v39 = vmul.f32 %v3526_v32, %v1572_v36  ;;  %v1559_v40 = vadd.f32 %v1515_v0, %v1495_v34  ;;  %v1558_v41 = vadd.f32 %v1513_v37, %v1494_v33 }
 0x3d0   : > { %v1619_v42 = vadd.f32 %v3533_v60, %v1596_v38  ;;  %v1618_v19 = vadd.f32 %v3533_v60, %v1595_v39  ;;  %v1575_v23 = vmul.f32 0.33333334, %v1559_v40  ;;  %v1574_v43 = vmul.f32 0.33333334, %v1558_v41 }
 0x3d1   : > { %v1519_v50 = vpop.permute.xlu1 %1518  ;;  %v1517_v51 = vpop.permute.xlu0 %1516  ;;  %v1503_v38 = vadd.f32 %v3509_v15, %v3408_v25  ;;  %v1502_v39 = vadd.f32 %v3511_v16, %v3404_v20  ;;  %v1505_v25 = vadd.f32 %v3513_v17, %v3420_v49  ;;  %v1504_v20 = vadd.f32 %v3515_v18, %v3416_v45 }
 0x3d2   : > { %v1635_v52 = vmax.f32 %v1619_v42, 0.0  ;;  %v1634_v53 = vmax.f32 %v1618_v19, 0.0  ;;  %v1598_v54 = vmul.f32 %v3526_v32, %v1575_v23  ;;  %v1597_v55 = vmul.f32 %v3526_v32, %v1574_v43 }
 0x3d3   : > { %v1561_v56 = vadd.f32 %v1519_v50, %v1497_v46  ;;  %v1560_v57 = vadd.f32 %v1517_v51, %v1496_v47 }
 0x3d4   : > { %1652 = vst.msk [vmem:[%s3222_s20 + $0x8] sm:$0xff] %vm1650_vm2, %v1635_v52  ;;  %1651 = vst.msk [vmem:[%s3222_s20] sm:$0xff] %vm1650_vm2, %v1634_v53  ;;  %v1621_v44 = vadd.f32 %v3533_v60, %v1598_v54  ;;  %v1620_v48 = vadd.f32 %v3533_v60, %v1597_v55 }
 0x3d5   : > { %v1577_v62 = vmul.f32 0.33333334, %v1561_v56  ;;  %v1576_v63 = vmul.f32 0.33333334, %v1560_v57  ;;  %v1523_v2 = vpop.permute.xlu1 %1522  ;;  %v1521_v3 = vpop.permute.xlu0 %1520  ;;  %v1507_v56 = vadd.f32 %v3517_v21, %v3432_v12  ;;  %v1506_v57 = vadd.f32 %v3519_v22, %v3428_v9 }
 0x3d6   : > { %v1637_v4 = vmax.f32 %v1621_v44, 0.0  ;;  %v1636_v5 = vmax.f32 %v1620_v48, 0.0  ;;  %v1563_v6 = vadd.f32 %v1523_v2, %v1499_v58  ;;  %v1562_v11 = vadd.f32 %v1521_v3, %v1498_v59 }
 0x3d7   : > { %v1600_v8 = vmul.f32 %v3526_v32, %v1577_v62  ;;  %v1599_v7 = vmul.f32 %v3526_v32, %v1576_v63 }
 0x3d8   : > { %1654 = vst.msk [vmem:[%s3222_s20 + $0x18] sm:$0xff] %vm1650_vm2, %v1637_v4  ;;  %1653 = vst.msk [vmem:[%s3222_s20 + $0x10] sm:$0xff] %vm1650_vm2, %v1636_v5  ;;  %v1579_v26 = vmul.f32 0.33333334, %v1563_v6  ;;  %v1578_v27 = vmul.f32 0.33333334, %v1562_v11 }
 0x3d9   : > { %v1623_v28 = vadd.f32 %v3533_v60, %v1600_v8  ;;  %v1622_v29 = vadd.f32 %v3533_v60, %v1599_v7  ;;  %v1527_v30 = vpop.permute.xlu1 %1526  ;;  %v1525_v31 = vpop.permute.xlu0 %1524 }
 0x3da   : > { %v1602_v33 = vmul.f32 %v3526_v32, %v1579_v26  ;;  %v1601_v1 = vmul.f32 %v3526_v32, %v1578_v27  ;;  %v1565_v13 = vadd.f32 %v1527_v30, %v1501_v24  ;;  %v1564_v61 = vadd.f32 %v1525_v31, %v1500_v10 }
 0x3db   : > { %v1639_v14 = vmax.f32 %v1623_v28, 0.0  ;;  %v1638_v34 = vmax.f32 %v1622_v29, 0.0 }
 0x3dc   : > { %v1625_v35 = vadd.f32 %v3533_v60, %v1602_v33  ;;  %v1624_v36 = vadd.f32 %v3533_v60, %v1601_v1  ;;  %v1581_v0 = vmul.f32 0.33333334, %v1565_v13  ;;  %v1580_v37 = vmul.f32 0.33333334, %v1564_v61 }
 0x3dd   : > { %1656 = vst.msk [vmem:[%s3222_s20 + $0x28] sm:$0xff] %vm1650_vm2, %v1639_v14  ;;  %1655 = vst.msk [vmem:[%s3222_s20 + $0x20] sm:$0xff] %vm1650_vm2, %v1638_v34  ;;  %v1531_v40 = vpop.permute.xlu1 %1530  ;;  %v1529_v41 = vpop.permute.xlu0 %1528 }
 0x3de   : > { %v1641_v42 = vmax.f32 %v1625_v35, 0.0  ;;  %v1640_v19 = vmax.f32 %v1624_v36, 0.0  ;;  %v1604_v23 = vmul.f32 %v3526_v32, %v1581_v0  ;;  %v1603_v43 = vmul.f32 %v3526_v32, %v1580_v37 }
 0x3df   : > { %v1567_v46 = vadd.f32 %v1531_v40, %v1503_v38  ;;  %v1566_v47 = vadd.f32 %v1529_v41, %v1502_v39 }
 0x3e0   : > { %1658 = vst.msk [vmem:[%s3222_s20 + $0x38] sm:$0xff] %vm1650_vm2, %v1641_v42  ;;  %1657 = vst.msk [vmem:[%s3222_s20 + $0x30] sm:$0xff] %vm1650_vm2, %v1640_v19  ;;  %v1627_v15 = vadd.f32 %v3533_v60, %v1604_v23  ;;  %v1626_v16 = vadd.f32 %v3533_v60, %v1603_v43 }
 0x3e1   : > { %v1583_v50 = vmul.f32 0.33333334, %v1567_v46  ;;  %v1582_v51 = vmul.f32 0.33333334, %v1566_v47  ;;  %v1535_v52 = vpop.permute.xlu1 %1534  ;;  %v1533_v53 = vpop.permute.xlu0 %1532 }
 0x3e2   : > { %v1643_v54 = vmax.f32 %v1627_v15, 0.0  ;;  %v1642_v55 = vmax.f32 %v1626_v16, 0.0  ;;  %v1569_v49 = vadd.f32 %v1535_v52, %v1505_v25  ;;  %v1568_v17 = vadd.f32 %v1533_v53, %v1504_v20 }
 0x3e3   : > { %v1606_v45 = vmul.f32 %v3526_v32, %v1583_v50  ;;  %v1605_v18 = vmul.f32 %v3526_v32, %v1582_v51 }
 0x3e4   : > { %1660 = vst.msk [vmem:[%s3222_s20 + $0x48] sm:$0xff] %vm1650_vm2, %v1643_v54  ;;  %1659 = vst.msk [vmem:[%s3222_s20 + $0x40] sm:$0xff] %vm1650_vm2, %v1642_v55  ;;  %v1585_v58 = vmul.f32 0.33333334, %v1569_v49  ;;  %v1584_v59 = vmul.f32 0.33333334, %v1568_v17 }
 0x3e5   : > { %v1629_v44 = vadd.f32 %v3533_v60, %v1606_v45  ;;  %v1628_v48 = vadd.f32 %v3533_v60, %v1605_v18  ;;  %v1539_v62 = vpop.permute.xlu1 %1538  ;;  %v1537_v63 = vpop.permute.xlu0 %1536 }
 0x3e6   : > { %v1608_v2 = vmul.f32 %v3526_v32, %v1585_v58  ;;  %v1607_v12 = vmul.f32 %v3526_v32, %v1584_v59  ;;  %v1571_v9 = vadd.f32 %v1539_v62, %v1507_v56  ;;  %v1570_v21 = vadd.f32 %v1537_v63, %v1506_v57 }
 0x3e7   : > { %v1645_v22 = vmax.f32 %v1629_v44, 0.0  ;;  %v1644_v3 = vmax.f32 %v1628_v48, 0.0 }
 0x3e8   : > { %v1631_v4 = vadd.f32 %v3533_v60, %v1608_v2  ;;  %v1630_v5 = vadd.f32 %v3533_v60, %v1607_v12  ;;  %v1587_v6 = vmul.f32 0.33333334, %v1571_v9  ;;  %v1586_v11 = vmul.f32 0.33333334, %v1570_v21 }
 0x3e9   : > { %1662 = vst.msk [vmem:[%s3222_s20 + $0x58] sm:$0xff] %vm1650_vm2, %v1645_v22  ;;  %1661 = vst.msk [vmem:[%s3222_s20 + $0x50] sm:$0xff] %vm1650_vm2, %v1644_v3 }
 0x3ea   : > { %v1647_v8 = vmax.f32 %v1631_v4, 0.0  ;;  %v1646_v7 = vmax.f32 %v1630_v5, 0.0  ;;  %v1610_v24 = vmul.f32 %v3526_v32, %v1587_v6  ;;  %v1609_v10 = vmul.f32 %v3526_v32, %v1586_v11 }
 0x3ec   : > { %1664 = vst.msk [vmem:[%s3222_s20 + $0x68] sm:$0xff] %vm1650_vm2, %v1647_v8  ;;  %1663 = vst.msk [vmem:[%s3222_s20 + $0x60] sm:$0xff] %vm1650_vm2, %v1646_v7  ;;  %v1633_v26 = vadd.f32 %v3533_v60, %v1610_v24  ;;  %v1632_v27 = vadd.f32 %v3533_v60, %v1609_v10 }
 0x3ee   : > { %v1649_v28 = vmax.f32 %v1633_v26, 0.0  ;;  %v1648_v29 = vmax.f32 %v1632_v27, 0.0 }
 0x3f0   : > { %1666 = vst.msk [vmem:[%s3222_s20 + $0x78] sm:$0xff] %vm1650_vm2, %v1649_v28  ;;  %1665 = vst.msk [vmem:[%s3222_s20 + $0x70] sm:$0xff] %vm1650_vm2, %v1648_v29 }
 0x3f1 PF: > { %p2533_p13 = scmp.eq.s32.totalorder %s3905_s27, 0 }
 0x3f2   : > { %v1695_v32 = vld [vmem:[#allocation3 + $0x40] sm:$0xff] (!%p2533_p13)  ;;  %v1696_v31 = vld [vmem:[#allocation3 + $0x48] sm:$0xff] (!%p2533_p13)  ;;  %v1697_v33 = vld [vmem:[#allocation3 + $0x50] sm:$0xff] (!%p2533_p13)  ;;  %s3635_s27 = scalar_lea.vmem (!%p2533_p13), [#allocation4], %s3211_s13  ;;  %p2550_p0 = scmp.ge.s32.totalorder (!%p2533_p13), %s3116_s28, 3 }
 0x3f3   : > { %1670 = sbr.rel (%p2533_p13) target bundleno = 1716 (0x6b4), region = 72  ;;  %v1687_v30 = vld [vmem:[#allocation3] sm:$0xff] (!%p2533_p13)  ;;  %2682 = vmatprep.subr.bf16.mxu0 (!%p2533_p13), %v1695_v32  ;;  %2930 = vmatprep.subr.bf16.mxu1 (!%p2533_p13), %v1695_v32  ;;  %v1688_v60 = vld [vmem:[#allocation3 + $0x8] sm:$0xff] (!%p2533_p13)  ;;  %v1689_v13 = vld [vmem:[#allocation3 + $0x10] sm:$0xff] (!%p2533_p13) }
 0x3f4   : > { %2683 = vmatpush3.bf16.msra.mxu0 (!%p2533_p13), %v1687_v30  ;;  %2938 = vmatpush3.bf16.msra.mxu1 (!%p2533_p13), %v1687_v30  ;;  %v3060_v1 = vld [vmem:[%s3217_s17 + $0x4] ss:$8 sps:$4 sm:$0xff] (!%p2533_p13)   ;;  %v1698_v14 = vld [vmem:[#allocation3 + $0x58] sm:$0xff] (!%p2533_p13)  ;;  %v1701_v38 = vld [vmem:[#allocation3 + $0x70] sm:$0xff] (!%p2533_p13) }
 0x3f5   : > { %2684 = vmatprep.subr.bf16.mxu0 (!%p2533_p13), %v1696_v31  ;;  %2931 = vmatprep.subr.bf16.mxu1 (!%p2533_p13), %v1696_v31  ;;  %v3063_v61 = vld [vmem:[%s3217_s17 + $0x44] ss:$8 sps:$4 sm:$0xff] (!%p2533_p13)   ;;  %v1690_v34 = vld [vmem:[#allocation3 + $0x18] sm:$0xff] (!%p2533_p13)  ;;  %v1693_v39 = vld [vmem:[#allocation3 + $0x30] sm:$0xff] (!%p2533_p13) }
 0x3f6   : > { %1832 = vmatprep.mubr.bf16.mxu0 (!%p2533_p13), %v3060_v1  ;;  %1864 = vmatprep.mubr.bf16.mxu1 (!%p2533_p13), %v3063_v61  ;;  %v1699_v35 = vld [vmem:[#allocation3 + $0x60] sm:$0xff] (!%p2533_p13)  ;;  %v1700_v0 = vld [vmem:[#allocation3 + $0x68] sm:$0xff] (!%p2533_p13)  ;;  %v1702_v40 = vld [vmem:[#allocation3 + $0x78] sm:$0xff] (!%p2533_p13) }
 0x3f7   : > { %v1691_v36 = vld [vmem:[#allocation3 + $0x20] sm:$0xff] (!%p2533_p13)  ;;  %v1692_v37 = vld [vmem:[#allocation3 + $0x28] sm:$0xff] (!%p2533_p13)  ;;  %v1694_v41 = vld [vmem:[#allocation3 + $0x38] sm:$0xff] (!%p2533_p13) }
 0x3f8   : > { %2685 = vmatpush3.bf16.msra.mxu0 (!%p2533_p13), %v1688_v60  ;;  %2939 = vmatpush3.bf16.msra.mxu1 (!%p2533_p13), %v1688_v60  ;;  %v3058_v42 = vld [vmem:[%s3217_s17] ss:$8 sps:$4 sm:$0xff] (!%p2533_p13)   ;;  %v3064_v23 = vld [vmem:[%s3217_s17 + $0x14] ss:$8 sps:$4 sm:$0xff] (!%p2533_p13)   ;;  %v3068_v46 = vld [vmem:[%s3217_s17 + $0x10] ss:$8 sps:$4 sm:$0xff] (!%p2533_p13)  }
 0x3f9   : > { %2686 = vmatprep.subr.bf16.mxu0 (!%p2533_p13), %v1697_v33  ;;  %2932 = vmatprep.subr.bf16.mxu1 (!%p2533_p13), %v1697_v33  ;;  %v3061_v19 = vld [vmem:[%s3217_s17 + $0x40] ss:$8 sps:$4 sm:$0xff] (!%p2533_p13)   ;;  %v3066_v43 = vld [vmem:[%s3217_s17 + $0x54] ss:$8 sps:$4 sm:$0xff] (!%p2533_p13)   ;;  %v3069_v47 = vld [vmem:[%s3217_s17 + $0x50] ss:$8 sps:$4 sm:$0xff] (!%p2533_p13)  }
 0x3fa   : > { %v3070_v25 = vld [vmem:[%s3217_s17 + $0x24] ss:$8 sps:$4 sm:$0xff]   ;;  %v3074_v15 = vld [vmem:[%s3217_s17 + $0x20] ss:$8 sps:$4 sm:$0xff]   ;;  %v3076_v50 = vld [vmem:[%s3217_s17 + $0x34] ss:$8 sps:$4 sm:$0xff]  }
 0x3fb   : > { %v3072_v20 = vld [vmem:[%s3217_s17 + $0x64] ss:$8 sps:$4 sm:$0xff]   ;;  %v3075_v16 = vld [vmem:[%s3217_s17 + $0x60] ss:$8 sps:$4 sm:$0xff]   ;;  %v3078_v51 = vld [vmem:[%s3217_s17 + $0x74] ss:$8 sps:$4 sm:$0xff]  }
 0x3fc   : > { %2687 = vmatpush3.bf16.msra.mxu0 %v1689_v13  ;;  %2940 = vmatpush3.bf16.msra.mxu1 %v1689_v13  ;;  %v3080_v52 = vld [vmem:[%s3217_s17 + $0x30] ss:$8 sps:$4 sm:$0xff]   ;;  %v1704_v49 = vld [vmem:[%s3635_s27] sm:$0xff]  ;;  %v1705_v44 = vld [vmem:[%s3635_s27 + $0x8] sm:$0xff]  ;;  %s2094_s16 = sshra.s32 (!%p2550_p0), %s3211_s13, 4 }
 0x3fd   : > { %2688 = vmatprep.subr.bf16.mxu0 %v1698_v14  ;;  %2933 = vmatprep.subr.bf16.mxu1 %v1698_v14  ;;  %v3081_v53 = vld [vmem:[%s3217_s17 + $0x70] ss:$8 sps:$4 sm:$0xff]   ;;  %v1712_v45 = vld [vmem:[%s3635_s27 + $0x40] sm:$0xff]  ;;  %v1713_v62 = vld [vmem:[%s3635_s27 + $0x48] sm:$0xff]  ;;  %s2559_s18 = sshll.u32 (!%p2550_p0), %s2094_s16, 3 }
 0x3fe   : > { %v1706_v24 = vld [vmem:[%s3635_s27 + $0x10] sm:$0xff]  ;;  %v1707_v31 = vld [vmem:[%s3635_s27 + $0x18] sm:$0xff]  ;;  %s2097_s19 = scalar_lea.vmem (!%p2550_p0), [#allocation2], %s2559_s18 }
 0x3ff   : > { %v1714_v26 = vld [vmem:[%s3635_s27 + $0x50] sm:$0xff]  ;;  %v1715_v33 = vld [vmem:[%s3635_s27 + $0x58] sm:$0xff] }
 0x400   : > { %2689 = vmatpush3.bf16.msra.mxu0 %v1690_v34  ;;  %2941 = vmatpush3.bf16.msra.mxu1 %v1690_v34 }
 0x401   : > { %2690 = vmatprep.subr.bf16.mxu0 %v1699_v35  ;;  %2934 = vmatprep.subr.bf16.mxu1 %v1699_v35 }
 0x404   : > { %2691 = vmatpush3.bf16.msra.mxu0 %v1691_v36  ;;  %2942 = vmatpush3.bf16.msra.mxu1 %v1691_v36 }
 0x405   : > { %2692 = vmatprep.subr.bf16.mxu0 %v1700_v0  ;;  %2935 = vmatprep.subr.bf16.mxu1 %v1700_v0 }
 0x408   : > { %2693 = vmatpush3.bf16.msra.mxu0 %v1692_v37  ;;  %2943 = vmatpush3.bf16.msra.mxu1 %v1692_v37 }
 0x409   : > { %2694 = vmatprep.subr.bf16.mxu0 %v1701_v38  ;;  %2936 = vmatprep.subr.bf16.mxu1 %v1701_v38 }
 0x40c   : > { %2695 = vmatpush3.bf16.msra.mxu0 %v1693_v39  ;;  %2944 = vmatpush3.bf16.msra.mxu1 %v1693_v39 }
 0x40d   : > { %2696 = vmatprep.subr.bf16.mxu0 %v1702_v40  ;;  %2937 = vmatprep.subr.bf16.mxu1 %v1702_v40 }
 0x410   : > { %2697 = vmatpush3.bf16.msra.mxu0 %v1694_v41  ;;  %2945 = vmatpush3.bf16.msra.mxu1 %v1694_v41 }
 0x413   : > { %1833 = vmatmul.mubr.bf16.vlgmr.msra.gmra.mrb[0].mxu0 %v3058_v42  ;;  %1865 = vmatmul.mubr.bf16.vlgmr.msra.gmra.mrb[0].mxu1 %v3061_v19  ;;  %v1708_v42 = vld [vmem:[%s3635_s27 + $0x20] sm:$0xff] }
 0x414   : > { %1840 = vmatprep.mubr.bf16.mxu0 %v3064_v23  ;;  %1872 = vmatprep.mubr.bf16.mxu1 %v3066_v43  ;;  %v1716_v23 = vld [vmem:[%s3635_s27 + $0x60] sm:$0xff] }
 0x41b   : > { %1841 = vmatmul.mubr.bf16.gmra.mrb[4].mxu0 %v3068_v46  ;;  %1873 = vmatmul.mubr.bf16.gmra.mrb[4].mxu1 %v3069_v47 }
 0x41c   : > { %1848 = vmatprep.mubr.bf16.mxu0 %v3070_v25  ;;  %1880 = vmatprep.mubr.bf16.mxu1 %v3072_v20 }
 0x423   : > { %1849 = vmatmul.mubr.bf16.gmra.mrb[8].mxu0 %v3074_v15  ;;  %1881 = vmatmul.mubr.bf16.gmra.mrb[8].mxu1 %v3075_v16  ;;  %v1709_v15 = vld [vmem:[%s3635_s27 + $0x28] sm:$0xff] }
 0x424   : > { %1856 = vmatprep.mubr.bf16.mxu0 %v3076_v50  ;;  %1888 = vmatprep.mubr.bf16.mxu1 %v3078_v51  ;;  %v1717_v50 = vld [vmem:[%s3635_s27 + $0x68] sm:$0xff] }
 0x42b   : > { %1857 = vmatmul.mubr.bf16.gmra.mrb[12].mxu0 %v3080_v52  ;;  %1889 = vmatmul.mubr.bf16.gmra.mrb[12].mxu1 %v3081_v53 }
 0x4e6   : > { %v2698_v54 = vpop.f32.mrb[0].mxu0  ;;  %v2722_v55 = vpop.f32.mrb[0].mxu1 }
 0x4e7   : > { %v2699_v17 = vpop.f32.mrb[1].mxu0  ;;  %v2723_v18 = vpop.f32.mrb[1].mxu1 }
 0x4e8   : > { %v2700_v56 = vadd.f32 %v2699_v17, %v2698_v54  ;;  %v2724_v57 = vadd.f32 %v2723_v18, %v2722_v55  ;;  %v2701_v58 = vpop.f32.mrb[2].mxu0  ;;  %v2725_v59 = vpop.f32.mrb[2].mxu1 }
 0x4e9   : > { %v2702_v48 = vpop.f32.mrb[3].mxu0  ;;  %v2726_v63 = vpop.f32.mrb[3].mxu1 }
 0x4ea   : > { %v1835_v2 = vadd.f32 %v2700_v56, %v1704_v49  ;;  %v1867_v12 = vadd.f32 %v2724_v57, %v1712_v45  ;;  %v2703_v9 = vadd.f32 %v2702_v48, %v2701_v58  ;;  %v2727_v21 = vadd.f32 %v2726_v63, %v2725_v59 }
 0x4ec   : > { %v3641_v22 = vmax.f32 %v1835_v2, 0.0  ;;  %v3643_v3 = vmax.f32 %v1867_v12, 0.0  ;;  %v1838_v4 = vadd.f32 %v2703_v9, %v1705_v44  ;;  %v1870_v5 = vadd.f32 %v2727_v21, %v1713_v62  ;;  %v1710_v44 = vld [vmem:[%s3635_s27 + $0x30] sm:$0xff] }
 0x4ed   : > { %v1718_v62 = vld [vmem:[%s3635_s27 + $0x70] sm:$0xff] }
 0x4ee   : > { %v3645_v6 = vmax.f32 %v1838_v4, 0.0  ;;  %v3647_v11 = vmax.f32 %v1870_v5, 0.0  ;;  %v2704_v8 = vpop.f32.mrb[4].mxu0  ;;  %v2728_v7 = vpop.f32.mrb[4].mxu1  ;;  %v1711_v4 = vld [vmem:[%s3635_s27 + $0x38] sm:$0xff] }
 0x4ef   : > { %v2705_v10 = vpop.f32.mrb[5].mxu0  ;;  %v2729_v27 = vpop.f32.mrb[5].mxu1 }
 0x4f0   : > { %v2706_v28 = vadd.f32 %v2705_v10, %v2704_v8  ;;  %v2730_v29 = vadd.f32 %v2729_v27, %v2728_v7  ;;  %v2707_v32 = vpop.f32.mrb[6].mxu0  ;;  %v2731_v30 = vpop.f32.mrb[6].mxu1  ;;  %v1719_v8 = vld [vmem:[%s3635_s27 + $0x78] sm:$0xff] }
 0x4f1   : > { %v2708_v60 = vpop.f32.mrb[7].mxu0  ;;  %v2732_v1 = vpop.f32.mrb[7].mxu1 }
 0x4f2   : > { %v1843_v13 = vadd.f32 %v2706_v28, %v1706_v24  ;;  %v1875_v61 = vadd.f32 %v2730_v29, %v1714_v26  ;;  %v2709_v14 = vadd.f32 %v2708_v60, %v2707_v32  ;;  %v2733_v34 = vadd.f32 %v2732_v1, %v2731_v30  ;;  %v3083_v1 = vld [vmem:[%s3886_s3 + $0x8] sm:$0xff] (!%p2550_p0)  }
 0x4f4   : > { %v3653_v35 = vmax.f32 %v1843_v13, 0.0  ;;  %v3655_v36 = vmax.f32 %v1875_v61, 0.0  ;;  %v1846_v0 = vadd.f32 %v2709_v14, %v1707_v31  ;;  %v1878_v37 = vadd.f32 %v2733_v34, %v1715_v33  ;;  %v3082_v33 = vld [vmem:[%s3886_s3] sm:$0xff] (!%p2550_p0)   ;;  %v3084_v14 = vld [vmem:[%s3886_s3 + $0x10] sm:$0xff] (!%p2550_p0)   ;;  %v3085_v34 = vld [vmem:[%s3886_s3 + $0x18] sm:$0xff] (!%p2550_p0)  }
 0x4f5   : > { %v1917_v13 = vpack.c.bf16 (!%p2550_p0), %v3645_v6, %v3641_v22  ;;  %v1921_v61 = vpack.c.bf16 (!%p2550_p0), %v3647_v11, %v3643_v3  ;;  %2866 = vmatprep.subr.bf16.mxu0 (!%p2550_p0), %v3082_v33  ;;  %2946 = vmatprep.subr.bf16.mxu1 (!%p2550_p0), %v3082_v33 }
 0x4f6   : > { %v3657_v38 = vmax.f32 %v1846_v0, 0.0  ;;  %v3659_v39 = vmax.f32 %v1878_v37, 0.0  ;;  %v2710_v40 = vpop.f32.mrb[8].mxu0  ;;  %v2734_v41 = vpop.f32.mrb[8].mxu1  ;;  %2867 = vmatpush3.bf16.msra.mxu0 (!%p2550_p0), %v3082_v33  ;;  %2954 = vmatpush3.bf16.msra.mxu1 (!%p2550_p0), %v3082_v33  ;;  %v3086_v0 = vld [vmem:[%s3886_s3 + $0x20] sm:$0xff] (!%p2550_p0)   ;;  %v3087_v37 = vld [vmem:[%s3886_s3 + $0x28] sm:$0xff] (!%p2550_p0)  }
 0x4f7   : > { %v2711_v19 = vpop.f32.mrb[9].mxu0  ;;  %v2735_v43 = vpop.f32.mrb[9].mxu1  ;;  %2868 = vmatprep.subr.bf16.mxu0 (!%p2550_p0), %v3083_v1  ;;  %2947 = vmatprep.subr.bf16.mxu1 (!%p2550_p0), %v3083_v1 }
 0x4f8   : > { %v2712_v46 = vadd.f32 %v2711_v19, %v2710_v40  ;;  %v2736_v47 = vadd.f32 %v2735_v43, %v2734_v41  ;;  %v2713_v25 = vpop.f32.mrb[10].mxu0  ;;  %v2737_v20 = vpop.f32.mrb[10].mxu1  ;;  %2882 = vmatprep.mubr.bf16.mxu0 (!%p2550_p0), %v1917_v13  ;;  %2890 = vmatprep.mubr.bf16.mxu1 (!%p2550_p0), %v1921_v61  ;;  %v3088_v40 = vld [vmem:[%s3886_s3 + $0x30] sm:$0xff] (!%p2550_p0)   ;;  %v3089_v41 = vld [vmem:[%s3886_s3 + $0x38] sm:$0xff] (!%p2550_p0)   ;;  %v1922_v19 = vpack.c.bf16 (!%p2550_p0), %v3659_v39, %v3655_v36 }
 0x4f9   : > { %v2714_v16 = vpop.f32.mrb[11].mxu0  ;;  %v2738_v51 = vpop.f32.mrb[11].mxu1 }
 0x4fa   : > { %v1851_v52 = vadd.f32 %v2712_v46, %v1708_v42  ;;  %v1883_v53 = vadd.f32 %v2736_v47, %v1716_v23  ;;  %v2715_v54 = vadd.f32 %v2714_v16, %v2713_v25  ;;  %v2739_v55 = vadd.f32 %v2738_v51, %v2737_v20  ;;  %2869 = vmatpush3.bf16.msra.mxu0 (!%p2550_p0), %v3083_v1 }
 0x4fb   : > { %2955 = vmatpush3.bf16.msra.mxu1 (!%p2550_p0), %v3083_v1  ;;  %2870 = vmatprep.subr.bf16.mxu0 (!%p2550_p0), %v3084_v14  ;;  %v1918_v42 = vpack.c.bf16 (!%p2550_p0), %v3657_v38, %v3653_v35 }
 0x4fc   : > { %v3665_v49 = vmax.f32 %v1851_v52, 0.0  ;;  %v3667_v17 = vmax.f32 %v1883_v53, 0.0  ;;  %v1854_v45 = vadd.f32 %v2715_v54, %v1709_v15  ;;  %v1886_v18 = vadd.f32 %v2739_v55, %v1717_v50  ;;  %2948 = vmatprep.subr.bf16.mxu1 (!%p2550_p0), %v3084_v14 }
 0x4fe   : > { %v3669_v56 = vmax.f32 %v1854_v45, 0.0  ;;  %v3671_v57 = vmax.f32 %v1886_v18, 0.0  ;;  %v2716_v58 = vpop.f32.mrb[12].mxu0  ;;  %v2740_v59 = vpop.f32.mrb[12].mxu1  ;;  %2871 = vmatpush3.bf16.msra.mxu0 (!%p2550_p0), %v3084_v14 }
 0x4ff   : > { %v2717_v48 = vpop.f32.mrb[13].mxu0  ;;  %v2741_v63 = vpop.f32.mrb[13].mxu1  ;;  %2956 = vmatpush3.bf16.msra.mxu1 (!%p2550_p0), %v3084_v14  ;;  %2872 = vmatprep.subr.bf16.mxu0 (!%p2550_p0), %v3085_v34 }
 0x500   : > { %v2718_v2 = vadd.f32 %v2717_v48, %v2716_v58  ;;  %v2742_v12 = vadd.f32 %v2741_v63, %v2740_v59  ;;  %v2719_v9 = vpop.f32.mrb[14].mxu0  ;;  %v2743_v21 = vpop.f32.mrb[14].mxu1  ;;  %1916 = sbr.rel (%p2550_p0) target bundleno = 1528 (0x5f8), region = 76  ;;  %2949 = vmatprep.subr.bf16.mxu1 (!%p2550_p0), %v3085_v34  ;;  %v1919_v23 = vpack.c.bf16 (!%p2550_p0), %v3669_v56, %v3665_v49  ;;  %v1923_v43 = vpack.c.bf16 (!%p2550_p0), %v3671_v57, %v3667_v17 }
 0x501   : > { %v2720_v5 = vpop.f32.mrb[15].mxu0  ;;  %v2744_v7 = vpop.f32.mrb[15].mxu1 }
 0x502   : > { %v1859_v24 = vadd.f32 %v2718_v2, %v1710_v44  ;;  %v1891_v10 = vadd.f32 %v2742_v12, %v1718_v62  ;;  %v2721_v26 = vadd.f32 %v2720_v5, %v2719_v9  ;;  %v2745_v27 = vadd.f32 %v2744_v7, %v2743_v21  ;;  %2873 = vmatpush3.bf16.msra.mxu0 (!%p2550_p0), %v3085_v34 }
 0x503   : > { %2957 = vmatpush3.bf16.msra.mxu1 (!%p2550_p0), %v3085_v34  ;;  %2874 = vmatprep.subr.bf16.mxu0 (!%p2550_p0), %v3086_v0 }
 0x504   : > { %v3677_v28 = vmax.f32 %v1859_v24, 0.0  ;;  %v3679_v29 = vmax.f32 %v1891_v10, 0.0  ;;  %v1862_v32 = vadd.f32 %v2721_v26, %v1711_v4  ;;  %v1894_v30 = vadd.f32 %v2745_v27, %v1719_v8  ;;  %2950 = vmatprep.subr.bf16.mxu1 (!%p2550_p0), %v3086_v0 }
 0x506   : > { %v3681_v31 = vmax.f32 %v1862_v32, 0.0  ;;  %v3683_v60 = vmax.f32 %v1894_v30, 0.0  ;;  %2875 = vmatpush3.bf16.msra.mxu0 (!%p2550_p0), %v3086_v0 }
 0x507   : > { %2958 = vmatpush3.bf16.msra.mxu1 %v3086_v0  ;;  %2876 = vmatprep.subr.bf16.mxu0 %v3087_v37 }
 0x508   : > { %2951 = vmatprep.subr.bf16.mxu1 %v3087_v37  ;;  %v1920_v46 = vpack.c.bf16 %v3681_v31, %v3677_v28  ;;  %v1924_v47 = vpack.c.bf16 %v3683_v60, %v3679_v29 }
 0x50a   : > { %2877 = vmatpush3.bf16.msra.mxu0 %v3087_v37 }
 0x50b   : > { %2959 = vmatpush3.bf16.msra.mxu1 %v3087_v37  ;;  %2878 = vmatprep.subr.bf16.mxu0 %v3088_v40 }
 0x50c   : > { %2952 = vmatprep.subr.bf16.mxu1 %v3088_v40 }
 0x50e   : > { %2879 = vmatpush3.bf16.msra.mxu0 %v3088_v40 }
 0x50f   : > { %2960 = vmatpush3.bf16.msra.mxu1 %v3088_v40  ;;  %2880 = vmatprep.subr.bf16.mxu0 %v3089_v41 }
 0x510   : > { %2953 = vmatprep.subr.bf16.mxu1 %v3089_v41 }
 0x512   : > { %2881 = vmatpush3.bf16.msra.mxu0 %v3089_v41 }
 0x513   : > { %2961 = vmatpush3.bf16.msra.mxu1 %v3089_v41 }
 0x515   : > { %2883 = vmatmul.mubr.bf16.vlgmr.msra.gmra.mrb[0].mxu0 %v1918_v42 }
 0x516   : > { %2891 = vmatmul.mubr.bf16.vlgmr.msra.gmra.mrb[0].mxu1 %v1922_v19  ;;  %2886 = vmatprep.mubr.bf16.mxu0 %v1919_v23 }
 0x517   : > { %2894 = vmatprep.mubr.bf16.mxu1 %v1923_v43 }
 0x51d   : > { %2887 = vmatmul.mubr.bf16.gmra.mrb[4].mxu0 %v1920_v46 }
 0x51e   : > { %2895 = vmatmul.mubr.bf16.gmra.mrb[4].mxu1 %v1924_v47 }
 0x5e8   : > { %v2884_v25 = vpop.f32.mrb[0].mxu0 }
 0x5e9   : > { %v2892_v20 = vpop.f32.mrb[0].mxu1  ;;  %v2023_v15 = vpop.f32.mrb[1].mxu0 }
 0x5ea   : > { %v2055_v16 = vpop.f32.mrb[1].mxu1  ;;  %v2885_v50 = vpop.f32.mrb[2].mxu0 }
 0x5eb   : > { %v2893_v51 = vpop.f32.mrb[2].mxu1  ;;  %v2087_v52 = vpack.c.bf16 %v2885_v50, %v2884_v25  ;;  %v2026_v54 = vpop.f32.mrb[3].mxu0 }
 0x5ec   : > { %v2091_v53 = vpack.c.bf16 %v2893_v51, %v2892_v20  ;;  %v2058_v55 = vpop.f32.mrb[3].mxu1  ;;  %v2086_v45 = vpack.c.bf16 %v2026_v54, %v2023_v15 }
 0x5ed   : > { %v2090_v18 = vpack.c.bf16 %v2058_v55, %v2055_v16  ;;  %2099 = vst [vmem:[%s2097_s19 + $0x8] sm:$0xff] %v2087_v52 }
 0x5ee   : > { %2103 = vst [vmem:[%s2097_s19 + $0x28] sm:$0xff] %v2091_v53  ;;  %2098 = vst [vmem:[%s2097_s19] sm:$0xff] %v2086_v45 }
 0x5ef   : > { %2102 = vst [vmem:[%s2097_s19 + $0x20] sm:$0xff] %v2090_v18 }
 0x5f0   : > { %v2888_v58 = vpop.f32.mrb[4].mxu0 }
 0x5f1   : > { %v2896_v59 = vpop.f32.mrb[4].mxu1  ;;  %v2039_v44 = vpop.f32.mrb[5].mxu0 }
 0x5f2   : > { %v2071_v48 = vpop.f32.mrb[5].mxu1  ;;  %v2889_v62 = vpop.f32.mrb[6].mxu0 }
 0x5f3   : > { %v2897_v63 = vpop.f32.mrb[6].mxu1  ;;  %v2089_v2 = vpack.c.bf16 %v2889_v62, %v2888_v58  ;;  %v2042_v9 = vpop.f32.mrb[7].mxu0 }
 0x5f4   : > { %v2093_v12 = vpack.c.bf16 %v2897_v63, %v2896_v59  ;;  %v2074_v21 = vpop.f32.mrb[7].mxu1  ;;  %v2088_v4 = vpack.c.bf16 %v2042_v9, %v2039_v44 }
 0x5f5   : > { %v2092_v5 = vpack.c.bf16 %v2074_v21, %v2071_v48  ;;  %2101 = vst [vmem:[%s2097_s19 + $0x18] sm:$0xff] %v2089_v2 }
 0x5f6   : > { %2105 = vst [vmem:[%s2097_s19 + $0x38] sm:$0xff] %v2093_v12  ;;  %2100 = vst [vmem:[%s2097_s19 + $0x10] sm:$0xff] %v2088_v4 }
 0x5f7   : > { %2104 = vst [vmem:[%s2097_s19 + $0x30] sm:$0xff] %v2092_v5 }
 0x5f8 PF: > { %p2560_p1 = scmp.ne.s32.totalorder %s3116_s28, 3 }
 0x5f9   : > { %s3132_s13 = smov (!%p2560_p1), 112   ;;  %s3133_s28 = smov (!%p2560_p1), 96   ;;  %v3777_v46 = vld [vmem:[%s3889_s6] ss:$0 sm:$0xff] (!%p2560_p1)  ;;  %vm2332_vm3 = vcmask (!%p2560_p1), 130048  }
 0x5fa   : > { %2109 = sbr.rel (%p2560_p1) target bundleno = 1716 (0x6b4), region = 80  ;;  %2130 = vrot.lane.b32.xlu1 (!%p2560_p1), %v3653_v35, %s3132_s13  ;;  %2126 = vrot.lane.b32.xlu0 (!%p2560_p1), %v3641_v22, %s3132_s13 }
 0x5fe   : > { %2132 = vrot.lane.b32.xlu1 (!%p2560_p1), %v3657_v38, %s3132_s13  ;;  %2128 = vrot.lane.b32.xlu0 (!%p2560_p1), %v3645_v6, %s3132_s13 }
 0x602   : > { %2136 = vrot.lane.b32.xlu1 %v3669_v56, %s3132_s13  ;;  %2134 = vrot.lane.b32.xlu0 %v3665_v49, %s3132_s13 }
 0x606   : > { %2140 = vrot.lane.b32.xlu1 %v3681_v31, %s3132_s13  ;;  %2138 = vrot.lane.b32.xlu0 %v3677_v28, %s3132_s13 }
 0x60a   : > { %2144 = vrot.lane.b32.xlu1 %v3647_v11, %s3132_s13  ;;  %2142 = vrot.lane.b32.xlu0 %v3643_v3, %s3132_s13 }
 0x60e   : > { %2148 = vrot.lane.b32.xlu1 %v3659_v39, %s3132_s13  ;;  %2146 = vrot.lane.b32.xlu0 %v3655_v36, %s3132_s13 }
 0x612   : > { %2152 = vrot.lane.b32.xlu1 %v3671_v57, %s3132_s13  ;;  %2150 = vrot.lane.b32.xlu0 %v3667_v17, %s3132_s13 }
 0x616   : > { %2156 = vrot.lane.b32.xlu1 %v3683_v60, %s3132_s13  ;;  %2154 = vrot.lane.b32.xlu0 %v3679_v29, %s3132_s13 }
 0x61a   : > { %2192 = vrot.lane.b32.xlu1 %v3645_v6, %s3133_s28  ;;  %2190 = vrot.lane.b32.xlu0 %v3641_v22, %s3133_s28 }
 0x61e   : > { %2196 = vrot.lane.b32.xlu1 %v3657_v38, %s3133_s28  ;;  %2194 = vrot.lane.b32.xlu0 %v3653_v35, %s3133_s28 }
 0x622   : > { %2200 = vrot.lane.b32.xlu1 %v3669_v56, %s3133_s28  ;;  %2198 = vrot.lane.b32.xlu0 %v3665_v49, %s3133_s28 }
 0x626   : > { %2204 = vrot.lane.b32.xlu1 %v3681_v31, %s3133_s28  ;;  %2202 = vrot.lane.b32.xlu0 %v3677_v28, %s3133_s28 }
 0x62a   : > { %2208 = vrot.lane.b32.xlu1 %v3647_v11, %s3133_s28  ;;  %2206 = vrot.lane.b32.xlu0 %v3643_v3, %s3133_s28 }
 0x62e   : > { %2212 = vrot.lane.b32.xlu1 %v3659_v39, %s3133_s28  ;;  %2210 = vrot.lane.b32.xlu0 %v3655_v36, %s3133_s28 }
 0x632   : > { %2216 = vrot.lane.b32.xlu1 %v3671_v57, %s3133_s28  ;;  %2214 = vrot.lane.b32.xlu0 %v3667_v17, %s3133_s28 }
 0x636   : > { %2220 = vrot.lane.b32.xlu1 %v3683_v60, %s3133_s28  ;;  %2218 = vrot.lane.b32.xlu0 %v3679_v29, %s3133_s28 }
 0x66c   : > { %v2131_v8 = vpop.permute.xlu1 %2130  ;;  %v2127_v7 = vpop.permute.xlu0 %2126 }
 0x66d   : > { %v2174_v40 = vadd.f32 %v2127_v7, %v3641_v22  ;;  %v2176_v47 = vadd.f32 %v2131_v8, %v3653_v35  ;;  %v3784_v22 = vld [vmem:[%s3890_s7] ss:$0 sm:$0xff] }
 0x670   : > { %v2133_v24 = vpop.permute.xlu1 %2132  ;;  %v2129_v10 = vpop.permute.xlu0 %2128 }
 0x671   : > { %v2175_v41 = vadd.f32 %v2129_v10, %v3645_v6  ;;  %v2177_v25 = vadd.f32 %v2133_v24, %v3657_v38 }
 0x674   : > { %v2137_v26 = vpop.permute.xlu1 %2136  ;;  %v2135_v27 = vpop.permute.xlu0 %2134 }
 0x675   : > { %v2179_v45 = vadd.f32 %v2137_v26, %v3669_v56  ;;  %v2178_v18 = vadd.f32 %v2135_v27, %v3665_v49 }
 0x678   : > { %v2141_v32 = vpop.permute.xlu1 %2140  ;;  %v2139_v30 = vpop.permute.xlu0 %2138 }
 0x679   : > { %v2181_v9 = vadd.f32 %v2141_v32, %v3681_v31  ;;  %v2180_v21 = vadd.f32 %v2139_v30, %v3677_v28 }
 0x67c   : > { %v2145_v33 = vpop.permute.xlu1 %2144  ;;  %v2143_v1 = vpop.permute.xlu0 %2142 }
 0x67d   : > { %v2183_v32 = vadd.f32 %v2145_v33, %v3647_v11  ;;  %v2182_v30 = vadd.f32 %v2143_v1, %v3643_v3 }
 0x680   : > { %v3760_v13 = vpop.permute.xlu1 %2148  ;;  %v3762_v61 = vpop.permute.xlu0 %2146 }
 0x684   : > { %v3764_v14 = vpop.permute.xlu1 %2152  ;;  %v3766_v34 = vpop.permute.xlu0 %2150 }
 0x688   : > { %v3768_v0 = vpop.permute.xlu1 %2156  ;;  %v3770_v37 = vpop.permute.xlu0 %2154 }
 0x68c   : > { %v2193_v42 = vpop.permute.xlu1 %2192  ;;  %v2191_v19 = vpop.permute.xlu0 %2190 }
 0x68d   : > { %v2239_v23 = vadd.f32 %v2193_v42, %v2175_v41  ;;  %v2238_v43 = vadd.f32 %v2191_v19, %v2174_v40 }
 0x68f   : > { %v2255_v20 = vmul.f32 0.33333334, %v2239_v23  ;;  %v2254_v15 = vmul.f32 0.33333334, %v2238_v43 }
 0x690   : > { %v2197_v6 = vpop.permute.xlu1 %2196  ;;  %v2195_v16 = vpop.permute.xlu0 %2194 }
 0x691   : > { %v2278_v50 = vmul.f32 %v3777_v46, %v2255_v20  ;;  %v2277_v51 = vmul.f32 %v3777_v46, %v2254_v15  ;;  %v2241_v52 = vadd.f32 %v2197_v6, %v2177_v25  ;;  %v2240_v53 = vadd.f32 %v2195_v16, %v2176_v47 }
 0x693   : > { %v2301_v54 = vadd.f32 %v3784_v22, %v2278_v50  ;;  %v2300_v35 = vadd.f32 %v3784_v22, %v2277_v51  ;;  %v2257_v38 = vmul.f32 0.33333334, %v2241_v52  ;;  %v2256_v55 = vmul.f32 0.33333334, %v2240_v53 }
 0x694   : > { %v2201_v58 = vpop.permute.xlu1 %2200  ;;  %v2199_v59 = vpop.permute.xlu0 %2198  ;;  %v2185_v50 = vadd.f32 %v3760_v13, %v3659_v39  ;;  %v2184_v51 = vadd.f32 %v3762_v61, %v3655_v36  ;;  %v2187_v39 = vadd.f32 %v3764_v14, %v3671_v57  ;;  %v2186_v36 = vadd.f32 %v3766_v34, %v3667_v17 }
 0x695   : > { %v2317_v44 = vmax.f32 %v2301_v54, 0.0  ;;  %v2316_v48 = vmax.f32 %v2300_v35, 0.0  ;;  %v2280_v62 = vmul.f32 %v3777_v46, %v2257_v38  ;;  %v2279_v63 = vmul.f32 %v3777_v46, %v2256_v55 }
 0x696   : > { %v2243_v2 = vadd.f32 %v2201_v58, %v2179_v45  ;;  %v2242_v12 = vadd.f32 %v2199_v59, %v2178_v18 }
 0x697   : > { %2334 = vst.msk [vmem:[%s3222_s20 + $0x8] sm:$0xff] %vm2332_vm3, %v2317_v44  ;;  %2333 = vst.msk [vmem:[%s3222_s20] sm:$0xff] %vm2332_vm3, %v2316_v48  ;;  %v2303_v49 = vadd.f32 %v3784_v22, %v2280_v62  ;;  %v2302_v56 = vadd.f32 %v3784_v22, %v2279_v63 }
 0x698   : > { %v2259_v4 = vmul.f32 0.33333334, %v2243_v2  ;;  %v2258_v5 = vmul.f32 0.33333334, %v2242_v12  ;;  %v2205_v8 = vpop.permute.xlu1 %2204  ;;  %v2203_v7 = vpop.permute.xlu0 %2202  ;;  %v2189_v2 = vadd.f32 %v3768_v0, %v3683_v60  ;;  %v2188_v12 = vadd.f32 %v3770_v37, %v3679_v29 }
 0x699   : > { %v2319_v24 = vmax.f32 %v2303_v49, 0.0  ;;  %v2318_v10 = vmax.f32 %v2302_v56, 0.0  ;;  %v2245_v26 = vadd.f32 %v2205_v8, %v2181_v9  ;;  %v2244_v31 = vadd.f32 %v2203_v7, %v2180_v21 }
 0x69a   : > { %v2282_v28 = vmul.f32 %v3777_v46, %v2259_v4  ;;  %v2281_v27 = vmul.f32 %v3777_v46, %v2258_v5 }
 0x69b   : > { %2336 = vst.msk [vmem:[%s3222_s20 + $0x18] sm:$0xff] %vm2332_vm3, %v2319_v24  ;;  %2335 = vst.msk [vmem:[%s3222_s20 + $0x10] sm:$0xff] %vm2332_vm3, %v2318_v10  ;;  %v2261_v40 = vmul.f32 0.33333334, %v2245_v26  ;;  %v2260_v41 = vmul.f32 0.33333334, %v2244_v31 }
 0x69c   : > { %v2305_v42 = vadd.f32 %v3784_v22, %v2282_v28  ;;  %v2304_v19 = vadd.f32 %v3784_v22, %v2281_v27  ;;  %v2209_v23 = vpop.permute.xlu1 %2208  ;;  %v2207_v43 = vpop.permute.xlu0 %2206 }
 0x69d   : > { %v2284_v47 = vmul.f32 %v3777_v46, %v2261_v40  ;;  %v2283_v11 = vmul.f32 %v3777_v46, %v2260_v41  ;;  %v2247_v33 = vadd.f32 %v2209_v23, %v2183_v32  ;;  %v2246_v3 = vadd.f32 %v2207_v43, %v2182_v30 }
 0x69e   : > { %v2321_v1 = vmax.f32 %v2305_v42, 0.0  ;;  %v2320_v25 = vmax.f32 %v2304_v19, 0.0 }
 0x69f   : > { %v2307_v20 = vadd.f32 %v3784_v22, %v2284_v47  ;;  %v2306_v15 = vadd.f32 %v3784_v22, %v2283_v11  ;;  %v2263_v6 = vmul.f32 0.33333334, %v2247_v33  ;;  %v2262_v16 = vmul.f32 0.33333334, %v2246_v3 }
 0x6a0   : > { %2338 = vst.msk [vmem:[%s3222_s20 + $0x28] sm:$0xff] %vm2332_vm3, %v2321_v1  ;;  %2337 = vst.msk [vmem:[%s3222_s20 + $0x20] sm:$0xff] %vm2332_vm3, %v2320_v25  ;;  %v2213_v52 = vpop.permute.xlu1 %2212  ;;  %v2211_v53 = vpop.permute.xlu0 %2210 }
 0x6a1   : > { %v2323_v54 = vmax.f32 %v2307_v20, 0.0  ;;  %v2322_v35 = vmax.f32 %v2306_v15, 0.0  ;;  %v2286_v38 = vmul.f32 %v3777_v46, %v2263_v6  ;;  %v2285_v55 = vmul.f32 %v3777_v46, %v2262_v16 }
 0x6a2   : > { %v2249_v45 = vadd.f32 %v2213_v52, %v2185_v50  ;;  %v2248_v18 = vadd.f32 %v2211_v53, %v2184_v51 }
 0x6a3   : > { %2340 = vst.msk [vmem:[%s3222_s20 + $0x38] sm:$0xff] %vm2332_vm3, %v2323_v54  ;;  %2339 = vst.msk [vmem:[%s3222_s20 + $0x30] sm:$0xff] %vm2332_vm3, %v2322_v35  ;;  %v2309_v13 = vadd.f32 %v3784_v22, %v2286_v38  ;;  %v2308_v61 = vadd.f32 %v3784_v22, %v2285_v55 }
 0x6a4   : > { %v2265_v58 = vmul.f32 0.33333334, %v2249_v45  ;;  %v2264_v59 = vmul.f32 0.33333334, %v2248_v18  ;;  %v2217_v44 = vpop.permute.xlu1 %2216  ;;  %v2215_v48 = vpop.permute.xlu0 %2214 }
 0x6a5   : > { %v2325_v62 = vmax.f32 %v2309_v13, 0.0  ;;  %v2324_v63 = vmax.f32 %v2308_v61, 0.0  ;;  %v2251_v57 = vadd.f32 %v2217_v44, %v2187_v39  ;;  %v2250_v14 = vadd.f32 %v2215_v48, %v2186_v36 }
 0x6a6   : > { %v2288_v17 = vmul.f32 %v3777_v46, %v2265_v58  ;;  %v2287_v34 = vmul.f32 %v3777_v46, %v2264_v59 }
 0x6a7   : > { %2342 = vst.msk [vmem:[%s3222_s20 + $0x48] sm:$0xff] %vm2332_vm3, %v2325_v62  ;;  %2341 = vst.msk [vmem:[%s3222_s20 + $0x40] sm:$0xff] %vm2332_vm3, %v2324_v63  ;;  %v2267_v9 = vmul.f32 0.33333334, %v2251_v57  ;;  %v2266_v21 = vmul.f32 0.33333334, %v2250_v14 }
 0x6a8   : > { %v2311_v49 = vadd.f32 %v3784_v22, %v2288_v17  ;;  %v2310_v56 = vadd.f32 %v3784_v22, %v2287_v34  ;;  %v2221_v4 = vpop.permute.xlu1 %2220  ;;  %v2219_v5 = vpop.permute.xlu0 %2218 }
 0x6a9   : > { %v2290_v8 = vmul.f32 %v3777_v46, %v2267_v9  ;;  %v2289_v60 = vmul.f32 %v3777_v46, %v2266_v21  ;;  %v2253_v29 = vadd.f32 %v2221_v4, %v2189_v2  ;;  %v2252_v0 = vadd.f32 %v2219_v5, %v2188_v12 }
 0x6aa   : > { %v2327_v37 = vmax.f32 %v2311_v49, 0.0  ;;  %v2326_v7 = vmax.f32 %v2310_v56, 0.0 }
 0x6ab   : > { %v2313_v24 = vadd.f32 %v3784_v22, %v2290_v8  ;;  %v2312_v10 = vadd.f32 %v3784_v22, %v2289_v60  ;;  %v2269_v26 = vmul.f32 0.33333334, %v2253_v29  ;;  %v2268_v31 = vmul.f32 0.33333334, %v2252_v0 }
 0x6ac   : > { %2344 = vst.msk [vmem:[%s3222_s20 + $0x58] sm:$0xff] %vm2332_vm3, %v2327_v37  ;;  %2343 = vst.msk [vmem:[%s3222_s20 + $0x50] sm:$0xff] %vm2332_vm3, %v2326_v7 }
 0x6ad   : > { %v2329_v28 = vmax.f32 %v2313_v24, 0.0  ;;  %v2328_v27 = vmax.f32 %v2312_v10, 0.0  ;;  %v2292_v32 = vmul.f32 %v3777_v46, %v2269_v26  ;;  %v2291_v30 = vmul.f32 %v3777_v46, %v2268_v31 }
 0x6af   : > { %2346 = vst.msk [vmem:[%s3222_s20 + $0x68] sm:$0xff] %vm2332_vm3, %v2329_v28  ;;  %2345 = vst.msk [vmem:[%s3222_s20 + $0x60] sm:$0xff] %vm2332_vm3, %v2328_v27  ;;  %v2315_v40 = vadd.f32 %v3784_v22, %v2292_v32  ;;  %v2314_v41 = vadd.f32 %v3784_v22, %v2291_v30 }
 0x6b1   : > { %v2331_v42 = vmax.f32 %v2315_v40, 0.0  ;;  %v2330_v19 = vmax.f32 %v2314_v41, 0.0 }
 0x6b3   : > { %2348 = vst.msk [vmem:[%s3222_s20 + $0x78] sm:$0xff] %vm2332_vm3, %v2331_v42  ;;  %2347 = vst.msk [vmem:[%s3222_s20 + $0x70] sm:$0xff] %vm2332_vm3, %v2330_v19 }
 0x6b4 PF: > { %s18_s9 = sadd.s32 1, %s3128_s9   ;;  %s3892_s27 = smov %s3120_s29 }
 0x6b5   : > { %p15_p2 = scmp.ge.s32.totalorder %s18_s9, 10   ;;  %s3893_s28 = smov %s3124_s30 }
 0x6b6   : > { %s3894_s29 = smov %s3897_s10  ;;  %s3895_s30 = smov %s3901_s11 }
 0x6b7   :  { %17 = sbr.rel (!%p15_p2) target bundleno = 3 (0x3), region = 117 }

</bundles_post_ra>
